<compile_context>
chip_gen: v7x
topology: tpu7x:2x2x1
jax: 0.10.0
libtpu: 0.0.40
codegen_flags: <defaults>
</compile_context>

<pallas_src>
import numpy as np

import jax
import jax.numpy as jnp
from jax.experimental import pallas as pl
from jax.experimental.pallas import tpu as pltpu

BN_EPS = 1e-5

# ---------------------------------------------------------------------------
# Static geometry for the stride-2 ConvTranspose2d(4x4, pad=1) decomposition.
# Output row 2m+a receives input rows {m-1, m} (a=0, kernel rows p={3,1}) or
# {m, m+1} (a=1, kernel rows p={2,0}); same for columns.
# ---------------------------------------------------------------------------
_ROWS = ((0, 1), (1, 2))      # 3x3-neighborhood tap indices used by parity a
_PVAL = ((3, 1), (2, 0))      # matching 4x4 transposed-conv kernel row index p

DECONV_TAPS = []              # [phase][subtap] -> tap index into the 3x3 selection set
DECONV_PQ = []                # [phase][subtap] -> (p, q) into the 4x4 kernel
for _a in range(2):
    for _b in range(2):
        _taps, _pq = [], []
        for _ir in range(2):
            for _ic in range(2):
                _taps.append(_ROWS[_a][_ir] * 3 + _ROWS[_b][_ic])
                _pq.append((_PVAL[_a][_ir], _PVAL[_b][_ic]))
        DECONV_TAPS.append(tuple(_taps))
        DECONV_PQ.append(tuple(_pq))


# ---------------------------------------------------------------------------
# Host-side constant builders (numpy, folded at trace time)
# ---------------------------------------------------------------------------
def _selection_matrices(h_in, w_in, h_out, w_out, ksize, stride, pad):
    """(ksize*ksize, h_out*w_out, h_in*w_in) 0/1 gather matrices, one per tap."""
    S = np.zeros((ksize * ksize, h_out * w_out, h_in * w_in), np.float32)
    for tr in range(ksize):
        for tc in range(ksize):
            t = tr * ksize + tc
            for yo in range(h_out):
                for xo in range(w_out):
                    yi = stride * yo + tr - pad
                    xi = stride * xo + tc - pad
                    if 0 <= yi < h_in and 0 <= xi < w_in:
                        S[t, yo * w_out + xo, yi * w_in + xi] = 1.0
    return S


def _depth_to_space_matrices(h, w):
    """(4, (2h)*(2w), h*w): phase (a,b) scatter of the low-res grid into 2x grid."""
    D = np.zeros((4, 4 * h * w, h * w), np.float32)
    for a in range(2):
        for b in range(2):
            ph = a * 2 + b
            for m in range(h):
                for n in range(w):
                    D[ph, (2 * m + a) * (2 * w) + (2 * n + b), m * w + n] = 1.0
    return D


def _bn_scale(gamma):
    # eval-mode BN with running_mean=0, running_var=1
    return gamma / jnp.sqrt(1.0 + BN_EPS)


def _im2col(x, kh, kw, stride, pad):
    """x: (N, H, W, C) -> patches (N*Ho*Wo, kh*kw*C).  Used only on the input."""
    if pad:
        x = jnp.pad(x, ((0, 0), (pad, pad), (pad, pad), (0, 0)))
    N, H, W, C = x.shape
    Ho = (H - kh) // stride + 1
    Wo = (W - kw) // stride + 1
    cols = []
    for i in range(kh):
        for j in range(kw):
            cols.append(x[:, i:i + stride * Ho:stride, j:j + stride * Wo:stride, :])
    patches = jnp.stack(cols, axis=3)                   # (N, Ho, Wo, kh*kw, C)
    return patches.reshape(N * Ho * Wo, kh * kw * C), (N, Ho, Wo)


# ---------------------------------------------------------------------------
# The fused Pallas kernel: one grid step == one image of the batch.
# ---------------------------------------------------------------------------
def _vqcvae_kernel(p1_ref, w1m_ref, w2_ref, w3_ref, w1x1_ref, wd1_ref, wd2_ref,
                   emb_ref, embt_ref, sel2_ref, sel3_ref, d2s_ref, sel8_ref,
                   sc_ref, bd2_ref,
                   ze_ref, zq_ref, amin_ref, rec_ref):
    f32 = jnp.float32
    bf16 = jnp.bfloat16
    d = w1x1_ref.shape[1]
    n_lat = sel3_ref.shape[1]            # latent pixels  (Hl*Wl)
    n_mid = sel8_ref.shape[1]            # mid-res pixels (Hm*Wm)
    n_blocks = w1x1_ref.shape[0]         # 4 res blocks
    i_sd1 = 4 + 4 * n_blocks             # scale rows for the first deconv BN

    def vrow(i):                         # (1, d) folded scale / shift row
        return sc_ref[i:i + 1, :]

    def mmw(a, w):                       # bf16 MXU feed, f32 accumulation
        return jnp.dot(a.astype(bf16), w, preferred_element_type=f32)

    def gather(sel, x):                  # exact f32 0/1-matrix spatial gather
        return jnp.dot(sel, x, preferred_element_type=f32)

    def patches(sel_ref, x, taps):       # (rows, len(taps)*d) lane-concatenated taps
        return jnp.concatenate([gather(sel_ref[t], x) for t in taps], axis=-1)

    # ---- encoder conv1: 4x4/s2/p1 (input pre-im2col'ed) + folded BN + ReLU
    h8 = jnp.maximum(mmw(p1_ref[...], w1m_ref[...]) * vrow(0) + vrow(1), 0.0)

    # ---- encoder conv2: 4x4/s2/p1 as ONE (n_lat, 16d) @ (16d, d) matmul
    p2 = patches(sel2_ref, h8, range(16))
    h4 = jnp.maximum(mmw(p2, w2_ref[...]) * vrow(2) + vrow(3), 0.0)

    # ---- ResBlock: x + Conv1x1(ReLU([BN](Conv3x3(ReLU(x))))); residual add and
    #      the BatchNorm following the block are folded into the 1x1 epilogue.
    #      The 3x3 conv is ONE (n_lat, 9d) @ (9d, d) matmul.
    def res_block(x, blk):
        base = 4 + 4 * blk
        h = jnp.maximum(x, 0.0)
        p = patches(sel3_ref, h, range(9))
        h = jnp.maximum(mmw(p, w3_ref[blk]) * vrow(base) + vrow(base + 1), 0.0)
        h = mmw(h, w1x1_ref[blk])
        return (x + h) * vrow(base + 2) + vrow(base + 3)

    e1 = res_block(h4, 0)
    z_e = res_block(e1, 1)               # trailing BN has gamma = 1/40
    ze_ref[...] = z_e

    # ---- vector quantization (f32 so the argmin stays exact) ----
    e = emb_ref[...]                     # (d, k)
    kk = e.shape[1]
    scores = jnp.dot(z_e, e, preferred_element_type=f32)              # (n_lat, k)
    e_sq = jnp.sum(e * e, axis=0, keepdims=True)                      # (1, k)
    dist = e_sq - 2.0 * scores           # ||z - e||^2 up to a per-row constant
    iota = jax.lax.broadcasted_iota(jnp.int32, dist.shape, 1)
    min_val = jnp.min(dist, axis=-1, keepdims=True)
    idx = jnp.min(jnp.where(dist == min_val, iota, kk), axis=-1, keepdims=True)
    amin_ref[...] = idx.astype(jnp.int32)
    onehot = (iota == idx).astype(f32)
    z_q = jnp.dot(onehot, embt_ref[...], preferred_element_type=f32)  # (n_lat, d)
    zq_ref[...] = z_q

    # ---- decoder res blocks (at latent resolution) ----
    g1 = res_block(z_q, 2)
    g2 = res_block(g1, 3)

    # ---- ConvTranspose(4x4,s2,p1) + BN + ReLU via the 4 stride^2 sub-kernels,
    #      one (n_lat, 4d) @ (4d, d) matmul per phase, then depth-to-space back
    #      to mid resolution, all in VMEM.
    g2_taps = [gather(sel3_ref[t], g2) for t in range(9)]
    u = jnp.zeros((n_mid, d), f32)
    for ph in range(4):
        p = jnp.concatenate([g2_taps[t] for t in DECONV_TAPS[ph]], axis=-1)
        a = jnp.maximum(mmw(p, wd1_ref[ph]) * vrow(i_sd1) + vrow(i_sd1 + 1), 0.0)
        u = u + gather(d2s_ref[ph], a)

    # ---- final ConvTranspose(4x4,s2,p1) + tanh; the 4 phase outputs are
    #      written as row blocks and interleaved to full resolution in glue.
    u_taps = [gather(sel8_ref[t], u) for t in range(9)]
    for ph in range(4):
        p = jnp.concatenate([u_taps[t] for t in DECONV_TAPS[ph]], axis=-1)
        a = mmw(p, wd2_ref[ph]) + bd2_ref[...]
        rec_ref[ph * n_mid:(ph + 1) * n_mid, :] = jnp.tanh(a)


# ---------------------------------------------------------------------------
# Parameter packing (folds biases into BN shifts, re-lays weights per layer)
# ---------------------------------------------------------------------------
def _pack_operands(params, d, num_channels):
    bf16 = jnp.bfloat16
    f32 = jnp.float32

    def conv_taps(w):
        # (co, ci, kh, kw) -> (kh*kw, ci, co): one (ci, co) matmul operand per tap
        co, ci, kh, kw = w.shape
        return jnp.transpose(w, (2, 3, 1, 0)).reshape(kh * kw, ci, co)

    # rows ordered (tap, ci) to match the lane-concatenated patches in-kernel
    w1m = conv_taps(params["enc_w1"]).reshape(-1, d).astype(bf16)        # (16*nc, d)
    w2 = conv_taps(params["enc_w2"]).reshape(-1, d).astype(bf16)         # (16*d, d)

    res_list = [params["enc_res1"], params["enc_res2"],
                params["dec_res1"], params["dec_res2"]]
    w3 = jnp.stack([conv_taps(p["w3"]).reshape(-1, d) for p in res_list],
                   0).astype(bf16)                                       # (4, 9d, d)
    w1x1 = jnp.stack([p["w1"][:, :, 0, 0].T for p in res_list], 0).astype(bf16)  # (4,d,d)

    # stride^2 sub-kernels of the transposed convs, sub-taps row-concatenated
    # per phase: (4, 4*ci, co)
    wd1 = jnp.stack([jnp.concatenate([params["dec_tw1"][:, :, p, q]
                                      for (p, q) in DECONV_PQ[ph]], 0)
                     for ph in range(4)], 0).astype(bf16)
    wd2 = jnp.stack([jnp.concatenate([params["dec_tw2"][:, :, p, q]
                                      for (p, q) in DECONV_PQ[ph]], 0)
                     for ph in range(4)], 0).astype(bf16)

    ones_d = jnp.ones((d,), f32)
    s1 = _bn_scale(params["enc_bn1_g"]); t1 = params["enc_b1"] * s1 + params["enc_bn1_b"]
    s2 = _bn_scale(params["enc_bn2_g"]); t2 = params["enc_b2"] * s2 + params["enc_bn2_b"]
    rows = [s1, t1, s2, t2]
    post_bn = [(params["enc_bn3_g"], params["enc_bn3_b"]),
               (params["enc_bn4_g"], params["enc_bn4_b"]),
               (params["dec_bn1_g"], params["dec_bn1_b"]),
               (None, None)]
    for p, (pg, pb) in zip(res_list, post_bn):
        if "bn_g" in p:                                   # mid BN (encoder blocks)
            s3 = _bn_scale(p["bn_g"]); t3 = p["b3"] * s3 + p["bn_b"]
        else:
            s3 = ones_d; t3 = p["b3"]
        if pg is None:                                    # no BN after the block
            sp = ones_d; tp = p["b1"]
        else:                                             # residual + BN folded
            sp = _bn_scale(pg); tp = p["b1"] * sp + pb
        rows += [s3, t3, sp, tp]
    sd1 = _bn_scale(params["dec_bn2_g"])
    td1 = params["dec_tb1"] * sd1 + params["dec_bn2_b"]
    rows += [sd1, td1]
    scales = jnp.stack(rows, 0).astype(f32)               # (4 + 4*4 + 2, d)

    return dict(
        w1m=w1m, w2=w2, w3=w3, w1x1=w1x1, wd1=wd1, wd2=wd2,
        emb=params["emb"].astype(f32), embt=params["emb"].T.astype(f32),
        scales=scales,
        bd2=params["dec_tb2"].reshape(1, num_channels).astype(f32))


# ---------------------------------------------------------------------------
# VQ_CVAE forward: NCHW in / NCHW out, one pallas_call
# ---------------------------------------------------------------------------
def vq_cvae_forward(params, x_nchw):
    N, nc, H, W = x_nchw.shape
    d = params["enc_w1"].shape[0]
    Hm, Wm = H // 2, W // 2                      # after conv1
    Hl, Wl = H // 4, W // 4                      # latent grid
    n_mid, n_lat = Hm * Wm, Hl * Wl

    x = jnp.transpose(x_nchw, (0, 2, 3, 1)).astype(jnp.float32)       # NHWC
    patches1, _ = _im2col(x, 4, 4, 2, 1)                              # (N*n_mid, 16*nc)

    ops = _pack_operands(params, d, nc)
    sel2 = jnp.asarray(_selection_matrices(Hm, Wm, Hl, Wl, 4, 2, 1))  # conv2 taps
    sel3 = jnp.asarray(_selection_matrices(Hl, Wl, Hl, Wl, 3, 1, 1))  # 3x3 @ latent
    sel8 = jnp.asarray(_selection_matrices(Hm, Wm, Hm, Wm, 3, 1, 1))  # 3x3 @ mid
    d2s = jnp.asarray(_depth_to_space_matrices(Hl, Wl))

    def cspec(shape):                             # full-array block, grid-invariant
        nd = len(shape)
        return pl.BlockSpec(shape, lambda n, _nd=nd: (0,) * _nd)

    in_specs = [
        pl.BlockSpec((n_mid, patches1.shape[1]), lambda n: (n, 0)),
        cspec(ops["w1m"].shape), cspec(ops["w2"].shape), cspec(ops["w3"].shape),
        cspec(ops["w1x1"].shape), cspec(ops["wd1"].shape), cspec(ops["wd2"].shape),
        cspec(ops["emb"].shape), cspec(ops["embt"].shape),
        cspec(sel2.shape), cspec(sel3.shape), cspec(d2s.shape), cspec(sel8.shape),
        cspec(ops["scales"].shape), cspec(ops["bd2"].shape),
    ]
    out_shape = (
        jax.ShapeDtypeStruct((N * n_lat, d), jnp.float32),            # z_e
        jax.ShapeDtypeStruct((N * n_lat, d), jnp.float32),            # z_q / emb
        jax.ShapeDtypeStruct((N * n_lat, 1), jnp.int32),              # argmin
        jax.ShapeDtypeStruct((N * 4 * n_mid, nc), jnp.float32),       # recon phases
    )
    out_specs = (
        pl.BlockSpec((n_lat, d), lambda n: (n, 0)),
        pl.BlockSpec((n_lat, d), lambda n: (n, 0)),
        pl.BlockSpec((n_lat, 1), lambda n: (n, 0)),
        pl.BlockSpec((4 * n_mid, nc), lambda n: (n, 0)),
    )

    ze2, zq2, amin2, rec_ph = pl.pallas_call(
        _vqcvae_kernel,
        out_shape=out_shape,
        grid=(N,),
        in_specs=in_specs,
        out_specs=out_specs,
        compiler_params=pltpu.CompilerParams(dimension_semantics=("parallel",)),
    )(patches1, ops["w1m"], ops["w2"], ops["w3"], ops["w1x1"], ops["wd1"],
      ops["wd2"], ops["emb"], ops["embt"], sel2, sel3, d2s, sel8,
      ops["scales"], ops["bd2"])

    z_e = ze2.reshape(N, Hl, Wl, d)
    z_q = zq2.reshape(N, Hl, Wl, d)
    argmin = amin2.reshape(N, Hl, Wl)
    rec = rec_ph.reshape(N, 2, 2, Hm, Wm, nc)                 # (n, a, b, y, x, c)
    rec = rec.transpose(0, 3, 1, 4, 2, 5).reshape(N, H, W, nc)

    return (jnp.transpose(rec, (0, 3, 1, 2)),                 # decode(z_q)  NCHW
            jnp.transpose(z_e, (0, 3, 1, 2)),                 # z_e          NCHW
            jnp.transpose(z_q, (0, 3, 1, 2)),                 # emb          NCHW
            argmin)                                            # (N, Hl, Wl)


# ---------------------------------------------------------------------------
# Pure-XLA reference (same bf16 MXU feed) - used only for the self-check
# ---------------------------------------------------------------------------
def _conv_ref(x, w, b, stride, pad):
    out = jax.lax.conv_general_dilated(
        x.astype(jnp.bfloat16),
        jnp.transpose(w, (2, 3, 1, 0)).astype(jnp.bfloat16),
        window_strides=(stride, stride),
        padding=[(pad, pad), (pad, pad)],
        dimension_numbers=("NHWC", "HWIO", "NHWC"),
        preferred_element_type=jnp.float32)
    return out + b.reshape(1, 1, 1, -1)


def _deconv_ref(x, w_t, b, stride, pad):
    ci, co, kh, kw = w_t.shape
    w_eq = jnp.transpose(w_t[:, :, ::-1, ::-1], (2, 3, 0, 1))
    out = jax.lax.conv_general_dilated(
        x.astype(jnp.bfloat16), w_eq.astype(jnp.bfloat16),
        window_strides=(1, 1),
        padding=[(kh - 1 - pad, kh - 1 - pad), (kw - 1 - pad, kw - 1 - pad)],
        lhs_dilation=(stride, stride),
        dimension_numbers=("NHWC", "HWIO", "NHWC"),
        preferred_element_type=jnp.float32)
    return out + b.reshape(1, 1, 1, -1)


def vq_cvae_reference(params, x_nchw):
    x = jnp.transpose(x_nchw, (0, 2, 3, 1)).astype(jnp.float32)

    def bn(h, g, b):
        return h * _bn_scale(g) + b

    def res(h, p):
        r = jnp.maximum(h, 0.0)
        r = _conv_ref(r, p["w3"], p["b3"], 1, 1)
        if "bn_g" in p:
            r = bn(r, p["bn_g"], p["bn_b"])
        r = jnp.maximum(r, 0.0)
        r = _conv_ref(r, p["w1"], p["b1"], 1, 0)
        return h + r

    h = jnp.maximum(bn(_conv_ref(x, params["enc_w1"], params["enc_b1"], 2, 1),
                       params["enc_bn1_g"], params["enc_bn1_b"]), 0.0)
    h = jnp.maximum(bn(_conv_ref(h, params["enc_w2"], params["enc_b2"], 2, 1),
                       params["enc_bn2_g"], params["enc_bn2_b"]), 0.0)
    h = bn(res(h, params["enc_res1"]), params["enc_bn3_g"], params["enc_bn3_b"])
    z_e = bn(res(h, params["enc_res2"]), params["enc_bn4_g"], params["enc_bn4_b"])

    N, Hl, Wl, d = z_e.shape
    zf = z_e.reshape(-1, d)
    e = params["emb"]
    dist = jnp.sum(e * e, axis=0)[None, :] - 2.0 * zf @ e
    am = jnp.argmin(dist, axis=-1)
    z_q = e.T[am].reshape(N, Hl, Wl, d)

    g = bn(res(z_q, params["dec_res1"]), params["dec_bn1_g"], params["dec_bn1_b"])
    g = res(g, params["dec_res2"])
    g = jnp.maximum(bn(_deconv_ref(g, params["dec_tw1"], params["dec_tb1"], 2, 1),
                       params["dec_bn2_g"], params["dec_bn2_b"]), 0.0)
    rec = jnp.tanh(_deconv_ref(g, params["dec_tw2"], params["dec_tb2"], 2, 1))
    return (jnp.transpose(rec, (0, 3, 1, 2)), jnp.transpose(z_e, (0, 3, 1, 2)),
            jnp.transpose(z_q, (0, 3, 1, 2)), am.reshape(N, Hl, Wl))


# ---------------------------------------------------------------------------
# Deterministic parameter init (shapes from VQ_CVAE.__init__)
# ---------------------------------------------------------------------------
def init_params(key, d=16, k=10, num_channels=3):
    keys = jax.random.split(key, 12)
    nrm = lambda kk, shp: (0.02 * jax.random.normal(kk, shp, jnp.float32))
    ones = lambda n: jnp.ones((n,), jnp.float32)
    zeros = lambda n: jnp.zeros((n,), jnp.float32)

    def resb(kk, with_bn):
        k1, k2 = jax.random.split(kk)
        p = {"w3": nrm(k1, (d, d, 3, 3)), "b3": zeros(d),
             "w1": nrm(k2, (d, d, 1, 1)), "b1": zeros(d)}
        if with_bn:
            p["bn_g"], p["bn_b"] = ones(d), zeros(d)
        return p

    return {
        "enc_w1": nrm(keys[0], (d, num_channels, 4, 4)), "enc_b1": zeros(d),
        "enc_bn1_g": ones(d), "enc_bn1_b": zeros(d),
        "enc_w2": nrm(keys[1], (d, d, 4, 4)), "enc_b2": zeros(d),
        "enc_bn2_g": ones(d), "enc_bn2_b": zeros(d),
        "enc_res1": resb(keys[2], True),
        "enc_bn3_g": ones(d), "enc_bn3_b": zeros(d),
        "enc_res2": resb(keys[3], True),
        "enc_bn4_g": jnp.full((d,), 1.0 / 40.0, jnp.float32), "enc_bn4_b": zeros(d),
        "emb": nrm(keys[4], (d, k)),
        "dec_res1": resb(keys[5], False),
        "dec_bn1_g": ones(d), "dec_bn1_b": zeros(d),
        "dec_res2": resb(keys[6], False),
        "dec_tw1": nrm(keys[7], (d, d, 4, 4)), "dec_tb1": zeros(d),
        "dec_bn2_g": ones(d), "dec_bn2_b": zeros(d),
        "dec_tw2": nrm(keys[8], (d, num_channels, 4, 4)), "dec_tb2": zeros(num_channels),
    }


if __name__ == "__main__":
    key = jax.random.PRNGKey(0)
    k_param, k_x = jax.random.split(key)
    d, k, num_channels = 16, 10, 3
    params = init_params(k_param, d=d, k=k, num_channels=num_channels)

    x = jax.random.normal(k_x, (2, num_channels, 16, 16), jnp.float32)   # NCHW

    fwd = jax.jit(vq_cvae_forward)
    recon, z_e, emb, argmin = fwd(params, x)
    jax.block_until_ready((recon, z_e, emb, argmin))

    assert recon.shape == (2, num_channels, 16, 16)
    assert z_e.shape == (2, d, 4, 4)
    assert emb.shape == (2, d, 4, 4)
    assert argmin.shape == (2, 4, 4)

    # numerical self-check against a pure-XLA reference with the same bf16 feed
    r_rec, r_ze, r_emb, r_am = jax.jit(vq_cvae_reference)(params, x)
    np.testing.assert_allclose(np.asarray(z_e), np.asarray(r_ze), atol=2e-5, rtol=0)
    np.testing.assert_allclose(np.asarray(emb), np.asarray(r_emb), atol=2e-5, rtol=0)
    np.testing.assert_allclose(np.asarray(recon), np.asarray(r_rec), atol=2e-5, rtol=0)
    assert int(np.sum(np.asarray(argmin) != np.asarray(r_am))) == 0

    print("KERNEL_OK")
</pallas_src>

<mosaic_0001>
module attributes {stable_mosaic.version = 11 : i64} {
  func.func @_vqcvae_kernel(%arg0: i32, %arg1: memref<64x48xf32, #tpu.memory_space<vmem>>, %arg2: memref<48x16xbf16, #tpu.memory_space<vmem>>, %arg3: memref<256x16xbf16, #tpu.memory_space<vmem>>, %arg4: memref<4x144x16xbf16, #tpu.memory_space<vmem>>, %arg5: memref<4x16x16xbf16, #tpu.memory_space<vmem>>, %arg6: memref<4x64x16xbf16, #tpu.memory_space<vmem>>, %arg7: memref<4x64x3xbf16, #tpu.memory_space<vmem>>, %arg8: memref<16x10xf32, #tpu.memory_space<vmem>>, %arg9: memref<10x16xf32, #tpu.memory_space<vmem>>, %arg10: memref<16x16x64xf32, #tpu.memory_space<vmem>>, %arg11: memref<9x16x16xf32, #tpu.memory_space<vmem>>, %arg12: memref<4x64x16xf32, #tpu.memory_space<vmem>>, %arg13: memref<9x64x64xf32, #tpu.memory_space<vmem>>, %arg14: memref<22x16xf32, #tpu.memory_space<vmem>>, %arg15: memref<1x3xf32, #tpu.memory_space<vmem>>, %arg16: memref<16x16xf32, #tpu.memory_space<vmem>>, %arg17: memref<16x16xf32, #tpu.memory_space<vmem>>, %arg18: memref<16x1xi32, #tpu.memory_space<vmem>>, %arg19: memref<256x3xf32, #tpu.memory_space<vmem>>) attributes {dimension_semantics = [#tpu.dimension_semantics<parallel>], iteration_bounds = array<i64: 2>, scalar_prefetch = 0 : i64, scratch_operands = 0 : i64, tpu.core_type = #tpu.core_type<tc>, window_params = [{transform_indices = @transform_0, window_bounds = array<i64: 64, 48>}, {pipeline_mode = #tpu.pipeline_mode<synchronous>, transform_indices = @transform_1, window_bounds = array<i64: 48, 16>}, {pipeline_mode = #tpu.pipeline_mode<synchronous>, transform_indices = @transform_2, window_bounds = array<i64: 256, 16>}, {pipeline_mode = #tpu.pipeline_mode<synchronous>, transform_indices = @transform_3, window_bounds = array<i64: 4, 144, 16>}, {pipeline_mode = #tpu.pipeline_mode<synchronous>, transform_indices = @transform_4, window_bounds = array<i64: 4, 16, 16>}, {pipeline_mode = #tpu.pipeline_mode<synchronous>, transform_indices = @transform_5, window_bounds = array<i64: 4, 64, 16>}, {pipeline_mode = #tpu.pipeline_mode<synchronous>, transform_indices = @transform_6, window_bounds = array<i64: 4, 64, 3>}, {pipeline_mode = #tpu.pipeline_mode<synchronous>, transform_indices = @transform_7, window_bounds = array<i64: 16, 10>}, {pipeline_mode = #tpu.pipeline_mode<synchronous>, transform_indices = @transform_8, window_bounds = array<i64: 10, 16>}, {pipeline_mode = #tpu.pipeline_mode<synchronous>, transform_indices = @transform_9, window_bounds = array<i64: 16, 16, 64>}, {pipeline_mode = #tpu.pipeline_mode<synchronous>, transform_indices = @transform_10, window_bounds = array<i64: 9, 16, 16>}, {pipeline_mode = #tpu.pipeline_mode<synchronous>, transform_indices = @transform_11, window_bounds = array<i64: 4, 64, 16>}, {pipeline_mode = #tpu.pipeline_mode<synchronous>, transform_indices = @transform_12, window_bounds = array<i64: 9, 64, 64>}, {pipeline_mode = #tpu.pipeline_mode<synchronous>, transform_indices = @transform_13, window_bounds = array<i64: 22, 16>}, {pipeline_mode = #tpu.pipeline_mode<synchronous>, transform_indices = @transform_14, window_bounds = array<i64: 1, 3>}, {transform_indices = @transform_15, window_bounds = array<i64: 16, 16>}, {transform_indices = @transform_16, window_bounds = array<i64: 16, 16>}, {transform_indices = @transform_17, window_bounds = array<i64: 16, 1>}, {transform_indices = @transform_18, window_bounds = array<i64: 256, 3>}]} {
    %c0 = arith.constant 0 : index
    %c0_0 = arith.constant 0 : index
    %0 = vector.load %arg1[%c0, %c0_0] : memref<64x48xf32, #tpu.memory_space<vmem>>, vector<64x48xf32>
    %c0_1 = arith.constant 0 : index
    %c0_2 = arith.constant 0 : index
    %1 = vector.load %arg2[%c0_1, %c0_2] : memref<48x16xbf16, #tpu.memory_space<vmem>>, vector<48x16xbf16>
    %2 = arith.truncf %0 : vector<64x48xf32> to vector<64x48xbf16>
    %cst = arith.constant dense<0.000000e+00> : vector<64x16xf32>
    %3 = tpu.matmul %2, %1, %cst {dimension_numbers = #tpu.dot_dimension_numbers<[1], [0], [0], [1], [0, 0, 1, 1], [], []>} : vector<64x48xbf16>, vector<48x16xbf16>, vector<64x16xf32> -> vector<64x16xf32>
    %c0_3 = arith.constant 0 : index
    %c0_4 = arith.constant 0 : index
    %4 = vector.load %arg14[%c0_3, %c0_4] : memref<22x16xf32, #tpu.memory_space<vmem>>, vector<1x16xf32>
    %5 = vector.broadcast %4 : vector<1x16xf32> to vector<64x16xf32>
    %6 = arith.mulf %3, %5 : vector<64x16xf32>
    %c1 = arith.constant 1 : index
    %c0_5 = arith.constant 0 : index
    %7 = vector.load %arg14[%c1, %c0_5] : memref<22x16xf32, #tpu.memory_space<vmem>>, vector<1x16xf32>
    %8 = vector.broadcast %7 : vector<1x16xf32> to vector<64x16xf32>
    %9 = arith.addf %6, %8 : vector<64x16xf32>
    %cst_6 = arith.constant 0.000000e+00 : f32
    %10 = vector.broadcast %cst_6 : f32 to vector<64x16xf32>
    %11 = arith.maximumf %9, %10 : vector<64x16xf32>
    %c0_7 = arith.constant 0 : index
    %c0_8 = arith.constant 0 : index
    %c0_9 = arith.constant 0 : index
    %12 = vector.load %arg10[%c0_7, %c0_8, %c0_9] : memref<16x16x64xf32, #tpu.memory_space<vmem>>, vector<1x16x64xf32>
    %13 = vector.shape_cast %12 : vector<1x16x64xf32> to vector<16x64xf32>
    %cst_10 = arith.constant dense<0.000000e+00> : vector<16x16xf32>
    %14 = tpu.matmul %13, %11, %cst_10 {dimension_numbers = #tpu.dot_dimension_numbers<[1], [0], [0], [1], [0, 0, 1, 1], [], []>} : vector<16x64xf32>, vector<64x16xf32>, vector<16x16xf32> -> vector<16x16xf32>
    %c1_11 = arith.constant 1 : index
    %c0_12 = arith.constant 0 : index
    %c0_13 = arith.constant 0 : index
    %15 = vector.load %arg10[%c1_11, %c0_12, %c0_13] : memref<16x16x64xf32, #tpu.memory_space<vmem>>, vector<1x16x64xf32>
    %16 = vector.shape_cast %15 : vector<1x16x64xf32> to vector<16x64xf32>
    %cst_14 = arith.constant dense<0.000000e+00> : vector<16x16xf32>
    %17 = tpu.matmul %16, %11, %cst_14 {dimension_numbers = #tpu.dot_dimension_numbers<[1], [0], [0], [1], [0, 0, 1, 1], [], []>} : vector<16x64xf32>, vector<64x16xf32>, vector<16x16xf32> -> vector<16x16xf32>
    %c2 = arith.constant 2 : index
    %c0_15 = arith.constant 0 : index
    %c0_16 = arith.constant 0 : index
    %18 = vector.load %arg10[%c2, %c0_15, %c0_16] : memref<16x16x64xf32, #tpu.memory_space<vmem>>, vector<1x16x64xf32>
    %19 = vector.shape_cast %18 : vector<1x16x64xf32> to vector<16x64xf32>
    %cst_17 = arith.constant dense<0.000000e+00> : vector<16x16xf32>
    %20 = tpu.matmul %19, %11, %cst_17 {dimension_numbers = #tpu.dot_dimension_numbers<[1], [0], [0], [1], [0, 0, 1, 1], [], []>} : vector<16x64xf32>, vector<64x16xf32>, vector<16x16xf32> -> vector<16x16xf32>
    %c3 = arith.constant 3 : index
    %c0_18 = arith.constant 0 : index
    %c0_19 = arith.constant 0 : index
    %21 = vector.load %arg10[%c3, %c0_18, %c0_19] : memref<16x16x64xf32, #tpu.memory_space<vmem>>, vector<1x16x64xf32>
    %22 = vector.shape_cast %21 : vector<1x16x64xf32> to vector<16x64xf32>
    %cst_20 = arith.constant dense<0.000000e+00> : vector<16x16xf32>
    %23 = tpu.matmul %22, %11, %cst_20 {dimension_numbers = #tpu.dot_dimension_numbers<[1], [0], [0], [1], [0, 0, 1, 1], [], []>} : vector<16x64xf32>, vector<64x16xf32>, vector<16x16xf32> -> vector<16x16xf32>
    %c4 = arith.constant 4 : index
    %c0_21 = arith.constant 0 : index
    %c0_22 = arith.constant 0 : index
    %24 = vector.load %arg10[%c4, %c0_21, %c0_22] : memref<16x16x64xf32, #tpu.memory_space<vmem>>, vector<1x16x64xf32>
    %25 = vector.shape_cast %24 : vector<1x16x64xf32> to vector<16x64xf32>
    %cst_23 = arith.constant dense<0.000000e+00> : vector<16x16xf32>
    %26 = tpu.matmul %25, %11, %cst_23 {dimension_numbers = #tpu.dot_dimension_numbers<[1], [0], [0], [1], [0, 0, 1, 1], [], []>} : vector<16x64xf32>, vector<64x16xf32>, vector<16x16xf32> -> vector<16x16xf32>
    %c5 = arith.constant 5 : index
    %c0_24 = arith.constant 0 : index
    %c0_25 = arith.constant 0 : index
    %27 = vector.load %arg10[%c5, %c0_24, %c0_25] : memref<16x16x64xf32, #tpu.memory_space<vmem>>, vector<1x16x64xf32>
    %28 = vector.shape_cast %27 : vector<1x16x64xf32> to vector<16x64xf32>
    %cst_26 = arith.constant dense<0.000000e+00> : vector<16x16xf32>
    %29 = tpu.matmul %28, %11, %cst_26 {dimension_numbers = #tpu.dot_dimension_numbers<[1], [0], [0], [1], [0, 0, 1, 1], [], []>} : vector<16x64xf32>, vector<64x16xf32>, vector<16x16xf32> -> vector<16x16xf32>
    %c6 = arith.constant 6 : index
    %c0_27 = arith.constant 0 : index
    %c0_28 = arith.constant 0 : index
    %30 = vector.load %arg10[%c6, %c0_27, %c0_28] : memref<16x16x64xf32, #tpu.memory_space<vmem>>, vector<1x16x64xf32>
    %31 = vector.shape_cast %30 : vector<1x16x64xf32> to vector<16x64xf32>
    %cst_29 = arith.constant dense<0.000000e+00> : vector<16x16xf32>
    %32 = tpu.matmul %31, %11, %cst_29 {dimension_numbers = #tpu.dot_dimension_numbers<[1], [0], [0], [1], [0, 0, 1, 1], [], []>} : vector<16x64xf32>, vector<64x16xf32>, vector<16x16xf32> -> vector<16x16xf32>
    %c7 = arith.constant 7 : index
    %c0_30 = arith.constant 0 : index
    %c0_31 = arith.constant 0 : index
    %33 = vector.load %arg10[%c7, %c0_30, %c0_31] : memref<16x16x64xf32, #tpu.memory_space<vmem>>, vector<1x16x64xf32>
    %34 = vector.shape_cast %33 : vector<1x16x64xf32> to vector<16x64xf32>
    %cst_32 = arith.constant dense<0.000000e+00> : vector<16x16xf32>
    %35 = tpu.matmul %34, %11, %cst_32 {dimension_numbers = #tpu.dot_dimension_numbers<[1], [0], [0], [1], [0, 0, 1, 1], [], []>} : vector<16x64xf32>, vector<64x16xf32>, vector<16x16xf32> -> vector<16x16xf32>
    %c8 = arith.constant 8 : index
    %c0_33 = arith.constant 0 : index
    %c0_34 = arith.constant 0 : index
    %36 = vector.load %arg10[%c8, %c0_33, %c0_34] : memref<16x16x64xf32, #tpu.memory_space<vmem>>, vector<1x16x64xf32>
    %37 = vector.shape_cast %36 : vector<1x16x64xf32> to vector<16x64xf32>
    %cst_35 = arith.constant dense<0.000000e+00> : vector<16x16xf32>
    %38 = tpu.matmul %37, %11, %cst_35 {dimension_numbers = #tpu.dot_dimension_numbers<[1], [0], [0], [1], [0, 0, 1, 1], [], []>} : vector<16x64xf32>, vector<64x16xf32>, vector<16x16xf32> -> vector<16x16xf32>
    %c9 = arith.constant 9 : index
    %c0_36 = arith.constant 0 : index
    %c0_37 = arith.constant 0 : index
    %39 = vector.load %arg10[%c9, %c0_36, %c0_37] : memref<16x16x64xf32, #tpu.memory_space<vmem>>, vector<1x16x64xf32>
    %40 = vector.shape_cast %39 : vector<1x16x64xf32> to vector<16x64xf32>
    %cst_38 = arith.constant dense<0.000000e+00> : vector<16x16xf32>
    %41 = tpu.matmul %40, %11, %cst_38 {dimension_numbers = #tpu.dot_dimension_numbers<[1], [0], [0], [1], [0, 0, 1, 1], [], []>} : vector<16x64xf32>, vector<64x16xf32>, vector<16x16xf32> -> vector<16x16xf32>
    %c10 = arith.constant 10 : index
    %c0_39 = arith.constant 0 : index
    %c0_40 = arith.constant 0 : index
    %42 = vector.load %arg10[%c10, %c0_39, %c0_40] : memref<16x16x64xf32, #tpu.memory_space<vmem>>, vector<1x16x64xf32>
    %43 = vector.shape_cast %42 : vector<1x16x64xf32> to vector<16x64xf32>
    %cst_41 = arith.constant dense<0.000000e+00> : vector<16x16xf32>
    %44 = tpu.matmul %43, %11, %cst_41 {dimension_numbers = #tpu.dot_dimension_numbers<[1], [0], [0], [1], [0, 0, 1, 1], [], []>} : vector<16x64xf32>, vector<64x16xf32>, vector<16x16xf32> -> vector<16x16xf32>
    %c11 = arith.constant 11 : index
    %c0_42 = arith.constant 0 : index
    %c0_43 = arith.constant 0 : index
    %45 = vector.load %arg10[%c11, %c0_42, %c0_43] : memref<16x16x64xf32, #tpu.memory_space<vmem>>, vector<1x16x64xf32>
    %46 = vector.shape_cast %45 : vector<1x16x64xf32> to vector<16x64xf32>
    %cst_44 = arith.constant dense<0.000000e+00> : vector<16x16xf32>
    %47 = tpu.matmul %46, %11, %cst_44 {dimension_numbers = #tpu.dot_dimension_numbers<[1], [0], [0], [1], [0, 0, 1, 1], [], []>} : vector<16x64xf32>, vector<64x16xf32>, vector<16x16xf32> -> vector<16x16xf32>
    %c12 = arith.constant 12 : index
    %c0_45 = arith.constant 0 : index
    %c0_46 = arith.constant 0 : index
    %48 = vector.load %arg10[%c12, %c0_45, %c0_46] : memref<16x16x64xf32, #tpu.memory_space<vmem>>, vector<1x16x64xf32>
    %49 = vector.shape_cast %48 : vector<1x16x64xf32> to vector<16x64xf32>
    %cst_47 = arith.constant dense<0.000000e+00> : vector<16x16xf32>
    %50 = tpu.matmul %49, %11, %cst_47 {dimension_numbers = #tpu.dot_dimension_numbers<[1], [0], [0], [1], [0, 0, 1, 1], [], []>} : vector<16x64xf32>, vector<64x16xf32>, vector<16x16xf32> -> vector<16x16xf32>
    %c13 = arith.constant 13 : index
    %c0_48 = arith.constant 0 : index
    %c0_49 = arith.constant 0 : index
    %51 = vector.load %arg10[%c13, %c0_48, %c0_49] : memref<16x16x64xf32, #tpu.memory_space<vmem>>, vector<1x16x64xf32>
    %52 = vector.shape_cast %51 : vector<1x16x64xf32> to vector<16x64xf32>
    %cst_50 = arith.constant dense<0.000000e+00> : vector<16x16xf32>
    %53 = tpu.matmul %52, %11, %cst_50 {dimension_numbers = #tpu.dot_dimension_numbers<[1], [0], [0], [1], [0, 0, 1, 1], [], []>} : vector<16x64xf32>, vector<64x16xf32>, vector<16x16xf32> -> vector<16x16xf32>
    %c14 = arith.constant 14 : index
    %c0_51 = arith.constant 0 : index
    %c0_52 = arith.constant 0 : index
    %54 = vector.load %arg10[%c14, %c0_51, %c0_52] : memref<16x16x64xf32, #tpu.memory_space<vmem>>, vector<1x16x64xf32>
    %55 = vector.shape_cast %54 : vector<1x16x64xf32> to vector<16x64xf32>
    %cst_53 = arith.constant dense<0.000000e+00> : vector<16x16xf32>
    %56 = tpu.matmul %55, %11, %cst_53 {dimension_numbers = #tpu.dot_dimension_numbers<[1], [0], [0], [1], [0, 0, 1, 1], [], []>} : vector<16x64xf32>, vector<64x16xf32>, vector<16x16xf32> -> vector<16x16xf32>
    %c15 = arith.constant 15 : index
    %c0_54 = arith.constant 0 : index
    %c0_55 = arith.constant 0 : index
    %57 = vector.load %arg10[%c15, %c0_54, %c0_55] : memref<16x16x64xf32, #tpu.memory_space<vmem>>, vector<1x16x64xf32>
    %58 = vector.shape_cast %57 : vector<1x16x64xf32> to vector<16x64xf32>
    %cst_56 = arith.constant dense<0.000000e+00> : vector<16x16xf32>
    %59 = tpu.matmul %58, %11, %cst_56 {dimension_numbers = #tpu.dot_dimension_numbers<[1], [0], [0], [1], [0, 0, 1, 1], [], []>} : vector<16x64xf32>, vector<64x16xf32>, vector<16x16xf32> -> vector<16x16xf32>
    %60 = tpu.concatenate %14, %17, %20, %23, %26, %29, %32, %35, %38, %41, %44, %47, %50, %53, %56, %59 in 1 : vector<16x16xf32>, vector<16x16xf32>, vector<16x16xf32>, vector<16x16xf32>, vector<16x16xf32>, vector<16x16xf32>, vector<16x16xf32>, vector<16x16xf32>, vector<16x16xf32>, vector<16x16xf32>, vector<16x16xf32>, vector<16x16xf32>, vector<16x16xf32>, vector<16x16xf32>, vector<16x16xf32>, vector<16x16xf32> -> vector<16x256xf32>
    %c0_57 = arith.constant 0 : index
    %c0_58 = arith.constant 0 : index
    %61 = vector.load %arg3[%c0_57, %c0_58] : memref<256x16xbf16, #tpu.memory_space<vmem>>, vector<256x16xbf16>
    %62 = arith.truncf %60 : vector<16x256xf32> to vector<16x256xbf16>
    %cst_59 = arith.constant dense<0.000000e+00> : vector<16x16xf32>
    %63 = tpu.matmul %62, %61, %cst_59 {dimension_numbers = #tpu.dot_dimension_numbers<[1], [0], [0], [1], [0, 0, 1, 1], [], []>} : vector<16x256xbf16>, vector<256x16xbf16>, vector<16x16xf32> -> vector<16x16xf32>
    %c2_60 = arith.constant 2 : index
    %c0_61 = arith.constant 0 : index
    %64 = vector.load %arg14[%c2_60, %c0_61] : memref<22x16xf32, #tpu.memory_space<vmem>>, vector<1x16xf32>
    %65 = vector.broadcast %64 : vector<1x16xf32> to vector<16x16xf32>
    %66 = arith.mulf %63, %65 : vector<16x16xf32>
    %c3_62 = arith.constant 3 : index
    %c0_63 = arith.constant 0 : index
    %67 = vector.load %arg14[%c3_62, %c0_63] : memref<22x16xf32, #tpu.memory_space<vmem>>, vector<1x16xf32>
    %68 = vector.broadcast %67 : vector<1x16xf32> to vector<16x16xf32>
    %69 = arith.addf %66, %68 : vector<16x16xf32>
    %cst_64 = arith.constant 0.000000e+00 : f32
    %70 = vector.broadcast %cst_64 : f32 to vector<16x16xf32>
    %71 = arith.maximumf %69, %70 : vector<16x16xf32>
    %cst_65 = arith.constant 0.000000e+00 : f32
    %72 = vector.broadcast %cst_65 : f32 to vector<16x16xf32>
    %73 = arith.maximumf %71, %72 : vector<16x16xf32>
    %c0_66 = arith.constant 0 : index
    %c0_67 = arith.constant 0 : index
    %c0_68 = arith.constant 0 : index
    %74 = vector.load %arg11[%c0_66, %c0_67, %c0_68] : memref<9x16x16xf32, #tpu.memory_space<vmem>>, vector<1x16x16xf32>
    %75 = vector.shape_cast %74 : vector<1x16x16xf32> to vector<16x16xf32>
    %cst_69 = arith.constant dense<0.000000e+00> : vector<16x16xf32>
    %76 = tpu.matmul %75, %73, %cst_69 {dimension_numbers = #tpu.dot_dimension_numbers<[1], [0], [0], [1], [0, 0, 1, 1], [], []>} : vector<16x16xf32>, vector<16x16xf32>, vector<16x16xf32> -> vector<16x16xf32>
    %c1_70 = arith.constant 1 : index
    %c0_71 = arith.constant 0 : index
    %c0_72 = arith.constant 0 : index
    %77 = vector.load %arg11[%c1_70, %c0_71, %c0_72] : memref<9x16x16xf32, #tpu.memory_space<vmem>>, vector<1x16x16xf32>
    %78 = vector.shape_cast %77 : vector<1x16x16xf32> to vector<16x16xf32>
    %cst_73 = arith.constant dense<0.000000e+00> : vector<16x16xf32>
    %79 = tpu.matmul %78, %73, %cst_73 {dimension_numbers = #tpu.dot_dimension_numbers<[1], [0], [0], [1], [0, 0, 1, 1], [], []>} : vector<16x16xf32>, vector<16x16xf32>, vector<16x16xf32> -> vector<16x16xf32>
    %c2_74 = arith.constant 2 : index
    %c0_75 = arith.constant 0 : index
    %c0_76 = arith.constant 0 : index
    %80 = vector.load %arg11[%c2_74, %c0_75, %c0_76] : memref<9x16x16xf32, #tpu.memory_space<vmem>>, vector<1x16x16xf32>
    %81 = vector.shape_cast %80 : vector<1x16x16xf32> to vector<16x16xf32>
    %cst_77 = arith.constant dense<0.000000e+00> : vector<16x16xf32>
    %82 = tpu.matmul %81, %73, %cst_77 {dimension_numbers = #tpu.dot_dimension_numbers<[1], [0], [0], [1], [0, 0, 1, 1], [], []>} : vector<16x16xf32>, vector<16x16xf32>, vector<16x16xf32> -> vector<16x16xf32>
    %c3_78 = arith.constant 3 : index
    %c0_79 = arith.constant 0 : index
    %c0_80 = arith.constant 0 : index
    %83 = vector.load %arg11[%c3_78, %c0_79, %c0_80] : memref<9x16x16xf32, #tpu.memory_space<vmem>>, vector<1x16x16xf32>
    %84 = vector.shape_cast %83 : vector<1x16x16xf32> to vector<16x16xf32>
    %cst_81 = arith.constant dense<0.000000e+00> : vector<16x16xf32>
    %85 = tpu.matmul %84, %73, %cst_81 {dimension_numbers = #tpu.dot_dimension_numbers<[1], [0], [0], [1], [0, 0, 1, 1], [], []>} : vector<16x16xf32>, vector<16x16xf32>, vector<16x16xf32> -> vector<16x16xf32>
    %c4_82 = arith.constant 4 : index
    %c0_83 = arith.constant 0 : index
    %c0_84 = arith.constant 0 : index
    %86 = vector.load %arg11[%c4_82, %c0_83, %c0_84] : memref<9x16x16xf32, #tpu.memory_space<vmem>>, vector<1x16x16xf32>
    %87 = vector.shape_cast %86 : vector<1x16x16xf32> to vector<16x16xf32>
    %cst_85 = arith.constant dense<0.000000e+00> : vector<16x16xf32>
    %88 = tpu.matmul %87, %73, %cst_85 {dimension_numbers = #tpu.dot_dimension_numbers<[1], [0], [0], [1], [0, 0, 1, 1], [], []>} : vector<16x16xf32>, vector<16x16xf32>, vector<16x16xf32> -> vector<16x16xf32>
    %c5_86 = arith.constant 5 : index
    %c0_87 = arith.constant 0 : index
    %c0_88 = arith.constant 0 : index
    %89 = vector.load %arg11[%c5_86, %c0_87, %c0_88] : memref<9x16x16xf32, #tpu.memory_space<vmem>>, vector<1x16x16xf32>
    %90 = vector.shape_cast %89 : vector<1x16x16xf32> to vector<16x16xf32>
    %cst_89 = arith.constant dense<0.000000e+00> : vector<16x16xf32>
    %91 = tpu.matmul %90, %73, %cst_89 {dimension_numbers = #tpu.dot_dimension_numbers<[1], [0], [0], [1], [0, 0, 1, 1], [], []>} : vector<16x16xf32>, vector<16x16xf32>, vector<16x16xf32> -> vector<16x16xf32>
    %c6_90 = arith.constant 6 : index
    %c0_91 = arith.constant 0 : index
    %c0_92 = arith.constant 0 : index
    %92 = vector.load %arg11[%c6_90, %c0_91, %c0_92] : memref<9x16x16xf32, #tpu.memory_space<vmem>>, vector<1x16x16xf32>
    %93 = vector.shape_cast %92 : vector<1x16x16xf32> to vector<16x16xf32>
    %cst_93 = arith.constant dense<0.000000e+00> : vector<16x16xf32>
    %94 = tpu.matmul %93, %73, %cst_93 {dimension_numbers = #tpu.dot_dimension_numbers<[1], [0], [0], [1], [0, 0, 1, 1], [], []>} : vector<16x16xf32>, vector<16x16xf32>, vector<16x16xf32> -> vector<16x16xf32>
    %c7_94 = arith.constant 7 : index
    %c0_95 = arith.constant 0 : index
    %c0_96 = arith.constant 0 : index
    %95 = vector.load %arg11[%c7_94, %c0_95, %c0_96] : memref<9x16x16xf32, #tpu.memory_space<vmem>>, vector<1x16x16xf32>
    %96 = vector.shape_cast %95 : vector<1x16x16xf32> to vector<16x16xf32>
    %cst_97 = arith.constant dense<0.000000e+00> : vector<16x16xf32>
    %97 = tpu.matmul %96, %73, %cst_97 {dimension_numbers = #tpu.dot_dimension_numbers<[1], [0], [0], [1], [0, 0, 1, 1], [], []>} : vector<16x16xf32>, vector<16x16xf32>, vector<16x16xf32> -> vector<16x16xf32>
    %c8_98 = arith.constant 8 : index
    %c0_99 = arith.constant 0 : index
    %c0_100 = arith.constant 0 : index
    %98 = vector.load %arg11[%c8_98, %c0_99, %c0_100] : memref<9x16x16xf32, #tpu.memory_space<vmem>>, vector<1x16x16xf32>
    %99 = vector.shape_cast %98 : vector<1x16x16xf32> to vector<16x16xf32>
    %cst_101 = arith.constant dense<0.000000e+00> : vector<16x16xf32>
    %100 = tpu.matmul %99, %73, %cst_101 {dimension_numbers = #tpu.dot_dimension_numbers<[1], [0], [0], [1], [0, 0, 1, 1], [], []>} : vector<16x16xf32>, vector<16x16xf32>, vector<16x16xf32> -> vector<16x16xf32>
    %101 = tpu.concatenate %76, %79, %82, %85, %88, %91, %94, %97, %100 in 1 : vector<16x16xf32>, vector<16x16xf32>, vector<16x16xf32>, vector<16x16xf32>, vector<16x16xf32>, vector<16x16xf32>, vector<16x16xf32>, vector<16x16xf32>, vector<16x16xf32> -> vector<16x144xf32>
    %c0_102 = arith.constant 0 : index
    %c0_103 = arith.constant 0 : index
    %c0_104 = arith.constant 0 : index
    %102 = vector.load %arg4[%c0_102, %c0_103, %c0_104] : memref<4x144x16xbf16, #tpu.memory_space<vmem>>, vector<1x144x16xbf16>
    %103 = vector.shape_cast %102 : vector<1x144x16xbf16> to vector<144x16xbf16>
    %104 = arith.truncf %101 : vector<16x144xf32> to vector<16x144xbf16>
    %cst_105 = arith.constant dense<0.000000e+00> : vector<16x16xf32>
    %105 = tpu.matmul %104, %103, %cst_105 {dimension_numbers = #tpu.dot_dimension_numbers<[1], [0], [0], [1], [0, 0, 1, 1], [], []>} : vector<16x144xbf16>, vector<144x16xbf16>, vector<16x16xf32> -> vector<16x16xf32>
    %c4_106 = arith.constant 4 : index
    %c0_107 = arith.constant 0 : index
    %106 = vector.load %arg14[%c4_106, %c0_107] : memref<22x16xf32, #tpu.memory_space<vmem>>, vector<1x16xf32>
    %107 = vector.broadcast %106 : vector<1x16xf32> to vector<16x16xf32>
    %108 = arith.mulf %105, %107 : vector<16x16xf32>
    %c5_108 = arith.constant 5 : index
    %c0_109 = arith.constant 0 : index
    %109 = vector.load %arg14[%c5_108, %c0_109] : memref<22x16xf32, #tpu.memory_space<vmem>>, vector<1x16xf32>
    %110 = vector.broadcast %109 : vector<1x16xf32> to vector<16x16xf32>
    %111 = arith.addf %108, %110 : vector<16x16xf32>
    %cst_110 = arith.constant 0.000000e+00 : f32
    %112 = vector.broadcast %cst_110 : f32 to vector<16x16xf32>
    %113 = arith.maximumf %111, %112 : vector<16x16xf32>
    %c0_111 = arith.constant 0 : index
    %c0_112 = arith.constant 0 : index
    %c0_113 = arith.constant 0 : index
    %114 = vector.load %arg5[%c0_111, %c0_112, %c0_113] : memref<4x16x16xbf16, #tpu.memory_space<vmem>>, vector<1x16x16xbf16>
    %115 = vector.shape_cast %114 : vector<1x16x16xbf16> to vector<16x16xbf16>
    %116 = arith.truncf %113 : vector<16x16xf32> to vector<16x16xbf16>
    %cst_114 = arith.constant dense<0.000000e+00> : vector<16x16xf32>
    %117 = tpu.matmul %116, %115, %cst_114 {dimension_numbers = #tpu.dot_dimension_numbers<[1], [0], [0], [1], [0, 0, 1, 1], [], []>} : vector<16x16xbf16>, vector<16x16xbf16>, vector<16x16xf32> -> vector<16x16xf32>
    %118 = arith.addf %71, %117 : vector<16x16xf32>
    %c6_115 = arith.constant 6 : index
    %c0_116 = arith.constant 0 : index
    %119 = vector.load %arg14[%c6_115, %c0_116] : memref<22x16xf32, #tpu.memory_space<vmem>>, vector<1x16xf32>
    %120 = vector.broadcast %119 : vector<1x16xf32> to vector<16x16xf32>
    %121 = arith.mulf %118, %120 : vector<16x16xf32>
    %c7_117 = arith.constant 7 : index
    %c0_118 = arith.constant 0 : index
    %122 = vector.load %arg14[%c7_117, %c0_118] : memref<22x16xf32, #tpu.memory_space<vmem>>, vector<1x16xf32>
    %123 = vector.broadcast %122 : vector<1x16xf32> to vector<16x16xf32>
    %124 = arith.addf %121, %123 : vector<16x16xf32>
    %cst_119 = arith.constant 0.000000e+00 : f32
    %125 = vector.broadcast %cst_119 : f32 to vector<16x16xf32>
    %126 = arith.maximumf %124, %125 : vector<16x16xf32>
    %c0_120 = arith.constant 0 : index
    %c0_121 = arith.constant 0 : index
    %c0_122 = arith.constant 0 : index
    %127 = vector.load %arg11[%c0_120, %c0_121, %c0_122] : memref<9x16x16xf32, #tpu.memory_space<vmem>>, vector<1x16x16xf32>
    %128 = vector.shape_cast %127 : vector<1x16x16xf32> to vector<16x16xf32>
    %cst_123 = arith.constant dense<0.000000e+00> : vector<16x16xf32>
    %129 = tpu.matmul %128, %126, %cst_123 {dimension_numbers = #tpu.dot_dimension_numbers<[1], [0], [0], [1], [0, 0, 1, 1], [], []>} : vector<16x16xf32>, vector<16x16xf32>, vector<16x16xf32> -> vector<16x16xf32>
    %c1_124 = arith.constant 1 : index
    %c0_125 = arith.constant 0 : index
    %c0_126 = arith.constant 0 : index
    %130 = vector.load %arg11[%c1_124, %c0_125, %c0_126] : memref<9x16x16xf32, #tpu.memory_space<vmem>>, vector<1x16x16xf32>
    %131 = vector.shape_cast %130 : vector<1x16x16xf32> to vector<16x16xf32>
    %cst_127 = arith.constant dense<0.000000e+00> : vector<16x16xf32>
    %132 = tpu.matmul %131, %126, %cst_127 {dimension_numbers = #tpu.dot_dimension_numbers<[1], [0], [0], [1], [0, 0, 1, 1], [], []>} : vector<16x16xf32>, vector<16x16xf32>, vector<16x16xf32> -> vector<16x16xf32>
    %c2_128 = arith.constant 2 : index
    %c0_129 = arith.constant 0 : index
    %c0_130 = arith.constant 0 : index
    %133 = vector.load %arg11[%c2_128, %c0_129, %c0_130] : memref<9x16x16xf32, #tpu.memory_space<vmem>>, vector<1x16x16xf32>
    %134 = vector.shape_cast %133 : vector<1x16x16xf32> to vector<16x16xf32>
    %cst_131 = arith.constant dense<0.000000e+00> : vector<16x16xf32>
    %135 = tpu.matmul %134, %126, %cst_131 {dimension_numbers = #tpu.dot_dimension_numbers<[1], [0], [0], [1], [0, 0, 1, 1], [], []>} : vector<16x16xf32>, vector<16x16xf32>, vector<16x16xf32> -> vector<16x16xf32>
    %c3_132 = arith.constant 3 : index
    %c0_133 = arith.constant 0 : index
    %c0_134 = arith.constant 0 : index
    %136 = vector.load %arg11[%c3_132, %c0_133, %c0_134] : memref<9x16x16xf32, #tpu.memory_space<vmem>>, vector<1x16x16xf32>
    %137 = vector.shape_cast %136 : vector<1x16x16xf32> to vector<16x16xf32>
    %cst_135 = arith.constant dense<0.000000e+00> : vector<16x16xf32>
    %138 = tpu.matmul %137, %126, %cst_135 {dimension_numbers = #tpu.dot_dimension_numbers<[1], [0], [0], [1], [0, 0, 1, 1], [], []>} : vector<16x16xf32>, vector<16x16xf32>, vector<16x16xf32> -> vector<16x16xf32>
    %c4_136 = arith.constant 4 : index
    %c0_137 = arith.constant 0 : index
    %c0_138 = arith.constant 0 : index
    %139 = vector.load %arg11[%c4_136, %c0_137, %c0_138] : memref<9x16x16xf32, #tpu.memory_space<vmem>>, vector<1x16x16xf32>
    %140 = vector.shape_cast %139 : vector<1x16x16xf32> to vector<16x16xf32>
    %cst_139 = arith.constant dense<0.000000e+00> : vector<16x16xf32>
    %141 = tpu.matmul %140, %126, %cst_139 {dimension_numbers = #tpu.dot_dimension_numbers<[1], [0], [0], [1], [0, 0, 1, 1], [], []>} : vector<16x16xf32>, vector<16x16xf32>, vector<16x16xf32> -> vector<16x16xf32>
    %c5_140 = arith.constant 5 : index
    %c0_141 = arith.constant 0 : index
    %c0_142 = arith.constant 0 : index
    %142 = vector.load %arg11[%c5_140, %c0_141, %c0_142] : memref<9x16x16xf32, #tpu.memory_space<vmem>>, vector<1x16x16xf32>
    %143 = vector.shape_cast %142 : vector<1x16x16xf32> to vector<16x16xf32>
    %cst_143 = arith.constant dense<0.000000e+00> : vector<16x16xf32>
    %144 = tpu.matmul %143, %126, %cst_143 {dimension_numbers = #tpu.dot_dimension_numbers<[1], [0], [0], [1], [0, 0, 1, 1], [], []>} : vector<16x16xf32>, vector<16x16xf32>, vector<16x16xf32> -> vector<16x16xf32>
    %c6_144 = arith.constant 6 : index
    %c0_145 = arith.constant 0 : index
    %c0_146 = arith.constant 0 : index
    %145 = vector.load %arg11[%c6_144, %c0_145, %c0_146] : memref<9x16x16xf32, #tpu.memory_space<vmem>>, vector<1x16x16xf32>
    %146 = vector.shape_cast %145 : vector<1x16x16xf32> to vector<16x16xf32>
    %cst_147 = arith.constant dense<0.000000e+00> : vector<16x16xf32>
    %147 = tpu.matmul %146, %126, %cst_147 {dimension_numbers = #tpu.dot_dimension_numbers<[1], [0], [0], [1], [0, 0, 1, 1], [], []>} : vector<16x16xf32>, vector<16x16xf32>, vector<16x16xf32> -> vector<16x16xf32>
    %c7_148 = arith.constant 7 : index
    %c0_149 = arith.constant 0 : index
    %c0_150 = arith.constant 0 : index
    %148 = vector.load %arg11[%c7_148, %c0_149, %c0_150] : memref<9x16x16xf32, #tpu.memory_space<vmem>>, vector<1x16x16xf32>
    %149 = vector.shape_cast %148 : vector<1x16x16xf32> to vector<16x16xf32>
    %cst_151 = arith.constant dense<0.000000e+00> : vector<16x16xf32>
    %150 = tpu.matmul %149, %126, %cst_151 {dimension_numbers = #tpu.dot_dimension_numbers<[1], [0], [0], [1], [0, 0, 1, 1], [], []>} : vector<16x16xf32>, vector<16x16xf32>, vector<16x16xf32> -> vector<16x16xf32>
    %c8_152 = arith.constant 8 : index
    %c0_153 = arith.constant 0 : index
    %c0_154 = arith.constant 0 : index
    %151 = vector.load %arg11[%c8_152, %c0_153, %c0_154] : memref<9x16x16xf32, #tpu.memory_space<vmem>>, vector<1x16x16xf32>
    %152 = vector.shape_cast %151 : vector<1x16x16xf32> to vector<16x16xf32>
    %cst_155 = arith.constant dense<0.000000e+00> : vector<16x16xf32>
    %153 = tpu.matmul %152, %126, %cst_155 {dimension_numbers = #tpu.dot_dimension_numbers<[1], [0], [0], [1], [0, 0, 1, 1], [], []>} : vector<16x16xf32>, vector<16x16xf32>, vector<16x16xf32> -> vector<16x16xf32>
    %154 = tpu.concatenate %129, %132, %135, %138, %141, %144, %147, %150, %153 in 1 : vector<16x16xf32>, vector<16x16xf32>, vector<16x16xf32>, vector<16x16xf32>, vector<16x16xf32>, vector<16x16xf32>, vector<16x16xf32>, vector<16x16xf32>, vector<16x16xf32> -> vector<16x144xf32>
    %c1_156 = arith.constant 1 : index
    %c0_157 = arith.constant 0 : index
    %c0_158 = arith.constant 0 : index
    %155 = vector.load %arg4[%c1_156, %c0_157, %c0_158] : memref<4x144x16xbf16, #tpu.memory_space<vmem>>, vector<1x144x16xbf16>
    %156 = vector.shape_cast %155 : vector<1x144x16xbf16> to vector<144x16xbf16>
    %157 = arith.truncf %154 : vector<16x144xf32> to vector<16x144xbf16>
    %cst_159 = arith.constant dense<0.000000e+00> : vector<16x16xf32>
    %158 = tpu.matmul %157, %156, %cst_159 {dimension_numbers = #tpu.dot_dimension_numbers<[1], [0], [0], [1], [0, 0, 1, 1], [], []>} : vector<16x144xbf16>, vector<144x16xbf16>, vector<16x16xf32> -> vector<16x16xf32>
    %c8_160 = arith.constant 8 : index
    %c0_161 = arith.constant 0 : index
    %159 = vector.load %arg14[%c8_160, %c0_161] : memref<22x16xf32, #tpu.memory_space<vmem>>, vector<1x16xf32>
    %160 = vector.broadcast %159 : vector<1x16xf32> to vector<16x16xf32>
    %161 = arith.mulf %158, %160 : vector<16x16xf32>
    %c9_162 = arith.constant 9 : index
    %c0_163 = arith.constant 0 : index
    %162 = vector.load %arg14[%c9_162, %c0_163] : memref<22x16xf32, #tpu.memory_space<vmem>>, vector<1x16xf32>
    %163 = vector.broadcast %162 : vector<1x16xf32> to vector<16x16xf32>
    %164 = arith.addf %161, %163 : vector<16x16xf32>
    %cst_164 = arith.constant 0.000000e+00 : f32
    %165 = vector.broadcast %cst_164 : f32 to vector<16x16xf32>
    %166 = arith.maximumf %164, %165 : vector<16x16xf32>
    %c1_165 = arith.constant 1 : index
    %c0_166 = arith.constant 0 : index
    %c0_167 = arith.constant 0 : index
    %167 = vector.load %arg5[%c1_165, %c0_166, %c0_167] : memref<4x16x16xbf16, #tpu.memory_space<vmem>>, vector<1x16x16xbf16>
    %168 = vector.shape_cast %167 : vector<1x16x16xbf16> to vector<16x16xbf16>
    %169 = arith.truncf %166 : vector<16x16xf32> to vector<16x16xbf16>
    %cst_168 = arith.constant dense<0.000000e+00> : vector<16x16xf32>
    %170 = tpu.matmul %169, %168, %cst_168 {dimension_numbers = #tpu.dot_dimension_numbers<[1], [0], [0], [1], [0, 0, 1, 1], [], []>} : vector<16x16xbf16>, vector<16x16xbf16>, vector<16x16xf32> -> vector<16x16xf32>
    %171 = arith.addf %124, %170 : vector<16x16xf32>
    %c10_169 = arith.constant 10 : index
    %c0_170 = arith.constant 0 : index
    %172 = vector.load %arg14[%c10_169, %c0_170] : memref<22x16xf32, #tpu.memory_space<vmem>>, vector<1x16xf32>
    %173 = vector.broadcast %172 : vector<1x16xf32> to vector<16x16xf32>
    %174 = arith.mulf %171, %173 : vector<16x16xf32>
    %c11_171 = arith.constant 11 : index
    %c0_172 = arith.constant 0 : index
    %175 = vector.load %arg14[%c11_171, %c0_172] : memref<22x16xf32, #tpu.memory_space<vmem>>, vector<1x16xf32>
    %176 = vector.broadcast %175 : vector<1x16xf32> to vector<16x16xf32>
    %177 = arith.addf %174, %176 : vector<16x16xf32>
    %c0_173 = arith.constant 0 : index
    %c0_174 = arith.constant 0 : index
    %178 = vector.load %arg16[%c0_173, %c0_174] : memref<16x16xf32, #tpu.memory_space<vmem>>, vector<16x16xf32>
    tpu.vector_store %arg16[%c0_173, %c0_174], %177 {strides = array<i32>} : memref<16x16xf32, #tpu.memory_space<vmem>>, vector<16x16xf32>,
    %c0_175 = arith.constant 0 : index
    %c0_176 = arith.constant 0 : index
    %179 = vector.load %arg8[%c0_175, %c0_176] : memref<16x10xf32, #tpu.memory_space<vmem>>, vector<16x10xf32>
    %cst_177 = arith.constant dense<0.000000e+00> : vector<16x10xf32>
    %180 = tpu.matmul %177, %179, %cst_177 {dimension_numbers = #tpu.dot_dimension_numbers<[1], [0], [0], [1], [0, 0, 1, 1], [], []>} : vector<16x16xf32>, vector<16x10xf32>, vector<16x10xf32> -> vector<16x10xf32>
    %181 = arith.mulf %179, %179 : vector<16x10xf32>
    %cst_178 = arith.constant dense<0.000000e+00> : vector<10xf32>
    %182 = vector.multi_reduction <add>, %181, %cst_178 [0] : vector<16x10xf32> to vector<10xf32>
    %183 = vector.shape_cast %182 : vector<10xf32> to vector<1x10xf32>
    %cst_179 = arith.constant 2.000000e+00 : f32
    %184 = vector.broadcast %cst_179 : f32 to vector<16x10xf32>
    %185 = arith.mulf %184, %180 : vector<16x10xf32>
    %186 = vector.broadcast %183 : vector<1x10xf32> to vector<16x10xf32>
    %187 = arith.subf %186, %185 : vector<16x10xf32>
    %188 = tpu.iota {dimensions = array<i32: 1>} : vector<16x10xi32>
    %cst_180 = arith.constant dense<0x7F800000> : vector<16xf32>
    %189 = vector.multi_reduction <minimumf>, %187, %cst_180 [1] : vector<16x10xf32> to vector<16xf32>
    %190 = vector.shape_cast %189 : vector<16xf32> to vector<16x1xf32>
    %191 = vector.broadcast %190 : vector<16x1xf32> to vector<16x10xf32>
    %192 = arith.cmpf oeq, %187, %191 : vector<16x10xf32>
    %c10_i32 = arith.constant 10 : i32
    %193 = vector.broadcast %c10_i32 : i32 to vector<16x10xi32>
    %194 = arith.select %192, %188, %193 : vector<16x10xi1>, vector<16x10xi32>
    %cst_181 = arith.constant dense<2147483647> : vector<16xi32>
    %195 = vector.multi_reduction <minsi>, %194, %cst_181 [1] : vector<16x10xi32> to vector<16xi32>
    %196 = vector.shape_cast %195 : vector<16xi32> to vector<16x1xi32>
    %c0_182 = arith.constant 0 : index
    %c0_183 = arith.constant 0 : index
    %197 = vector.load %arg18[%c0_182, %c0_183] : memref<16x1xi32, #tpu.memory_space<vmem>>, vector<16x1xi32>
    tpu.vector_store %arg18[%c0_182, %c0_183], %196 {strides = array<i32>} : memref<16x1xi32, #tpu.memory_space<vmem>>, vector<16x1xi32>,
    %198 = vector.broadcast %196 : vector<16x1xi32> to vector<16x10xi32>
    %199 = arith.cmpi eq, %188, %198 : vector<16x10xi32>
    %200 = arith.extui %199 : vector<16x10xi1> to vector<16x10xi32>
    %201 = arith.sitofp %200 : vector<16x10xi32> to vector<16x10xf32>
    %c0_184 = arith.constant 0 : index
    %c0_185 = arith.constant 0 : index
    %202 = vector.load %arg9[%c0_184, %c0_185] : memref<10x16xf32, #tpu.memory_space<vmem>>, vector<10x16xf32>
    %cst_186 = arith.constant dense<0.000000e+00> : vector<16x16xf32>
    %203 = tpu.matmul %201, %202, %cst_186 {dimension_numbers = #tpu.dot_dimension_numbers<[1], [0], [0], [1], [0, 0, 1, 1], [], []>} : vector<16x10xf32>, vector<10x16xf32>, vector<16x16xf32> -> vector<16x16xf32>
    %c0_187 = arith.constant 0 : index
    %c0_188 = arith.constant 0 : index
    %204 = vector.load %arg17[%c0_187, %c0_188] : memref<16x16xf32, #tpu.memory_space<vmem>>, vector<16x16xf32>
    tpu.vector_store %arg17[%c0_187, %c0_188], %203 {strides = array<i32>} : memref<16x16xf32, #tpu.memory_space<vmem>>, vector<16x16xf32>,
    %cst_189 = arith.constant 0.000000e+00 : f32
    %205 = vector.broadcast %cst_189 : f32 to vector<16x16xf32>
    %206 = arith.maximumf %203, %205 : vector<16x16xf32>
    %c0_190 = arith.constant 0 : index
    %c0_191 = arith.constant 0 : index
    %c0_192 = arith.constant 0 : index
    %207 = vector.load %arg11[%c0_190, %c0_191, %c0_192] : memref<9x16x16xf32, #tpu.memory_space<vmem>>, vector<1x16x16xf32>
    %208 = vector.shape_cast %207 : vector<1x16x16xf32> to vector<16x16xf32>
    %cst_193 = arith.constant dense<0.000000e+00> : vector<16x16xf32>
    %209 = tpu.matmul %208, %206, %cst_193 {dimension_numbers = #tpu.dot_dimension_numbers<[1], [0], [0], [1], [0, 0, 1, 1], [], []>} : vector<16x16xf32>, vector<16x16xf32>, vector<16x16xf32> -> vector<16x16xf32>
    %c1_194 = arith.constant 1 : index
    %c0_195 = arith.constant 0 : index
    %c0_196 = arith.constant 0 : index
    %210 = vector.load %arg11[%c1_194, %c0_195, %c0_196] : memref<9x16x16xf32, #tpu.memory_space<vmem>>, vector<1x16x16xf32>
    %211 = vector.shape_cast %210 : vector<1x16x16xf32> to vector<16x16xf32>
    %cst_197 = arith.constant dense<0.000000e+00> : vector<16x16xf32>
    %212 = tpu.matmul %211, %206, %cst_197 {dimension_numbers = #tpu.dot_dimension_numbers<[1], [0], [0], [1], [0, 0, 1, 1], [], []>} : vector<16x16xf32>, vector<16x16xf32>, vector<16x16xf32> -> vector<16x16xf32>
    %c2_198 = arith.constant 2 : index
    %c0_199 = arith.constant 0 : index
    %c0_200 = arith.constant 0 : index
    %213 = vector.load %arg11[%c2_198, %c0_199, %c0_200] : memref<9x16x16xf32, #tpu.memory_space<vmem>>, vector<1x16x16xf32>
    %214 = vector.shape_cast %213 : vector<1x16x16xf32> to vector<16x16xf32>
    %cst_201 = arith.constant dense<0.000000e+00> : vector<16x16xf32>
    %215 = tpu.matmul %214, %206, %cst_201 {dimension_numbers = #tpu.dot_dimension_numbers<[1], [0], [0], [1], [0, 0, 1, 1], [], []>} : vector<16x16xf32>, vector<16x16xf32>, vector<16x16xf32> -> vector<16x16xf32>
    %c3_202 = arith.constant 3 : index
    %c0_203 = arith.constant 0 : index
    %c0_204 = arith.constant 0 : index
    %216 = vector.load %arg11[%c3_202, %c0_203, %c0_204] : memref<9x16x16xf32, #tpu.memory_space<vmem>>, vector<1x16x16xf32>
    %217 = vector.shape_cast %216 : vector<1x16x16xf32> to vector<16x16xf32>
    %cst_205 = arith.constant dense<0.000000e+00> : vector<16x16xf32>
    %218 = tpu.matmul %217, %206, %cst_205 {dimension_numbers = #tpu.dot_dimension_numbers<[1], [0], [0], [1], [0, 0, 1, 1], [], []>} : vector<16x16xf32>, vector<16x16xf32>, vector<16x16xf32> -> vector<16x16xf32>
    %c4_206 = arith.constant 4 : index
    %c0_207 = arith.constant 0 : index
    %c0_208 = arith.constant 0 : index
    %219 = vector.load %arg11[%c4_206, %c0_207, %c0_208] : memref<9x16x16xf32, #tpu.memory_space<vmem>>, vector<1x16x16xf32>
    %220 = vector.shape_cast %219 : vector<1x16x16xf32> to vector<16x16xf32>
    %cst_209 = arith.constant dense<0.000000e+00> : vector<16x16xf32>
    %221 = tpu.matmul %220, %206, %cst_209 {dimension_numbers = #tpu.dot_dimension_numbers<[1], [0], [0], [1], [0, 0, 1, 1], [], []>} : vector<16x16xf32>, vector<16x16xf32>, vector<16x16xf32> -> vector<16x16xf32>
    %c5_210 = arith.constant 5 : index
    %c0_211 = arith.constant 0 : index
    %c0_212 = arith.constant 0 : index
    %222 = vector.load %arg11[%c5_210, %c0_211, %c0_212] : memref<9x16x16xf32, #tpu.memory_space<vmem>>, vector<1x16x16xf32>
    %223 = vector.shape_cast %222 : vector<1x16x16xf32> to vector<16x16xf32>
    %cst_213 = arith.constant dense<0.000000e+00> : vector<16x16xf32>
    %224 = tpu.matmul %223, %206, %cst_213 {dimension_numbers = #tpu.dot_dimension_numbers<[1], [0], [0], [1], [0, 0, 1, 1], [], []>} : vector<16x16xf32>, vector<16x16xf32>, vector<16x16xf32> -> vector<16x16xf32>
    %c6_214 = arith.constant 6 : index
    %c0_215 = arith.constant 0 : index
    %c0_216 = arith.constant 0 : index
    %225 = vector.load %arg11[%c6_214, %c0_215, %c0_216] : memref<9x16x16xf32, #tpu.memory_space<vmem>>, vector<1x16x16xf32>
    %226 = vector.shape_cast %225 : vector<1x16x16xf32> to vector<16x16xf32>
    %cst_217 = arith.constant dense<0.000000e+00> : vector<16x16xf32>
    %227 = tpu.matmul %226, %206, %cst_217 {dimension_numbers = #tpu.dot_dimension_numbers<[1], [0], [0], [1], [0, 0, 1, 1], [], []>} : vector<16x16xf32>, vector<16x16xf32>, vector<16x16xf32> -> vector<16x16xf32>
    %c7_218 = arith.constant 7 : index
    %c0_219 = arith.constant 0 : index
    %c0_220 = arith.constant 0 : index
    %228 = vector.load %arg11[%c7_218, %c0_219, %c0_220] : memref<9x16x16xf32, #tpu.memory_space<vmem>>, vector<1x16x16xf32>
    %229 = vector.shape_cast %228 : vector<1x16x16xf32> to vector<16x16xf32>
    %cst_221 = arith.constant dense<0.000000e+00> : vector<16x16xf32>
    %230 = tpu.matmul %229, %206, %cst_221 {dimension_numbers = #tpu.dot_dimension_numbers<[1], [0], [0], [1], [0, 0, 1, 1], [], []>} : vector<16x16xf32>, vector<16x16xf32>, vector<16x16xf32> -> vector<16x16xf32>
    %c8_222 = arith.constant 8 : index
    %c0_223 = arith.constant 0 : index
    %c0_224 = arith.constant 0 : index
    %231 = vector.load %arg11[%c8_222, %c0_223, %c0_224] : memref<9x16x16xf32, #tpu.memory_space<vmem>>, vector<1x16x16xf32>
    %232 = vector.shape_cast %231 : vector<1x16x16xf32> to vector<16x16xf32>
    %cst_225 = arith.constant dense<0.000000e+00> : vector<16x16xf32>
    %233 = tpu.matmul %232, %206, %cst_225 {dimension_numbers = #tpu.dot_dimension_numbers<[1], [0], [0], [1], [0, 0, 1, 1], [], []>} : vector<16x16xf32>, vector<16x16xf32>, vector<16x16xf32> -> vector<16x16xf32>
    %234 = tpu.concatenate %209, %212, %215, %218, %221, %224, %227, %230, %233 in 1 : vector<16x16xf32>, vector<16x16xf32>, vector<16x16xf32>, vector<16x16xf32>, vector<16x16xf32>, vector<16x16xf32>, vector<16x16xf32>, vector<16x16xf32>, vector<16x16xf32> -> vector<16x144xf32>
    %c2_226 = arith.constant 2 : index
    %c0_227 = arith.constant 0 : index
    %c0_228 = arith.constant 0 : index
    %235 = vector.load %arg4[%c2_226, %c0_227, %c0_228] : memref<4x144x16xbf16, #tpu.memory_space<vmem>>, vector<1x144x16xbf16>
    %236 = vector.shape_cast %235 : vector<1x144x16xbf16> to vector<144x16xbf16>
    %237 = arith.truncf %234 : vector<16x144xf32> to vector<16x144xbf16>
    %cst_229 = arith.constant dense<0.000000e+00> : vector<16x16xf32>
    %238 = tpu.matmul %237, %236, %cst_229 {dimension_numbers = #tpu.dot_dimension_numbers<[1], [0], [0], [1], [0, 0, 1, 1], [], []>} : vector<16x144xbf16>, vector<144x16xbf16>, vector<16x16xf32> -> vector<16x16xf32>
    %c12_230 = arith.constant 12 : index
    %c0_231 = arith.constant 0 : index
    %239 = vector.load %arg14[%c12_230, %c0_231] : memref<22x16xf32, #tpu.memory_space<vmem>>, vector<1x16xf32>
    %240 = vector.broadcast %239 : vector<1x16xf32> to vector<16x16xf32>
    %241 = arith.mulf %238, %240 : vector<16x16xf32>
    %c13_232 = arith.constant 13 : index
    %c0_233 = arith.constant 0 : index
    %242 = vector.load %arg14[%c13_232, %c0_233] : memref<22x16xf32, #tpu.memory_space<vmem>>, vector<1x16xf32>
    %243 = vector.broadcast %242 : vector<1x16xf32> to vector<16x16xf32>
    %244 = arith.addf %241, %243 : vector<16x16xf32>
    %cst_234 = arith.constant 0.000000e+00 : f32
    %245 = vector.broadcast %cst_234 : f32 to vector<16x16xf32>
    %246 = arith.maximumf %244, %245 : vector<16x16xf32>
    %c2_235 = arith.constant 2 : index
    %c0_236 = arith.constant 0 : index
    %c0_237 = arith.constant 0 : index
    %247 = vector.load %arg5[%c2_235, %c0_236, %c0_237] : memref<4x16x16xbf16, #tpu.memory_space<vmem>>, vector<1x16x16xbf16>
    %248 = vector.shape_cast %247 : vector<1x16x16xbf16> to vector<16x16xbf16>
    %249 = arith.truncf %246 : vector<16x16xf32> to vector<16x16xbf16>
    %cst_238 = arith.constant dense<0.000000e+00> : vector<16x16xf32>
    %250 = tpu.matmul %249, %248, %cst_238 {dimension_numbers = #tpu.dot_dimension_numbers<[1], [0], [0], [1], [0, 0, 1, 1], [], []>} : vector<16x16xbf16>, vector<16x16xbf16>, vector<16x16xf32> -> vector<16x16xf32>
    %251 = arith.addf %203, %250 : vector<16x16xf32>
    %c14_239 = arith.constant 14 : index
    %c0_240 = arith.constant 0 : index
    %252 = vector.load %arg14[%c14_239, %c0_240] : memref<22x16xf32, #tpu.memory_space<vmem>>, vector<1x16xf32>
    %253 = vector.broadcast %252 : vector<1x16xf32> to vector<16x16xf32>
    %254 = arith.mulf %251, %253 : vector<16x16xf32>
    %c15_241 = arith.constant 15 : index
    %c0_242 = arith.constant 0 : index
    %255 = vector.load %arg14[%c15_241, %c0_242] : memref<22x16xf32, #tpu.memory_space<vmem>>, vector<1x16xf32>
    %256 = vector.broadcast %255 : vector<1x16xf32> to vector<16x16xf32>
    %257 = arith.addf %254, %256 : vector<16x16xf32>
    %cst_243 = arith.constant 0.000000e+00 : f32
    %258 = vector.broadcast %cst_243 : f32 to vector<16x16xf32>
    %259 = arith.maximumf %257, %258 : vector<16x16xf32>
    %c0_244 = arith.constant 0 : index
    %c0_245 = arith.constant 0 : index
    %c0_246 = arith.constant 0 : index
    %260 = vector.load %arg11[%c0_244, %c0_245, %c0_246] : memref<9x16x16xf32, #tpu.memory_space<vmem>>, vector<1x16x16xf32>
    %261 = vector.shape_cast %260 : vector<1x16x16xf32> to vector<16x16xf32>
    %cst_247 = arith.constant dense<0.000000e+00> : vector<16x16xf32>
    %262 = tpu.matmul %261, %259, %cst_247 {dimension_numbers = #tpu.dot_dimension_numbers<[1], [0], [0], [1], [0, 0, 1, 1], [], []>} : vector<16x16xf32>, vector<16x16xf32>, vector<16x16xf32> -> vector<16x16xf32>
    %c1_248 = arith.constant 1 : index
    %c0_249 = arith.constant 0 : index
    %c0_250 = arith.constant 0 : index
    %263 = vector.load %arg11[%c1_248, %c0_249, %c0_250] : memref<9x16x16xf32, #tpu.memory_space<vmem>>, vector<1x16x16xf32>
    %264 = vector.shape_cast %263 : vector<1x16x16xf32> to vector<16x16xf32>
    %cst_251 = arith.constant dense<0.000000e+00> : vector<16x16xf32>
    %265 = tpu.matmul %264, %259, %cst_251 {dimension_numbers = #tpu.dot_dimension_numbers<[1], [0], [0], [1], [0, 0, 1, 1], [], []>} : vector<16x16xf32>, vector<16x16xf32>, vector<16x16xf32> -> vector<16x16xf32>
    %c2_252 = arith.constant 2 : index
    %c0_253 = arith.constant 0 : index
    %c0_254 = arith.constant 0 : index
    %266 = vector.load %arg11[%c2_252, %c0_253, %c0_254] : memref<9x16x16xf32, #tpu.memory_space<vmem>>, vector<1x16x16xf32>
    %267 = vector.shape_cast %266 : vector<1x16x16xf32> to vector<16x16xf32>
    %cst_255 = arith.constant dense<0.000000e+00> : vector<16x16xf32>
    %268 = tpu.matmul %267, %259, %cst_255 {dimension_numbers = #tpu.dot_dimension_numbers<[1], [0], [0], [1], [0, 0, 1, 1], [], []>} : vector<16x16xf32>, vector<16x16xf32>, vector<16x16xf32> -> vector<16x16xf32>
    %c3_256 = arith.constant 3 : index
    %c0_257 = arith.constant 0 : index
    %c0_258 = arith.constant 0 : index
    %269 = vector.load %arg11[%c3_256, %c0_257, %c0_258] : memref<9x16x16xf32, #tpu.memory_space<vmem>>, vector<1x16x16xf32>
    %270 = vector.shape_cast %269 : vector<1x16x16xf32> to vector<16x16xf32>
    %cst_259 = arith.constant dense<0.000000e+00> : vector<16x16xf32>
    %271 = tpu.matmul %270, %259, %cst_259 {dimension_numbers = #tpu.dot_dimension_numbers<[1], [0], [0], [1], [0, 0, 1, 1], [], []>} : vector<16x16xf32>, vector<16x16xf32>, vector<16x16xf32> -> vector<16x16xf32>
    %c4_260 = arith.constant 4 : index
    %c0_261 = arith.constant 0 : index
    %c0_262 = arith.constant 0 : index
    %272 = vector.load %arg11[%c4_260, %c0_261, %c0_262] : memref<9x16x16xf32, #tpu.memory_space<vmem>>, vector<1x16x16xf32>
    %273 = vector.shape_cast %272 : vector<1x16x16xf32> to vector<16x16xf32>
    %cst_263 = arith.constant dense<0.000000e+00> : vector<16x16xf32>
    %274 = tpu.matmul %273, %259, %cst_263 {dimension_numbers = #tpu.dot_dimension_numbers<[1], [0], [0], [1], [0, 0, 1, 1], [], []>} : vector<16x16xf32>, vector<16x16xf32>, vector<16x16xf32> -> vector<16x16xf32>
    %c5_264 = arith.constant 5 : index
    %c0_265 = arith.constant 0 : index
    %c0_266 = arith.constant 0 : index
    %275 = vector.load %arg11[%c5_264, %c0_265, %c0_266] : memref<9x16x16xf32, #tpu.memory_space<vmem>>, vector<1x16x16xf32>
    %276 = vector.shape_cast %275 : vector<1x16x16xf32> to vector<16x16xf32>
    %cst_267 = arith.constant dense<0.000000e+00> : vector<16x16xf32>
    %277 = tpu.matmul %276, %259, %cst_267 {dimension_numbers = #tpu.dot_dimension_numbers<[1], [0], [0], [1], [0, 0, 1, 1], [], []>} : vector<16x16xf32>, vector<16x16xf32>, vector<16x16xf32> -> vector<16x16xf32>
    %c6_268 = arith.constant 6 : index
    %c0_269 = arith.constant 0 : index
    %c0_270 = arith.constant 0 : index
    %278 = vector.load %arg11[%c6_268, %c0_269, %c0_270] : memref<9x16x16xf32, #tpu.memory_space<vmem>>, vector<1x16x16xf32>
    %279 = vector.shape_cast %278 : vector<1x16x16xf32> to vector<16x16xf32>
    %cst_271 = arith.constant dense<0.000000e+00> : vector<16x16xf32>
    %280 = tpu.matmul %279, %259, %cst_271 {dimension_numbers = #tpu.dot_dimension_numbers<[1], [0], [0], [1], [0, 0, 1, 1], [], []>} : vector<16x16xf32>, vector<16x16xf32>, vector<16x16xf32> -> vector<16x16xf32>
    %c7_272 = arith.constant 7 : index
    %c0_273 = arith.constant 0 : index
    %c0_274 = arith.constant 0 : index
    %281 = vector.load %arg11[%c7_272, %c0_273, %c0_274] : memref<9x16x16xf32, #tpu.memory_space<vmem>>, vector<1x16x16xf32>
    %282 = vector.shape_cast %281 : vector<1x16x16xf32> to vector<16x16xf32>
    %cst_275 = arith.constant dense<0.000000e+00> : vector<16x16xf32>
    %283 = tpu.matmul %282, %259, %cst_275 {dimension_numbers = #tpu.dot_dimension_numbers<[1], [0], [0], [1], [0, 0, 1, 1], [], []>} : vector<16x16xf32>, vector<16x16xf32>, vector<16x16xf32> -> vector<16x16xf32>
    %c8_276 = arith.constant 8 : index
    %c0_277 = arith.constant 0 : index
    %c0_278 = arith.constant 0 : index
    %284 = vector.load %arg11[%c8_276, %c0_277, %c0_278] : memref<9x16x16xf32, #tpu.memory_space<vmem>>, vector<1x16x16xf32>
    %285 = vector.shape_cast %284 : vector<1x16x16xf32> to vector<16x16xf32>
    %cst_279 = arith.constant dense<0.000000e+00> : vector<16x16xf32>
    %286 = tpu.matmul %285, %259, %cst_279 {dimension_numbers = #tpu.dot_dimension_numbers<[1], [0], [0], [1], [0, 0, 1, 1], [], []>} : vector<16x16xf32>, vector<16x16xf32>, vector<16x16xf32> -> vector<16x16xf32>
    %287 = tpu.concatenate %262, %265, %268, %271, %274, %277, %280, %283, %286 in 1 : vector<16x16xf32>, vector<16x16xf32>, vector<16x16xf32>, vector<16x16xf32>, vector<16x16xf32>, vector<16x16xf32>, vector<16x16xf32>, vector<16x16xf32>, vector<16x16xf32> -> vector<16x144xf32>
    %c3_280 = arith.constant 3 : index
    %c0_281 = arith.constant 0 : index
    %c0_282 = arith.constant 0 : index
    %288 = vector.load %arg4[%c3_280, %c0_281, %c0_282] : memref<4x144x16xbf16, #tpu.memory_space<vmem>>, vector<1x144x16xbf16>
    %289 = vector.shape_cast %288 : vector<1x144x16xbf16> to vector<144x16xbf16>
    %290 = arith.truncf %287 : vector<16x144xf32> to vector<16x144xbf16>
    %cst_283 = arith.constant dense<0.000000e+00> : vector<16x16xf32>
    %291 = tpu.matmul %290, %289, %cst_283 {dimension_numbers = #tpu.dot_dimension_numbers<[1], [0], [0], [1], [0, 0, 1, 1], [], []>} : vector<16x144xbf16>, vector<144x16xbf16>, vector<16x16xf32> -> vector<16x16xf32>
    %c16 = arith.constant 16 : index
    %c0_284 = arith.constant 0 : index
    %292 = vector.load %arg14[%c16, %c0_284] : memref<22x16xf32, #tpu.memory_space<vmem>>, vector<1x16xf32>
    %293 = vector.broadcast %292 : vector<1x16xf32> to vector<16x16xf32>
    %294 = arith.mulf %291, %293 : vector<16x16xf32>
    %c17 = arith.constant 17 : index
    %c0_285 = arith.constant 0 : index
    %295 = vector.load %arg14[%c17, %c0_285] : memref<22x16xf32, #tpu.memory_space<vmem>>, vector<1x16xf32>
    %296 = vector.broadcast %295 : vector<1x16xf32> to vector<16x16xf32>
    %297 = arith.addf %294, %296 : vector<16x16xf32>
    %cst_286 = arith.constant 0.000000e+00 : f32
    %298 = vector.broadcast %cst_286 : f32 to vector<16x16xf32>
    %299 = arith.maximumf %297, %298 : vector<16x16xf32>
    %c3_287 = arith.constant 3 : index
    %c0_288 = arith.constant 0 : index
    %c0_289 = arith.constant 0 : index
    %300 = vector.load %arg5[%c3_287, %c0_288, %c0_289] : memref<4x16x16xbf16, #tpu.memory_space<vmem>>, vector<1x16x16xbf16>
    %301 = vector.shape_cast %300 : vector<1x16x16xbf16> to vector<16x16xbf16>
    %302 = arith.truncf %299 : vector<16x16xf32> to vector<16x16xbf16>
    %cst_290 = arith.constant dense<0.000000e+00> : vector<16x16xf32>
    %303 = tpu.matmul %302, %301, %cst_290 {dimension_numbers = #tpu.dot_dimension_numbers<[1], [0], [0], [1], [0, 0, 1, 1], [], []>} : vector<16x16xbf16>, vector<16x16xbf16>, vector<16x16xf32> -> vector<16x16xf32>
    %304 = arith.addf %257, %303 : vector<16x16xf32>
    %c18 = arith.constant 18 : index
    %c0_291 = arith.constant 0 : index
    %305 = vector.load %arg14[%c18, %c0_291] : memref<22x16xf32, #tpu.memory_space<vmem>>, vector<1x16xf32>
    %306 = vector.broadcast %305 : vector<1x16xf32> to vector<16x16xf32>
    %307 = arith.mulf %304, %306 : vector<16x16xf32>
    %c19 = arith.constant 19 : index
    %c0_292 = arith.constant 0 : index
    %308 = vector.load %arg14[%c19, %c0_292] : memref<22x16xf32, #tpu.memory_space<vmem>>, vector<1x16xf32>
    %309 = vector.broadcast %308 : vector<1x16xf32> to vector<16x16xf32>
    %310 = arith.addf %307, %309 : vector<16x16xf32>
    %c0_293 = arith.constant 0 : index
    %c0_294 = arith.constant 0 : index
    %c0_295 = arith.constant 0 : index
    %311 = vector.load %arg11[%c0_293, %c0_294, %c0_295] : memref<9x16x16xf32, #tpu.memory_space<vmem>>, vector<1x16x16xf32>
    %312 = vector.shape_cast %311 : vector<1x16x16xf32> to vector<16x16xf32>
    %cst_296 = arith.constant dense<0.000000e+00> : vector<16x16xf32>
    %313 = tpu.matmul %312, %310, %cst_296 {dimension_numbers = #tpu.dot_dimension_numbers<[1], [0], [0], [1], [0, 0, 1, 1], [], []>} : vector<16x16xf32>, vector<16x16xf32>, vector<16x16xf32> -> vector<16x16xf32>
    %c1_297 = arith.constant 1 : index
    %c0_298 = arith.constant 0 : index
    %c0_299 = arith.constant 0 : index
    %314 = vector.load %arg11[%c1_297, %c0_298, %c0_299] : memref<9x16x16xf32, #tpu.memory_space<vmem>>, vector<1x16x16xf32>
    %315 = vector.shape_cast %314 : vector<1x16x16xf32> to vector<16x16xf32>
    %cst_300 = arith.constant dense<0.000000e+00> : vector<16x16xf32>
    %316 = tpu.matmul %315, %310, %cst_300 {dimension_numbers = #tpu.dot_dimension_numbers<[1], [0], [0], [1], [0, 0, 1, 1], [], []>} : vector<16x16xf32>, vector<16x16xf32>, vector<16x16xf32> -> vector<16x16xf32>
    %c2_301 = arith.constant 2 : index
    %c0_302 = arith.constant 0 : index
    %c0_303 = arith.constant 0 : index
    %317 = vector.load %arg11[%c2_301, %c0_302, %c0_303] : memref<9x16x16xf32, #tpu.memory_space<vmem>>, vector<1x16x16xf32>
    %318 = vector.shape_cast %317 : vector<1x16x16xf32> to vector<16x16xf32>
    %cst_304 = arith.constant dense<0.000000e+00> : vector<16x16xf32>
    %319 = tpu.matmul %318, %310, %cst_304 {dimension_numbers = #tpu.dot_dimension_numbers<[1], [0], [0], [1], [0, 0, 1, 1], [], []>} : vector<16x16xf32>, vector<16x16xf32>, vector<16x16xf32> -> vector<16x16xf32>
    %c3_305 = arith.constant 3 : index
    %c0_306 = arith.constant 0 : index
    %c0_307 = arith.constant 0 : index
    %320 = vector.load %arg11[%c3_305, %c0_306, %c0_307] : memref<9x16x16xf32, #tpu.memory_space<vmem>>, vector<1x16x16xf32>
    %321 = vector.shape_cast %320 : vector<1x16x16xf32> to vector<16x16xf32>
    %cst_308 = arith.constant dense<0.000000e+00> : vector<16x16xf32>
    %322 = tpu.matmul %321, %310, %cst_308 {dimension_numbers = #tpu.dot_dimension_numbers<[1], [0], [0], [1], [0, 0, 1, 1], [], []>} : vector<16x16xf32>, vector<16x16xf32>, vector<16x16xf32> -> vector<16x16xf32>
    %c4_309 = arith.constant 4 : index
    %c0_310 = arith.constant 0 : index
    %c0_311 = arith.constant 0 : index
    %323 = vector.load %arg11[%c4_309, %c0_310, %c0_311] : memref<9x16x16xf32, #tpu.memory_space<vmem>>, vector<1x16x16xf32>
    %324 = vector.shape_cast %323 : vector<1x16x16xf32> to vector<16x16xf32>
    %cst_312 = arith.constant dense<0.000000e+00> : vector<16x16xf32>
    %325 = tpu.matmul %324, %310, %cst_312 {dimension_numbers = #tpu.dot_dimension_numbers<[1], [0], [0], [1], [0, 0, 1, 1], [], []>} : vector<16x16xf32>, vector<16x16xf32>, vector<16x16xf32> -> vector<16x16xf32>
    %c5_313 = arith.constant 5 : index
    %c0_314 = arith.constant 0 : index
    %c0_315 = arith.constant 0 : index
    %326 = vector.load %arg11[%c5_313, %c0_314, %c0_315] : memref<9x16x16xf32, #tpu.memory_space<vmem>>, vector<1x16x16xf32>
    %327 = vector.shape_cast %326 : vector<1x16x16xf32> to vector<16x16xf32>
    %cst_316 = arith.constant dense<0.000000e+00> : vector<16x16xf32>
    %328 = tpu.matmul %327, %310, %cst_316 {dimension_numbers = #tpu.dot_dimension_numbers<[1], [0], [0], [1], [0, 0, 1, 1], [], []>} : vector<16x16xf32>, vector<16x16xf32>, vector<16x16xf32> -> vector<16x16xf32>
    %c6_317 = arith.constant 6 : index
    %c0_318 = arith.constant 0 : index
    %c0_319 = arith.constant 0 : index
    %329 = vector.load %arg11[%c6_317, %c0_318, %c0_319] : memref<9x16x16xf32, #tpu.memory_space<vmem>>, vector<1x16x16xf32>
    %330 = vector.shape_cast %329 : vector<1x16x16xf32> to vector<16x16xf32>
    %cst_320 = arith.constant dense<0.000000e+00> : vector<16x16xf32>
    %331 = tpu.matmul %330, %310, %cst_320 {dimension_numbers = #tpu.dot_dimension_numbers<[1], [0], [0], [1], [0, 0, 1, 1], [], []>} : vector<16x16xf32>, vector<16x16xf32>, vector<16x16xf32> -> vector<16x16xf32>
    %c7_321 = arith.constant 7 : index
    %c0_322 = arith.constant 0 : index
    %c0_323 = arith.constant 0 : index
    %332 = vector.load %arg11[%c7_321, %c0_322, %c0_323] : memref<9x16x16xf32, #tpu.memory_space<vmem>>, vector<1x16x16xf32>
    %333 = vector.shape_cast %332 : vector<1x16x16xf32> to vector<16x16xf32>
    %cst_324 = arith.constant dense<0.000000e+00> : vector<16x16xf32>
    %334 = tpu.matmul %333, %310, %cst_324 {dimension_numbers = #tpu.dot_dimension_numbers<[1], [0], [0], [1], [0, 0, 1, 1], [], []>} : vector<16x16xf32>, vector<16x16xf32>, vector<16x16xf32> -> vector<16x16xf32>
    %c8_325 = arith.constant 8 : index
    %c0_326 = arith.constant 0 : index
    %c0_327 = arith.constant 0 : index
    %335 = vector.load %arg11[%c8_325, %c0_326, %c0_327] : memref<9x16x16xf32, #tpu.memory_space<vmem>>, vector<1x16x16xf32>
    %336 = vector.shape_cast %335 : vector<1x16x16xf32> to vector<16x16xf32>
    %cst_328 = arith.constant dense<0.000000e+00> : vector<16x16xf32>
    %337 = tpu.matmul %336, %310, %cst_328 {dimension_numbers = #tpu.dot_dimension_numbers<[1], [0], [0], [1], [0, 0, 1, 1], [], []>} : vector<16x16xf32>, vector<16x16xf32>, vector<16x16xf32> -> vector<16x16xf32>
    %cst_329 = arith.constant 0.000000e+00 : f32
    %338 = vector.broadcast %cst_329 : f32 to vector<64x16xf32>
    %339 = tpu.concatenate %313, %316, %322, %325 in 1 : vector<16x16xf32>, vector<16x16xf32>, vector<16x16xf32>, vector<16x16xf32> -> vector<16x64xf32>
    %c0_330 = arith.constant 0 : index
    %c0_331 = arith.constant 0 : index
    %c0_332 = arith.constant 0 : index
    %340 = vector.load %arg6[%c0_330, %c0_331, %c0_332] : memref<4x64x16xbf16, #tpu.memory_space<vmem>>, vector<1x64x16xbf16>
    %341 = vector.shape_cast %340 : vector<1x64x16xbf16> to vector<64x16xbf16>
    %342 = arith.truncf %339 : vector<16x64xf32> to vector<16x64xbf16>
    %cst_333 = arith.constant dense<0.000000e+00> : vector<16x16xf32>
    %343 = tpu.matmul %342, %341, %cst_333 {dimension_numbers = #tpu.dot_dimension_numbers<[1], [0], [0], [1], [0, 0, 1, 1], [], []>} : vector<16x64xbf16>, vector<64x16xbf16>, vector<16x16xf32> -> vector<16x16xf32>
    %c20 = arith.constant 20 : index
    %c0_334 = arith.constant 0 : index
    %344 = vector.load %arg14[%c20, %c0_334] : memref<22x16xf32, #tpu.memory_space<vmem>>, vector<1x16xf32>
    %345 = vector.broadcast %344 : vector<1x16xf32> to vector<16x16xf32>
    %346 = arith.mulf %343, %345 : vector<16x16xf32>
    %c21 = arith.constant 21 : index
    %c0_335 = arith.constant 0 : index
    %347 = vector.load %arg14[%c21, %c0_335] : memref<22x16xf32, #tpu.memory_space<vmem>>, vector<1x16xf32>
    %348 = vector.broadcast %347 : vector<1x16xf32> to vector<16x16xf32>
    %349 = arith.addf %346, %348 : vector<16x16xf32>
    %cst_336 = arith.constant 0.000000e+00 : f32
    %350 = vector.broadcast %cst_336 : f32 to vector<16x16xf32>
    %351 = arith.maximumf %349, %350 : vector<16x16xf32>
    %c0_337 = arith.constant 0 : index
    %c0_338 = arith.constant 0 : index
    %c0_339 = arith.constant 0 : index
    %352 = vector.load %arg12[%c0_337, %c0_338, %c0_339] : memref<4x64x16xf32, #tpu.memory_space<vmem>>, vector<1x64x16xf32>
    %353 = vector.shape_cast %352 : vector<1x64x16xf32> to vector<64x16xf32>
    %cst_340 = arith.constant dense<0.000000e+00> : vector<64x16xf32>
    %354 = tpu.matmul %353, %351, %cst_340 {dimension_numbers = #tpu.dot_dimension_numbers<[1], [0], [0], [1], [0, 0, 1, 1], [], []>} : vector<64x16xf32>, vector<16x16xf32>, vector<64x16xf32> -> vector<64x16xf32>
    %355 = arith.addf %338, %354 : vector<64x16xf32>
    %356 = tpu.concatenate %316, %319, %325, %328 in 1 : vector<16x16xf32>, vector<16x16xf32>, vector<16x16xf32>, vector<16x16xf32> -> vector<16x64xf32>
    %c1_341 = arith.constant 1 : index
    %c0_342 = arith.constant 0 : index
    %c0_343 = arith.constant 0 : index
    %357 = vector.load %arg6[%c1_341, %c0_342, %c0_343] : memref<4x64x16xbf16, #tpu.memory_space<vmem>>, vector<1x64x16xbf16>
    %358 = vector.shape_cast %357 : vector<1x64x16xbf16> to vector<64x16xbf16>
    %359 = arith.truncf %356 : vector<16x64xf32> to vector<16x64xbf16>
    %cst_344 = arith.constant dense<0.000000e+00> : vector<16x16xf32>
    %360 = tpu.matmul %359, %358, %cst_344 {dimension_numbers = #tpu.dot_dimension_numbers<[1], [0], [0], [1], [0, 0, 1, 1], [], []>} : vector<16x64xbf16>, vector<64x16xbf16>, vector<16x16xf32> -> vector<16x16xf32>
    %c20_345 = arith.constant 20 : index
    %c0_346 = arith.constant 0 : index
    %361 = vector.load %arg14[%c20_345, %c0_346] : memref<22x16xf32, #tpu.memory_space<vmem>>, vector<1x16xf32>
    %362 = vector.broadcast %361 : vector<1x16xf32> to vector<16x16xf32>
    %363 = arith.mulf %360, %362 : vector<16x16xf32>
    %c21_347 = arith.constant 21 : index
    %c0_348 = arith.constant 0 : index
    %364 = vector.load %arg14[%c21_347, %c0_348] : memref<22x16xf32, #tpu.memory_space<vmem>>, vector<1x16xf32>
    %365 = vector.broadcast %364 : vector<1x16xf32> to vector<16x16xf32>
    %366 = arith.addf %363, %365 : vector<16x16xf32>
    %cst_349 = arith.constant 0.000000e+00 : f32
    %367 = vector.broadcast %cst_349 : f32 to vector<16x16xf32>
    %368 = arith.maximumf %366, %367 : vector<16x16xf32>
    %c1_350 = arith.constant 1 : index
    %c0_351 = arith.constant 0 : index
    %c0_352 = arith.constant 0 : index
    %369 = vector.load %arg12[%c1_350, %c0_351, %c0_352] : memref<4x64x16xf32, #tpu.memory_space<vmem>>, vector<1x64x16xf32>
    %370 = vector.shape_cast %369 : vector<1x64x16xf32> to vector<64x16xf32>
    %cst_353 = arith.constant dense<0.000000e+00> : vector<64x16xf32>
    %371 = tpu.matmul %370, %368, %cst_353 {dimension_numbers = #tpu.dot_dimension_numbers<[1], [0], [0], [1], [0, 0, 1, 1], [], []>} : vector<64x16xf32>, vector<16x16xf32>, vector<64x16xf32> -> vector<64x16xf32>
    %372 = arith.addf %355, %371 : vector<64x16xf32>
    %373 = tpu.concatenate %322, %325, %331, %334 in 1 : vector<16x16xf32>, vector<16x16xf32>, vector<16x16xf32>, vector<16x16xf32> -> vector<16x64xf32>
    %c2_354 = arith.constant 2 : index
    %c0_355 = arith.constant 0 : index
    %c0_356 = arith.constant 0 : index
    %374 = vector.load %arg6[%c2_354, %c0_355, %c0_356] : memref<4x64x16xbf16, #tpu.memory_space<vmem>>, vector<1x64x16xbf16>
    %375 = vector.shape_cast %374 : vector<1x64x16xbf16> to vector<64x16xbf16>
    %376 = arith.truncf %373 : vector<16x64xf32> to vector<16x64xbf16>
    %cst_357 = arith.constant dense<0.000000e+00> : vector<16x16xf32>
    %377 = tpu.matmul %376, %375, %cst_357 {dimension_numbers = #tpu.dot_dimension_numbers<[1], [0], [0], [1], [0, 0, 1, 1], [], []>} : vector<16x64xbf16>, vector<64x16xbf16>, vector<16x16xf32> -> vector<16x16xf32>
    %c20_358 = arith.constant 20 : index
    %c0_359 = arith.constant 0 : index
    %378 = vector.load %arg14[%c20_358, %c0_359] : memref<22x16xf32, #tpu.memory_space<vmem>>, vector<1x16xf32>
    %379 = vector.broadcast %378 : vector<1x16xf32> to vector<16x16xf32>
    %380 = arith.mulf %377, %379 : vector<16x16xf32>
    %c21_360 = arith.constant 21 : index
    %c0_361 = arith.constant 0 : index
    %381 = vector.load %arg14[%c21_360, %c0_361] : memref<22x16xf32, #tpu.memory_space<vmem>>, vector<1x16xf32>
    %382 = vector.broadcast %381 : vector<1x16xf32> to vector<16x16xf32>
    %383 = arith.addf %380, %382 : vector<16x16xf32>
    %cst_362 = arith.constant 0.000000e+00 : f32
    %384 = vector.broadcast %cst_362 : f32 to vector<16x16xf32>
    %385 = arith.maximumf %383, %384 : vector<16x16xf32>
    %c2_363 = arith.constant 2 : index
    %c0_364 = arith.constant 0 : index
    %c0_365 = arith.constant 0 : index
    %386 = vector.load %arg12[%c2_363, %c0_364, %c0_365] : memref<4x64x16xf32, #tpu.memory_space<vmem>>, vector<1x64x16xf32>
    %387 = vector.shape_cast %386 : vector<1x64x16xf32> to vector<64x16xf32>
    %cst_366 = arith.constant dense<0.000000e+00> : vector<64x16xf32>
    %388 = tpu.matmul %387, %385, %cst_366 {dimension_numbers = #tpu.dot_dimension_numbers<[1], [0], [0], [1], [0, 0, 1, 1], [], []>} : vector<64x16xf32>, vector<16x16xf32>, vector<64x16xf32> -> vector<64x16xf32>
    %389 = arith.addf %372, %388 : vector<64x16xf32>
    %390 = tpu.concatenate %325, %328, %334, %337 in 1 : vector<16x16xf32>, vector<16x16xf32>, vector<16x16xf32>, vector<16x16xf32> -> vector<16x64xf32>
    %c3_367 = arith.constant 3 : index
    %c0_368 = arith.constant 0 : index
    %c0_369 = arith.constant 0 : index
    %391 = vector.load %arg6[%c3_367, %c0_368, %c0_369] : memref<4x64x16xbf16, #tpu.memory_space<vmem>>, vector<1x64x16xbf16>
    %392 = vector.shape_cast %391 : vector<1x64x16xbf16> to vector<64x16xbf16>
    %393 = arith.truncf %390 : vector<16x64xf32> to vector<16x64xbf16>
    %cst_370 = arith.constant dense<0.000000e+00> : vector<16x16xf32>
    %394 = tpu.matmul %393, %392, %cst_370 {dimension_numbers = #tpu.dot_dimension_numbers<[1], [0], [0], [1], [0, 0, 1, 1], [], []>} : vector<16x64xbf16>, vector<64x16xbf16>, vector<16x16xf32> -> vector<16x16xf32>
    %c20_371 = arith.constant 20 : index
    %c0_372 = arith.constant 0 : index
    %395 = vector.load %arg14[%c20_371, %c0_372] : memref<22x16xf32, #tpu.memory_space<vmem>>, vector<1x16xf32>
    %396 = vector.broadcast %395 : vector<1x16xf32> to vector<16x16xf32>
    %397 = arith.mulf %394, %396 : vector<16x16xf32>
    %c21_373 = arith.constant 21 : index
    %c0_374 = arith.constant 0 : index
    %398 = vector.load %arg14[%c21_373, %c0_374] : memref<22x16xf32, #tpu.memory_space<vmem>>, vector<1x16xf32>
    %399 = vector.broadcast %398 : vector<1x16xf32> to vector<16x16xf32>
    %400 = arith.addf %397, %399 : vector<16x16xf32>
    %cst_375 = arith.constant 0.000000e+00 : f32
    %401 = vector.broadcast %cst_375 : f32 to vector<16x16xf32>
    %402 = arith.maximumf %400, %401 : vector<16x16xf32>
    %c3_376 = arith.constant 3 : index
    %c0_377 = arith.constant 0 : index
    %c0_378 = arith.constant 0 : index
    %403 = vector.load %arg12[%c3_376, %c0_377, %c0_378] : memref<4x64x16xf32, #tpu.memory_space<vmem>>, vector<1x64x16xf32>
    %404 = vector.shape_cast %403 : vector<1x64x16xf32> to vector<64x16xf32>
    %cst_379 = arith.constant dense<0.000000e+00> : vector<64x16xf32>
    %405 = tpu.matmul %404, %402, %cst_379 {dimension_numbers = #tpu.dot_dimension_numbers<[1], [0], [0], [1], [0, 0, 1, 1], [], []>} : vector<64x16xf32>, vector<16x16xf32>, vector<64x16xf32> -> vector<64x16xf32>
    %406 = arith.addf %389, %405 : vector<64x16xf32>
    %c0_380 = arith.constant 0 : index
    %c0_381 = arith.constant 0 : index
    %c0_382 = arith.constant 0 : index
    %407 = vector.load %arg13[%c0_380, %c0_381, %c0_382] : memref<9x64x64xf32, #tpu.memory_space<vmem>>, vector<1x64x64xf32>
    %408 = vector.shape_cast %407 : vector<1x64x64xf32> to vector<64x64xf32>
    %cst_383 = arith.constant dense<0.000000e+00> : vector<64x16xf32>
    %409 = tpu.matmul %408, %406, %cst_383 {dimension_numbers = #tpu.dot_dimension_numbers<[1], [0], [0], [1], [0, 0, 1, 1], [], []>} : vector<64x64xf32>, vector<64x16xf32>, vector<64x16xf32> -> vector<64x16xf32>
    %c1_384 = arith.constant 1 : index
    %c0_385 = arith.constant 0 : index
    %c0_386 = arith.constant 0 : index
    %410 = vector.load %arg13[%c1_384, %c0_385, %c0_386] : memref<9x64x64xf32, #tpu.memory_space<vmem>>, vector<1x64x64xf32>
    %411 = vector.shape_cast %410 : vector<1x64x64xf32> to vector<64x64xf32>
    %cst_387 = arith.constant dense<0.000000e+00> : vector<64x16xf32>
    %412 = tpu.matmul %411, %406, %cst_387 {dimension_numbers = #tpu.dot_dimension_numbers<[1], [0], [0], [1], [0, 0, 1, 1], [], []>} : vector<64x64xf32>, vector<64x16xf32>, vector<64x16xf32> -> vector<64x16xf32>
    %c2_388 = arith.constant 2 : index
    %c0_389 = arith.constant 0 : index
    %c0_390 = arith.constant 0 : index
    %413 = vector.load %arg13[%c2_388, %c0_389, %c0_390] : memref<9x64x64xf32, #tpu.memory_space<vmem>>, vector<1x64x64xf32>
    %414 = vector.shape_cast %413 : vector<1x64x64xf32> to vector<64x64xf32>
    %cst_391 = arith.constant dense<0.000000e+00> : vector<64x16xf32>
    %415 = tpu.matmul %414, %406, %cst_391 {dimension_numbers = #tpu.dot_dimension_numbers<[1], [0], [0], [1], [0, 0, 1, 1], [], []>} : vector<64x64xf32>, vector<64x16xf32>, vector<64x16xf32> -> vector<64x16xf32>
    %c3_392 = arith.constant 3 : index
    %c0_393 = arith.constant 0 : index
    %c0_394 = arith.constant 0 : index
    %416 = vector.load %arg13[%c3_392, %c0_393, %c0_394] : memref<9x64x64xf32, #tpu.memory_space<vmem>>, vector<1x64x64xf32>
    %417 = vector.shape_cast %416 : vector<1x64x64xf32> to vector<64x64xf32>
    %cst_395 = arith.constant dense<0.000000e+00> : vector<64x16xf32>
    %418 = tpu.matmul %417, %406, %cst_395 {dimension_numbers = #tpu.dot_dimension_numbers<[1], [0], [0], [1], [0, 0, 1, 1], [], []>} : vector<64x64xf32>, vector<64x16xf32>, vector<64x16xf32> -> vector<64x16xf32>
    %c4_396 = arith.constant 4 : index
    %c0_397 = arith.constant 0 : index
    %c0_398 = arith.constant 0 : index
    %419 = vector.load %arg13[%c4_396, %c0_397, %c0_398] : memref<9x64x64xf32, #tpu.memory_space<vmem>>, vector<1x64x64xf32>
    %420 = vector.shape_cast %419 : vector<1x64x64xf32> to vector<64x64xf32>
    %cst_399 = arith.constant dense<0.000000e+00> : vector<64x16xf32>
    %421 = tpu.matmul %420, %406, %cst_399 {dimension_numbers = #tpu.dot_dimension_numbers<[1], [0], [0], [1], [0, 0, 1, 1], [], []>} : vector<64x64xf32>, vector<64x16xf32>, vector<64x16xf32> -> vector<64x16xf32>
    %c5_400 = arith.constant 5 : index
    %c0_401 = arith.constant 0 : index
    %c0_402 = arith.constant 0 : index
    %422 = vector.load %arg13[%c5_400, %c0_401, %c0_402] : memref<9x64x64xf32, #tpu.memory_space<vmem>>, vector<1x64x64xf32>
    %423 = vector.shape_cast %422 : vector<1x64x64xf32> to vector<64x64xf32>
    %cst_403 = arith.constant dense<0.000000e+00> : vector<64x16xf32>
    %424 = tpu.matmul %423, %406, %cst_403 {dimension_numbers = #tpu.dot_dimension_numbers<[1], [0], [0], [1], [0, 0, 1, 1], [], []>} : vector<64x64xf32>, vector<64x16xf32>, vector<64x16xf32> -> vector<64x16xf32>
    %c6_404 = arith.constant 6 : index
    %c0_405 = arith.constant 0 : index
    %c0_406 = arith.constant 0 : index
    %425 = vector.load %arg13[%c6_404, %c0_405, %c0_406] : memref<9x64x64xf32, #tpu.memory_space<vmem>>, vector<1x64x64xf32>
    %426 = vector.shape_cast %425 : vector<1x64x64xf32> to vector<64x64xf32>
    %cst_407 = arith.constant dense<0.000000e+00> : vector<64x16xf32>
    %427 = tpu.matmul %426, %406, %cst_407 {dimension_numbers = #tpu.dot_dimension_numbers<[1], [0], [0], [1], [0, 0, 1, 1], [], []>} : vector<64x64xf32>, vector<64x16xf32>, vector<64x16xf32> -> vector<64x16xf32>
    %c7_408 = arith.constant 7 : index
    %c0_409 = arith.constant 0 : index
    %c0_410 = arith.constant 0 : index
    %428 = vector.load %arg13[%c7_408, %c0_409, %c0_410] : memref<9x64x64xf32, #tpu.memory_space<vmem>>, vector<1x64x64xf32>
    %429 = vector.shape_cast %428 : vector<1x64x64xf32> to vector<64x64xf32>
    %cst_411 = arith.constant dense<0.000000e+00> : vector<64x16xf32>
    %430 = tpu.matmul %429, %406, %cst_411 {dimension_numbers = #tpu.dot_dimension_numbers<[1], [0], [0], [1], [0, 0, 1, 1], [], []>} : vector<64x64xf32>, vector<64x16xf32>, vector<64x16xf32> -> vector<64x16xf32>
    %c8_412 = arith.constant 8 : index
    %c0_413 = arith.constant 0 : index
    %c0_414 = arith.constant 0 : index
    %431 = vector.load %arg13[%c8_412, %c0_413, %c0_414] : memref<9x64x64xf32, #tpu.memory_space<vmem>>, vector<1x64x64xf32>
    %432 = vector.shape_cast %431 : vector<1x64x64xf32> to vector<64x64xf32>
    %cst_415 = arith.constant dense<0.000000e+00> : vector<64x16xf32>
    %433 = tpu.matmul %432, %406, %cst_415 {dimension_numbers = #tpu.dot_dimension_numbers<[1], [0], [0], [1], [0, 0, 1, 1], [], []>} : vector<64x64xf32>, vector<64x16xf32>, vector<64x16xf32> -> vector<64x16xf32>
    %434 = tpu.concatenate %409, %412, %418, %421 in 1 : vector<64x16xf32>, vector<64x16xf32>, vector<64x16xf32>, vector<64x16xf32> -> vector<64x64xf32>
    %c0_416 = arith.constant 0 : index
    %c0_417 = arith.constant 0 : index
    %c0_418 = arith.constant 0 : index
    %435 = vector.load %arg7[%c0_416, %c0_417, %c0_418] : memref<4x64x3xbf16, #tpu.memory_space<vmem>>, vector<1x64x3xbf16>
    %436 = vector.shape_cast %435 : vector<1x64x3xbf16> to vector<64x3xbf16>
    %437 = arith.truncf %434 : vector<64x64xf32> to vector<64x64xbf16>
    %cst_419 = arith.constant dense<0.000000e+00> : vector<64x3xf32>
    %438 = tpu.matmul %437, %436, %cst_419 {dimension_numbers = #tpu.dot_dimension_numbers<[1], [0], [0], [1], [0, 0, 1, 1], [], []>} : vector<64x64xbf16>, vector<64x3xbf16>, vector<64x3xf32> -> vector<64x3xf32>
    %c0_420 = arith.constant 0 : index
    %c0_421 = arith.constant 0 : index
    %439 = vector.load %arg15[%c0_420, %c0_421] : memref<1x3xf32, #tpu.memory_space<vmem>>, vector<1x3xf32>
    %440 = vector.broadcast %439 : vector<1x3xf32> to vector<64x3xf32>
    %441 = arith.addf %438, %440 : vector<64x3xf32>
    %442 = math.tanh %441 : vector<64x3xf32>
    %c0_422 = arith.constant 0 : index
    %c0_423 = arith.constant 0 : index
    %443 = vector.load %arg19[%c0_422, %c0_423] : memref<256x3xf32, #tpu.memory_space<vmem>>, vector<64x3xf32>
    tpu.vector_store %arg19[%c0_422, %c0_423], %442 {strides = array<i32>} : memref<256x3xf32, #tpu.memory_space<vmem>>, vector<64x3xf32>,
    %444 = tpu.concatenate %412, %415, %421, %424 in 1 : vector<64x16xf32>, vector<64x16xf32>, vector<64x16xf32>, vector<64x16xf32> -> vector<64x64xf32>
    %c1_424 = arith.constant 1 : index
    %c0_425 = arith.constant 0 : index
    %c0_426 = arith.constant 0 : index
    %445 = vector.load %arg7[%c1_424, %c0_425, %c0_426] : memref<4x64x3xbf16, #tpu.memory_space<vmem>>, vector<1x64x3xbf16>
    %446 = vector.shape_cast %445 : vector<1x64x3xbf16> to vector<64x3xbf16>
    %447 = arith.truncf %444 : vector<64x64xf32> to vector<64x64xbf16>
    %cst_427 = arith.constant dense<0.000000e+00> : vector<64x3xf32>
    %448 = tpu.matmul %447, %446, %cst_427 {dimension_numbers = #tpu.dot_dimension_numbers<[1], [0], [0], [1], [0, 0, 1, 1], [], []>} : vector<64x64xbf16>, vector<64x3xbf16>, vector<64x3xf32> -> vector<64x3xf32>
    %c0_428 = arith.constant 0 : index
    %c0_429 = arith.constant 0 : index
    %449 = vector.load %arg15[%c0_428, %c0_429] : memref<1x3xf32, #tpu.memory_space<vmem>>, vector<1x3xf32>
    %450 = vector.broadcast %449 : vector<1x3xf32> to vector<64x3xf32>
    %451 = arith.addf %448, %450 : vector<64x3xf32>
    %452 = math.tanh %451 : vector<64x3xf32>
    %c64 = arith.constant 64 : index
    %c0_430 = arith.constant 0 : index
    %453 = vector.load %arg19[%c64, %c0_430] : memref<256x3xf32, #tpu.memory_space<vmem>>, vector<64x3xf32>
    tpu.vector_store %arg19[%c64, %c0_430], %452 {strides = array<i32>} : memref<256x3xf32, #tpu.memory_space<vmem>>, vector<64x3xf32>,
    %454 = tpu.concatenate %418, %421, %427, %430 in 1 : vector<64x16xf32>, vector<64x16xf32>, vector<64x16xf32>, vector<64x16xf32> -> vector<64x64xf32>
    %c2_431 = arith.constant 2 : index
    %c0_432 = arith.constant 0 : index
    %c0_433 = arith.constant 0 : index
    %455 = vector.load %arg7[%c2_431, %c0_432, %c0_433] : memref<4x64x3xbf16, #tpu.memory_space<vmem>>, vector<1x64x3xbf16>
    %456 = vector.shape_cast %455 : vector<1x64x3xbf16> to vector<64x3xbf16>
    %457 = arith.truncf %454 : vector<64x64xf32> to vector<64x64xbf16>
    %cst_434 = arith.constant dense<0.000000e+00> : vector<64x3xf32>
    %458 = tpu.matmul %457, %456, %cst_434 {dimension_numbers = #tpu.dot_dimension_numbers<[1], [0], [0], [1], [0, 0, 1, 1], [], []>} : vector<64x64xbf16>, vector<64x3xbf16>, vector<64x3xf32> -> vector<64x3xf32>
    %c0_435 = arith.constant 0 : index
    %c0_436 = arith.constant 0 : index
    %459 = vector.load %arg15[%c0_435, %c0_436] : memref<1x3xf32, #tpu.memory_space<vmem>>, vector<1x3xf32>
    %460 = vector.broadcast %459 : vector<1x3xf32> to vector<64x3xf32>
    %461 = arith.addf %458, %460 : vector<64x3xf32>
    %462 = math.tanh %461 : vector<64x3xf32>
    %c128 = arith.constant 128 : index
    %c0_437 = arith.constant 0 : index
    %463 = vector.load %arg19[%c128, %c0_437] : memref<256x3xf32, #tpu.memory_space<vmem>>, vector<64x3xf32>
    tpu.vector_store %arg19[%c128, %c0_437], %462 {strides = array<i32>} : memref<256x3xf32, #tpu.memory_space<vmem>>, vector<64x3xf32>,
    %464 = tpu.concatenate %421, %424, %430, %433 in 1 : vector<64x16xf32>, vector<64x16xf32>, vector<64x16xf32>, vector<64x16xf32> -> vector<64x64xf32>
    %c3_438 = arith.constant 3 : index
    %c0_439 = arith.constant 0 : index
    %c0_440 = arith.constant 0 : index
    %465 = vector.load %arg7[%c3_438, %c0_439, %c0_440] : memref<4x64x3xbf16, #tpu.memory_space<vmem>>, vector<1x64x3xbf16>
    %466 = vector.shape_cast %465 : vector<1x64x3xbf16> to vector<64x3xbf16>
    %467 = arith.truncf %464 : vector<64x64xf32> to vector<64x64xbf16>
    %cst_441 = arith.constant dense<0.000000e+00> : vector<64x3xf32>
    %468 = tpu.matmul %467, %466, %cst_441 {dimension_numbers = #tpu.dot_dimension_numbers<[1], [0], [0], [1], [0, 0, 1, 1], [], []>} : vector<64x64xbf16>, vector<64x3xbf16>, vector<64x3xf32> -> vector<64x3xf32>
    %c0_442 = arith.constant 0 : index
    %c0_443 = arith.constant 0 : index
    %469 = vector.load %arg15[%c0_442, %c0_443] : memref<1x3xf32, #tpu.memory_space<vmem>>, vector<1x3xf32>
    %470 = vector.broadcast %469 : vector<1x3xf32> to vector<64x3xf32>
    %471 = arith.addf %468, %470 : vector<64x3xf32>
    %472 = math.tanh %471 : vector<64x3xf32>
    %c192 = arith.constant 192 : index
    %c0_444 = arith.constant 0 : index
    %473 = vector.load %arg19[%c192, %c0_444] : memref<256x3xf32, #tpu.memory_space<vmem>>, vector<64x3xf32>
    tpu.vector_store %arg19[%c192, %c0_444], %472 {strides = array<i32>} : memref<256x3xf32, #tpu.memory_space<vmem>>, vector<64x3xf32>,
    return
  }
  func.func @transform_0(%arg0: i32) -> (i32, i32) {
    %c0_i32 = arith.constant 0 : i32
    %c0_i32_0 = arith.constant 0 : i32
    return %arg0, %c0_i32 : i32, i32
  }
  func.func @transform_1(%arg0: i32) -> (i32, i32) {
    %c0_i32 = arith.constant 0 : i32
    %c0_i32_0 = arith.constant 0 : i32
    %c0_i32_1 = arith.constant 0 : i32
    return %c0_i32, %c0_i32_0 : i32, i32
  }
  func.func @transform_2(%arg0: i32) -> (i32, i32) {
    %c0_i32 = arith.constant 0 : i32
    %c0_i32_0 = arith.constant 0 : i32
    %c0_i32_1 = arith.constant 0 : i32
    return %c0_i32, %c0_i32_0 : i32, i32
  }
  func.func @transform_3(%arg0: i32) -> (i32, i32, i32) {
    %c0_i32 = arith.constant 0 : i32
    %c0_i32_0 = arith.constant 0 : i32
    %c0_i32_1 = arith.constant 0 : i32
    %c0_i32_2 = arith.constant 0 : i32
    return %c0_i32, %c0_i32_0, %c0_i32_1 : i32, i32, i32
  }
  func.func @transform_4(%arg0: i32) -> (i32, i32, i32) {
    %c0_i32 = arith.constant 0 : i32
    %c0_i32_0 = arith.constant 0 : i32
    %c0_i32_1 = arith.constant 0 : i32
    %c0_i32_2 = arith.constant 0 : i32
    return %c0_i32, %c0_i32_0, %c0_i32_1 : i32, i32, i32
  }
  func.func @transform_5(%arg0: i32) -> (i32, i32, i32) {
    %c0_i32 = arith.constant 0 : i32
    %c0_i32_0 = arith.constant 0 : i32
    %c0_i32_1 = arith.constant 0 : i32
    %c0_i32_2 = arith.constant 0 : i32
    return %c0_i32, %c0_i32_0, %c0_i32_1 : i32, i32, i32
  }
  func.func @transform_6(%arg0: i32) -> (i32, i32, i32) {
    %c0_i32 = arith.constant 0 : i32
    %c0_i32_0 = arith.constant 0 : i32
    %c0_i32_1 = arith.constant 0 : i32
    %c0_i32_2 = arith.constant 0 : i32
    return %c0_i32, %c0_i32_0, %c0_i32_1 : i32, i32, i32
  }
  func.func @transform_7(%arg0: i32) -> (i32, i32) {
    %c0_i32 = arith.constant 0 : i32
    %c0_i32_0 = arith.constant 0 : i32
    %c0_i32_1 = arith.constant 0 : i32
    return %c0_i32, %c0_i32_0 : i32, i32
  }
  func.func @transform_8(%arg0: i32) -> (i32, i32) {
    %c0_i32 = arith.constant 0 : i32
    %c0_i32_0 = arith.constant 0 : i32
    %c0_i32_1 = arith.constant 0 : i32
    return %c0_i32, %c0_i32_0 : i32, i32
  }
  func.func @transform_9(%arg0: i32) -> (i32, i32, i32) {
    %c0_i32 = arith.constant 0 : i32
    %c0_i32_0 = arith.constant 0 : i32
    %c0_i32_1 = arith.constant 0 : i32
    %c0_i32_2 = arith.constant 0 : i32
    return %c0_i32, %c0_i32_0, %c0_i32_1 : i32, i32, i32
  }
  func.func @transform_10(%arg0: i32) -> (i32, i32, i32) {
    %c0_i32 = arith.constant 0 : i32
    %c0_i32_0 = arith.constant 0 : i32
    %c0_i32_1 = arith.constant 0 : i32
    %c0_i32_2 = arith.constant 0 : i32
    return %c0_i32, %c0_i32_0, %c0_i32_1 : i32, i32, i32
  }
  func.func @transform_11(%arg0: i32) -> (i32, i32, i32) {
    %c0_i32 = arith.constant 0 : i32
    %c0_i32_0 = arith.constant 0 : i32
    %c0_i32_1 = arith.constant 0 : i32
    %c0_i32_2 = arith.constant 0 : i32
    return %c0_i32, %c0_i32_0, %c0_i32_1 : i32, i32, i32
  }
  func.func @transform_12(%arg0: i32) -> (i32, i32, i32) {
    %c0_i32 = arith.constant 0 : i32
    %c0_i32_0 = arith.constant 0 : i32
    %c0_i32_1 = arith.constant 0 : i32
    %c0_i32_2 = arith.constant 0 : i32
    return %c0_i32, %c0_i32_0, %c0_i32_1 : i32, i32, i32
  }
  func.func @transform_13(%arg0: i32) -> (i32, i32) {
    %c0_i32 = arith.constant 0 : i32
    %c0_i32_0 = arith.constant 0 : i32
    %c0_i32_1 = arith.constant 0 : i32
    return %c0_i32, %c0_i32_0 : i32, i32
  }
  func.func @transform_14(%arg0: i32) -> (i32, i32) {
    %c0_i32 = arith.constant 0 : i32
    %c0_i32_0 = arith.constant 0 : i32
    %c0_i32_1 = arith.constant 0 : i32
    return %c0_i32, %c0_i32_0 : i32, i32
  }
  func.func @transform_15(%arg0: i32) -> (i32, i32) {
    %c0_i32 = arith.constant 0 : i32
    %c0_i32_0 = arith.constant 0 : i32
    return %arg0, %c0_i32 : i32, i32
  }
  func.func @transform_16(%arg0: i32) -> (i32, i32) {
    %c0_i32 = arith.constant 0 : i32
    %c0_i32_0 = arith.constant 0 : i32
    return %arg0, %c0_i32 : i32, i32
  }
  func.func @transform_17(%arg0: i32) -> (i32, i32) {
    %c0_i32 = arith.constant 0 : i32
    %c0_i32_0 = arith.constant 0 : i32
    return %arg0, %c0_i32 : i32, i32
  }
  func.func @transform_18(%arg0: i32) -> (i32, i32) {
    %c0_i32 = arith.constant 0 : i32
    %c0_i32_0 = arith.constant 0 : i32
    return %arg0, %c0_i32 : i32, i32
  }
}

</mosaic_0001>

<bundles_post_ra>
// kernel: vq_cvae_forward.1
= control target key start
LH: loop header
LB: loop body
LE: loop exit
PB: predicated region body
PF: predicated region fallthrough
CT: control target
= control target key end

     0   :  { %s17278_s0 = inlined_call_operand.vmem [shape: f32[128,48], index: 0, kind: input, shape index: {}]   ;;  %s17279_s1 = inlined_call_operand.vmem [shape: bf16[48,16], index: 1, kind: input, shape index: {}]   ;;  %s17280_s2 = inlined_call_operand.vmem [shape: bf16[256,16], index: 2, kind: input, shape index: {}]   ;;  %s17281_s3 = inlined_call_operand.vmem [shape: bf16[4,144,16], index: 3, kind: input, shape index: {}]   ;;  %s17282_s4 = inlined_call_operand.vmem [shape: bf16[4,16,16], index: 4, kind: input, shape index: {}]   ;;  %s17283_s5 = inlined_call_operand.vmem [shape: bf16[4,64,16], index: 5, kind: input, shape index: {}]   ;;  %s17284_s6 = inlined_call_operand.vmem [shape: bf16[4,64,3], index: 6, kind: input, shape index: {}]   ;;  %s17285_s7 = inlined_call_operand.vmem [shape: f32[16,10], index: 7, kind: input, shape index: {}]   ;;  %s17286_s8 = inlined_call_operand.vmem [shape: f32[10,16], index: 8, kind: input, shape index: {}]   ;;  %s17287_s9 = inlined_call_operand.vmem [shape: f32[16,16,64], index: 9, kind: input, shape index: {}]   ;;  %s17288_s10 = inlined_call_operand.vmem [shape: f32[9,16,16], index: 10, kind: input, shape index: {}]   ;;  %s17289_s11 = inlined_call_operand.vmem [shape: f32[4,64,16], index: 11, kind: input, shape index: {}]   ;;  %s17290_s12 = inlined_call_operand.vmem [shape: f32[9,64,64], index: 12, kind: input, shape index: {}]   ;;  %s17291_s13 = inlined_call_operand.vmem [shape: f32[22,16], index: 13, kind: input, shape index: {}]   ;;  %s17292_s14 = inlined_call_operand.vmem [shape: f32[1,3], index: 14, kind: input, shape index: {}]   ;;  %s17293_s15 = inlined_call_operand.hbm [shape: f32[32,16], index: 15, kind: output, shape index: {0}]   ;;  %s17294_s16 = inlined_call_operand.hbm [shape: f32[32,16], index: 16, kind: output, shape index: {1}]   ;;  %s17295_s17 = inlined_call_operand.vmem [shape: s32[32,1], index: 17, kind: output, shape index: {2}]   ;;  %s17296_s18 = inlined_call_operand.vmem [shape: f32[512,3], index: 18, kind: output, shape index: {3}]  }
   0x1   :  { %17323 = sst [smem:[#allocation15_spill]] %s17278_s0 }
   0x2   :  { %17324 = sst [smem:[#allocation16_spill]] %s17279_s1 }
   0x3   :  { %17325 = sst [smem:[#allocation17_spill]] %s17280_s2 }
   0x4   :  { %17326 = sst [smem:[#allocation18_spill]] %s17285_s7 }
   0x5   :  { %17327 = sst [smem:[#allocation19_spill]] %s17286_s8 }
   0x6   :  { %17328 = sst [smem:[#allocation20_spill]] %s17287_s9 }
   0x7   :  { %17329 = sst [smem:[#allocation21_spill]] %s17295_s17 }
   0x8   :  { %17330 = sst [smem:[#allocation22_spill]] %s17296_s18 }
   0x9   :  { %24 = vsyncpa [#allocation3], 0 }
   0xa   :  { %26 = vsyncpa [#allocation3 + $0x1], 0 }
   0xb   :  { %27 = vsyncpa [#allocation5], 0 }
   0xc   :  { %29 = vsyncpa [#allocation5 + $0x1], 0  ;;  %s14730_s27 = smov 0   ;;  %s14732_s28 = smov 0  }
   0xd   :  { %s14734_s29 = smov 0   ;;  %s14736_s30 = smov 0  }
   0xe LB: > { %17331 = sst [smem:[#allocation8_spill]] %s14606_s27  ;;  %s14751_s0 = sadd.s32 4294967295, %s14618_s30   ;;  %s14618_s30 = sphi %s14736_s30, %s17359_s30   ;;  %s14614_s29 = sphi %s14734_s29, %s17362_s29   ;;  %s14610_s28 = sphi %s14732_s28, %s17361_s28   ;;  %s14606_s27 = sphi %s14730_s27, %s17360_s27  }
   0xf   : > { %17332 = sst [smem:[#allocation9_spill]] %s14610_s28  ;;  %s10772_s19 = sadd.s32 4294967294, %s14618_s30  }
  0x10   : > { %17333 = sst [smem:[#allocation10_spill]] %s14614_s29  ;;  %s14755_s1 = sadd.s32 1, %s14618_s30  }
  0x11   : > { %17334 = sst [smem:[#allocation11_spill]] %s14618_s30  ;;  %s362_s20 = sadd.s32 1, %s14614_s29 }
  0x12   : > { %17335 = sst [smem:[#allocation12_spill]] %s14755_s1  ;;  %s359_s21 = ssub.s32 %s14618_s30, %s14755_s1 }
  0x13   : > { %p372_p0 = scmp.ne.s32.totalorder %s14614_s29, %s14610_s28  ;;  %p360_p1 = scmp.eq.s32.totalorder %s359_s21, 0 }
  0x14   : > { %p373_p2 = scmp.eq.s32.totalorder %s14751_s0, 1  ;;  %p378_p3 = scmp.ne.s32.totalorder %s14610_s28, %s14606_s27 }
  0x15   : > { %p379_p4 = scmp.eq.s32.totalorder %s10772_s19, 1  ;;  %p10775_p7 = scmp.ge.s32.totalorder %s14618_s30, 1 }
  0x16   : > { %s14766_s22 = scalar_select %p360_p1, %s14614_s29, %s362_s20  }
  0x17   : > { %p14768_p5 = por %p373_p2, %p372_p0  ;;  %p14772_p6 = por %p379_p4, %p378_p3 }
  0x18   : > { %17336 = sst [smem:[#allocation13_spill]] %s14766_s22  ;;  %p526_p8 = scmp.lt.s32.totalorder %s14618_s30, 3 }
  0x19   : > { %s17338_s23 = scalar_select %p14772_p6, 1, 0 }
  0x1a   : > { %p527_p9 = pnand %p10775_p7, %p526_p8 }
  0x1b   : > { %17339 = sst [smem:[#allocation14_spill]] %s17338_s23  ;;  %s17340_s26 = sld [smem:[#allocation16_spill]] (!%p527_p9)  ;;  %vm652_vm0 = vcmask (!%p527_p9), 392192   ;;  %vm766_vm1 = vcmask (!%p527_p9), 523264   ;;  %v10791_v17 = vld [vmem:[%s17291_s13] ss:$0 sm:$0xff] (!%p527_p9) }
  0x1c   : > { %530 = sbr.rel (%p527_p9) target bundleno = 6615 (0x19d7), region = 80  ;;  %s10778_s19 = sshll.u32 (!%p527_p9), %s14751_s0, 3  ;;  %v10792_v19 = vld [vmem:[%s17291_s13 + $0x1] ss:$0 sm:$0xff] (!%p527_p9)  ;;  %vm2220_vm2 = vcmask (!%p527_p9), 130048   ;;  %vm2223_vm3 = vcmask (!%p527_p9), 261120  }
  0x1d   : > { %p596_p10 = scmp.lt.s32.totalorder (!%p527_p9), %s10778_s19, 15  ;;  %s17341_s24 = sld [smem:[#allocation15_spill]] (!%p527_p9)  ;;  %vm2230_vm4 = vcmask (!%p527_p9), 654336   ;;  %vm2233_vm5 = vcmask (!%p527_p9), 785408   ;;  %vm2236_vm6 = vcmask (!%p527_p9), 916480   ;;  %vm14629_vm7 = vmmov (!%p527_p9), 0  }
  0x1e   : > { %s17342_s9 = sld [smem:[#allocation20_spill]] (!%p527_p9)  ;;  %s17310_s27 = smov (!%p527_p9), 48   ;;  %vm4509_vm8 = vcmask (!%p527_p9), 80896   ;;  %vm4582_vm13 = vcmask (!%p527_p9), 1041408   ;;  %vm14630_vm14 = vmmov (!%p527_p9), 1  }
  0x1f   : > { %s17306_s29 = smov (!%p527_p9), 64   ;;  %s17344_s22 = smov (!%p527_p9), 48   ;;  %vm13487_vm15 = vmpackc.low (!%p527_p9), %vm4582_vm13, %vm14630_vm14 }
  0x20   : > { %s17317_s21 = smov (!%p527_p9), 96   ;;  %s17345_s23 = smov (!%p527_p9), 64  }
  0x21   : > { %v14351_v0 = vld [vmem:[%s17340_s26] sm:$0xff] (!%p527_p9)   ;;  %v14352_v1 = vld [vmem:[%s17340_s26 + $0x8] sm:$0xff] (!%p527_p9)   ;;  %v14353_v2 = vld [vmem:[%s17340_s26 + $0x10] sm:$0xff] (!%p527_p9)   ;;  %s17347_s20 = smov (!%p527_p9), 96   ;;  %s17349_s26 = smov (!%p527_p9), 16  }
  0x22   : > { %12055 = vmatprep.subr.bf16.mxu0 (!%p527_p9), %v14351_v0  ;;  %s17351_s7 = sld [smem:[#allocation18_spill]] (!%p527_p9)  ;;  %s17352_s8 = sld [smem:[#allocation19_spill]] (!%p527_p9) }
  0x23   : > { %12056 = vmatpush3.bf16.msra.mxu0 %v14351_v0  ;;  %s17364_s19 = smov (!%p596_p10, %s10778_s19), 15  ;;  %s17353_s17 = sld [smem:[#allocation21_spill]] }
  0x24   : > { %12057 = vmatprep.subr.bf16.mxu0 %v14352_v1  ;;  %s10779_s1 = sshll.u32 %s17364_s19, 3  ;;  %v764_v15 = vld [vmem:[%s17342_s9] sm:$0xff]  ;;  %v10795_v16 = vld [vmem:[%s17342_s9 + $0x10] sm:$0xff]  ;;  %v765_v55 = vld [vmem:[%s17342_s9 + $0x8] sm:$0xff]  ;;  %s17343_s19 = sld [smem:[#allocation17_spill]] }
  0x25   : > { %s599_s25 = scalar_lea.vmem %s17341_s24, %s10779_s1  ;;  %12085 = vmatprep.mubr.msk.f32.mxu1 %vm766_vm1, %v764_v15  ;;  %v10796_v56 = vld [vmem:[%s17342_s9 + $0x18] sm:$0xff]  ;;  %v10799_v57 = vld [vmem:[%s17342_s9 + $0x20] sm:$0xff]  ;;  %v10803_v58 = vld [vmem:[%s17342_s9 + $0x30] sm:$0xff]  ;;  %s17308_s24 = smov 16  }
  0x26   : > { %v616_v3 = vld [vmem:[%s599_s25] sm:$0xff]  ;;  %v617_v4 = vld [vmem:[%s599_s25 + $0x8] sm:$0xff]  ;;  %v618_v5 = vld [vmem:[%s599_s25 + $0x10] sm:$0xff]  ;;  %s17304_s1 = smov 80  }
  0x27   : > { %12058 = vmatpush3.bf16.msra.mxu0 %v14352_v1  ;;  %v630_v6 = vpack.c.bf16 %v617_v4, %v616_v3  ;;  %v619_v7 = vld [vmem:[%s599_s25 + $0x18] sm:$0xff]  ;;  %v620_v8 = vld [vmem:[%s599_s25 + $0x20] sm:$0xff]  ;;  %v621_v9 = vld [vmem:[%s599_s25 + $0x28] sm:$0xff] }
  0x28   : > { %12059 = vmatprep.subr.bf16.mxu0 %v14353_v2  ;;  %v631_v10 = vpack.c.bf16 %v619_v7, %v618_v5  ;;  %v632_v11 = vpack.c.bf16 %v621_v9, %v620_v8  ;;  %v622_v12 = vld [vmem:[%s599_s25 + $0x30] sm:$0xff]  ;;  %v623_v13 = vld [vmem:[%s599_s25 + $0x38] sm:$0xff]  ;;  %v10800_v59 = vld [vmem:[%s17342_s9 + $0x28] sm:$0xff]  ;;  %s17312_s25 = smov 32  }
  0x29   : > { %12061 = vmatprep.mubr.msk.bf16.mxu0 %vm652_vm0, %v630_v6  ;;  %v633_v14 = vpack.c.bf16 %v623_v13, %v622_v12  ;;  %v10804_v60 = vld [vmem:[%s17342_s9 + $0x38] sm:$0xff]  ;;  %v10807_v61 = vld [vmem:[%s17342_s9 + $0x40] sm:$0xff]  ;;  %v10811_v62 = vld [vmem:[%s17342_s9 + $0x50] sm:$0xff] }
  0x2a   : > { %v10808_v63 = vld [vmem:[%s17342_s9 + $0x48] sm:$0xff]  ;;  %v10812_v0 = vld [vmem:[%s17342_s9 + $0x58] sm:$0xff]  ;;  %v10815_v1 = vld [vmem:[%s17342_s9 + $0x60] sm:$0xff] }
  0x2b   : > { %12060 = vmatpush3.bf16.msra.mxu0 %v14353_v2  ;;  %v10819_v2 = vld [vmem:[%s17342_s9 + $0x70] sm:$0xff]  ;;  %v10816_v3 = vld [vmem:[%s17342_s9 + $0x68] sm:$0xff]  ;;  %v10820_v4 = vld [vmem:[%s17342_s9 + $0x78] sm:$0xff] }
  0x2c   : > { %v10823_v5 = vld [vmem:[%s17342_s9 + $0x80] sm:$0xff]  ;;  %v10827_v6 = vld [vmem:[%s17342_s9 + $0x90] sm:$0xff]  ;;  %v10824_v7 = vld [vmem:[%s17342_s9 + $0x88] sm:$0xff] }
  0x2d   : > { %v10828_v8 = vld [vmem:[%s17342_s9 + $0x98] sm:$0xff]  ;;  %v10831_v9 = vld [vmem:[%s17342_s9 + $0xa0] sm:$0xff]  ;;  %v10840_v15 = vld [vmem:[%s17342_s9 + $0xc8] sm:$0xff] }
  0x2e   : > { %12062 = vmatmul.mubr.msk.bf16.vlgmr.msra.gmra.mrb[0].mxu0 %vm652_vm0, %v631_v10  ;;  %v10835_v10 = vld [vmem:[%s17342_s9 + $0xb0] sm:$0xff]  ;;  %v10836_v12 = vld [vmem:[%s17342_s9 + $0xb8] sm:$0xff]  ;;  %v10839_v13 = vld [vmem:[%s17342_s9 + $0xc0] sm:$0xff] }
  0x2f   : > { %12065 = vmatprep.mubr.msk.bf16.mxu0 %vm652_vm0, %v632_v11  ;;  %v10832_v11 = vld [vmem:[%s17342_s9 + $0xa8] sm:$0xff] }
  0x36   : > { %12066 = vmatmul.mubr.msk.bf16.gmra.mrb[4].mxu0 %vm652_vm0, %v633_v14  ;;  %v10843_v14 = vld [vmem:[%s17342_s9 + $0xd0] sm:$0xff] }
  0x37   : > { %12104 = vmatprep.mubr.msk.f32.mxu0 %vm766_vm1, %v10795_v16  ;;  %v10844_v16 = vld [vmem:[%s17342_s9 + $0xd8] sm:$0xff] }
 0x101   : > { %v12063_v18 = vpop.f32.mrb[0].mxu0 }
 0x102   : > { %v737_v20 = vmul.f32 %v12063_v18, %v10791_v17  ;;  %v699_v21 = vpop.f32.mrb[1].mxu0  ;;  %v10851_v18 = vld [vmem:[%s17342_s9 + $0xf0] sm:$0xff] }
 0x103   : > { %v735_v22 = vmul.f32 %v10791_v17, %v699_v21  ;;  %v12064_v23 = vpop.f32.mrb[2].mxu0 }
 0x104   : > { %v750_v24 = vadd.f32 %v10792_v19, %v737_v20  ;;  %v738_v25 = vmul.f32 %v12064_v23, %v10791_v17  ;;  %v702_v26 = vpop.f32.mrb[3].mxu0  ;;  %v10852_v20 = vld [vmem:[%s17342_s9 + $0xf8] sm:$0xff] }
 0x105   : > { %v748_v27 = vadd.f32 %v10792_v19, %v735_v22  ;;  %v736_v28 = vmul.f32 %v10791_v17, %v702_v26 }
 0x106   : > { %v751_v29 = vadd.f32 %v10792_v19, %v738_v25  ;;  %v758_v31 = vmax.f32 %v750_v24, 0.0 }
 0x107   : > { %v749_v30 = vadd.f32 %v10792_v19, %v736_v28  ;;  %v756_v33 = vmax.f32 %v748_v27, 0.0 }
 0x108   : > { %v759_v32 = vmax.f32 %v751_v29, 0.0 }
 0x109   : > { %v757_v34 = vmax.f32 %v749_v30, 0.0  ;;  %v12067_v35 = vpop.f32.mrb[4].mxu0 }
 0x10a   : > { %v14809_v36 = vpack.c.bf16 %v759_v32, %v758_v31  ;;  %v741_v37 = vmul.f32 %v12067_v35, %v10791_v17  ;;  %v715_v38 = vpop.f32.mrb[5].mxu0 }
 0x10b   : > { %v14811_v39 = vpack.c.bf16 %v757_v34, %v756_v33  ;;  %v739_v40 = vmul.f32 %v10791_v17, %v715_v38  ;;  %v12068_v41 = vpop.f32.mrb[6].mxu0 }
 0x10c   : > { %v754_v42 = vadd.f32 %v10792_v19, %v741_v37  ;;  %v742_v43 = vmul.f32 %v12068_v41, %v10791_v17  ;;  %v718_v44 = vpop.f32.mrb[7].mxu0 }
 0x10d   : > { %v752_v45 = vadd.f32 %v10792_v19, %v739_v40  ;;  %v740_v46 = vmul.f32 %v10791_v17, %v718_v44  ;;  %13155 = vmatprep.subr.bf16.mxu1 %v14811_v39  ;;  %13171 = vmatprep.subr.bf16.mxu0 %v14811_v39  ;;  %v10847_v17 = vld [vmem:[%s17342_s9 + $0xe0] sm:$0xff] }
 0x10e   : > { %v755_v47 = vadd.f32 %v10792_v19, %v742_v43  ;;  %13157 = vmatpush3.bf16.msra.mxu1 %v14811_v39  ;;  %13173 = vmatpush3.bf16.msra.mxu0 %v14811_v39  ;;  %v762_v49 = vmax.f32 %v754_v42, 0.0 }
 0x10f   : > { %v753_v48 = vadd.f32 %v10792_v19, %v740_v46  ;;  %13159 = vmatprep.subr.bf16.mxu1 %v14809_v36  ;;  %13175 = vmatprep.subr.bf16.mxu0 %v14809_v36  ;;  %v760_v51 = vmax.f32 %v752_v45, 0.0  ;;  %v10848_v19 = vld [vmem:[%s17342_s9 + $0xe8] sm:$0xff]  ;;  %s17348_s9 = smov 112  }
 0x110   : > { %v763_v50 = vmax.f32 %v755_v47, 0.0 }
 0x111   : > { %v761_v52 = vmax.f32 %v753_v48, 0.0 }
 0x112   : > { %v14819_v53 = vpack.c.bf16 %v763_v50, %v762_v49  ;;  %13161 = vmatpush3.bf16.msra.mxu1 %v14809_v36  ;;  %13177 = vmatpush3.bf16.msra.mxu0 %v14809_v36  ;;  %v14354_v49 = vld [vmem:[%s17343_s19 + $0x40] sm:$0xff]  }
 0x113   : > { %v14823_v54 = vpack.c.bf16 %v761_v52, %v760_v51  ;;  %v14355_v52 = vld [vmem:[%s17343_s19] sm:$0xff]  }
 0x115   : > { %13163 = vmatprep.subr.bf16.mxu1 %v14823_v54  ;;  %13179 = vmatprep.subr.bf16.mxu0 %v14823_v54 }
 0x116   : > { %13165 = vmatpush3.bf16.msra.mxu1 %v14823_v54  ;;  %13181 = vmatpush3.bf16.msra.mxu0 %v14823_v54 }
 0x117   : > { %13167 = vmatprep.subr.bf16.mxu1 %v14819_v53  ;;  %13183 = vmatprep.subr.bf16.mxu0 %v14819_v53 }
 0x11a   : > { %13169 = vmatpush3.bf16.msra.mxu1 %v14819_v53  ;;  %13185 = vmatpush3.bf16.msra.mxu0 %v14819_v53 }
 0x11b   : > { %13187 = vmatprep.subr.bf16.mxu1 %v14811_v39  ;;  %13203 = vmatprep.subr.bf16.mxu0 %v14811_v39 }
 0x11d   : > { %12086 = vmatmul.mubr.msk.f32.vlgmr.msra.gmra.mrb[0].mxu1 %vm766_vm1, %v765_v55  ;;  %12105 = vmatmul.mubr.msk.f32.vlgmr.msra.gmra.mrb[8].mxu0 %vm766_vm1, %v10796_v56 }
 0x11e   : > { %13189 = vmatpush3.bf16.msra.mxu1 %v14811_v39  ;;  %13205 = vmatpush3.bf16.msra.mxu0 %v14811_v39 }
 0x11f   : > { %13191 = vmatprep.subr.bf16.mxu1 %v14809_v36  ;;  %13207 = vmatprep.subr.bf16.mxu0 %v14809_v36 }
 0x120   : > { %12123 = vmatprep.mubr.msk.f32.mxu1 %vm766_vm1, %v10799_v57  ;;  %12142 = vmatprep.mubr.msk.f32.mxu0 %vm766_vm1, %v10803_v58  ;;  %v14356_v57 = vld [vmem:[%s17343_s19 + $0x48] sm:$0xff]  }
 0x121   : > { %v14357_v58 = vld [vmem:[%s17343_s19 + $0x8] sm:$0xff]  }
 0x122   : > { %13193 = vmatpush3.bf16.msra.mxu1 %v14809_v36  ;;  %13209 = vmatpush3.bf16.msra.mxu0 %v14809_v36 }
 0x123   : > { %13195 = vmatprep.subr.bf16.mxu1 %v14823_v54  ;;  %13211 = vmatprep.subr.bf16.mxu0 %v14823_v54 }
 0x126   : > { %13197 = vmatpush3.bf16.msra.mxu1 %v14823_v54  ;;  %13213 = vmatpush3.bf16.msra.mxu0 %v14823_v54 }
 0x127   : > { %13199 = vmatprep.subr.bf16.mxu1 %v14819_v53  ;;  %13215 = vmatprep.subr.bf16.mxu0 %v14819_v53 }
 0x12a   : > { %13201 = vmatpush3.bf16.msra.mxu1 %v14819_v53  ;;  %13217 = vmatpush3.bf16.msra.mxu0 %v14819_v53 }
 0x12b   : > { %13219 = vmatprep.subr.bf16.mxu1 %v14811_v39  ;;  %13235 = vmatprep.subr.bf16.mxu0 %v14811_v39 }
 0x12d   : > { %12124 = vmatmul.mubr.msk.f32.vlgmr.msra.gmra.mrb[2].mxu1 %vm766_vm1, %v10800_v59  ;;  %12143 = vmatmul.mubr.msk.f32.vlgmr.msra.gmra.mrb[10].mxu0 %vm766_vm1, %v10804_v60  ;;  %v14358_v59 = vld [vmem:[%s17343_s19 + $0x50] sm:$0xff]  }
 0x12e   : > { %13221 = vmatpush3.bf16.msra.mxu1 %v14811_v39  ;;  %13237 = vmatpush3.bf16.msra.mxu0 %v14811_v39  ;;  %v14359_v60 = vld [vmem:[%s17343_s19 + $0x10] sm:$0xff]  }
 0x12f   : > { %13223 = vmatprep.subr.bf16.mxu1 %v14809_v36  ;;  %13239 = vmatprep.subr.bf16.mxu0 %v14809_v36 }
 0x130   : > { %12161 = vmatprep.mubr.msk.f32.mxu1 %vm766_vm1, %v10807_v61  ;;  %12180 = vmatprep.mubr.msk.f32.mxu0 %vm766_vm1, %v10811_v62  ;;  %v14360_v61 = vld [vmem:[%s17343_s19 + $0x58] sm:$0xff]  }
 0x131   : > { %v14361_v62 = vld [vmem:[%s17343_s19 + $0x18] sm:$0xff]  }
 0x132   : > { %13225 = vmatpush3.bf16.msra.mxu1 %v14809_v36  ;;  %13241 = vmatpush3.bf16.msra.mxu0 %v14809_v36 }
 0x133   : > { %13227 = vmatprep.subr.bf16.mxu1 %v14823_v54  ;;  %13243 = vmatprep.subr.bf16.mxu0 %v14823_v54 }
 0x136   : > { %13229 = vmatpush3.bf16.msra.mxu1 %v14823_v54  ;;  %13245 = vmatpush3.bf16.msra.mxu0 %v14823_v54 }
 0x137   : > { %13231 = vmatprep.subr.bf16.mxu1 %v14819_v53  ;;  %13247 = vmatprep.subr.bf16.mxu0 %v14819_v53 }
 0x13a   : > { %13233 = vmatpush3.bf16.msra.mxu1 %v14819_v53  ;;  %13249 = vmatpush3.bf16.msra.mxu0 %v14819_v53 }
 0x13b   : > { %13251 = vmatprep.subr.bf16.mxu1 %v14811_v39  ;;  %13267 = vmatprep.subr.bf16.mxu0 %v14811_v39 }
 0x13d   : > { %12162 = vmatmul.mubr.msk.f32.vlgmr.msra.gmra.mrb[4].mxu1 %vm766_vm1, %v10808_v63  ;;  %12181 = vmatmul.mubr.msk.f32.vlgmr.msra.gmra.mrb[12].mxu0 %vm766_vm1, %v10812_v0  ;;  %v14362_v63 = vld [vmem:[%s17343_s19 + $0x60] sm:$0xff]  }
 0x13e   : > { %13253 = vmatpush3.bf16.msra.mxu1 %v14811_v39  ;;  %13269 = vmatpush3.bf16.msra.mxu0 %v14811_v39  ;;  %v14363_v0 = vld [vmem:[%s17343_s19 + $0x20] sm:$0xff]  }
 0x13f   : > { %13255 = vmatprep.subr.bf16.mxu1 %v14809_v36  ;;  %13271 = vmatprep.subr.bf16.mxu0 %v14809_v36 }
 0x140   : > { %12199 = vmatprep.mubr.msk.f32.mxu1 %vm766_vm1, %v10815_v1  ;;  %12218 = vmatprep.mubr.msk.f32.mxu0 %vm766_vm1, %v10819_v2  ;;  %v14364_v1 = vld [vmem:[%s17343_s19 + $0x68] sm:$0xff]  }
 0x142   : > { %13257 = vmatpush3.bf16.msra.mxu1 %v14809_v36  ;;  %13273 = vmatpush3.bf16.msra.mxu0 %v14809_v36 }
 0x143   : > { %13259 = vmatprep.subr.bf16.mxu1 %v14823_v54  ;;  %13275 = vmatprep.subr.bf16.mxu0 %v14823_v54 }
 0x146   : > { %13261 = vmatpush3.bf16.msra.mxu1 %v14823_v54  ;;  %13277 = vmatpush3.bf16.msra.mxu0 %v14823_v54 }
 0x147   : > { %13263 = vmatprep.subr.bf16.mxu1 %v14819_v53  ;;  %13279 = vmatprep.subr.bf16.mxu0 %v14819_v53 }
 0x14a   : > { %13265 = vmatpush3.bf16.msra.mxu1 %v14819_v53  ;;  %13281 = vmatpush3.bf16.msra.mxu0 %v14819_v53 }
 0x14b   : > { %13283 = vmatprep.subr.bf16.mxu1 %v14811_v39  ;;  %13299 = vmatprep.subr.bf16.mxu0 %v14811_v39 }
 0x14d   : > { %12200 = vmatmul.mubr.msk.f32.vlgmr.msra.gmra.mrb[6].mxu1 %vm766_vm1, %v10816_v3  ;;  %12219 = vmatmul.mubr.msk.f32.vlgmr.msra.gmra.mrb[14].mxu0 %vm766_vm1, %v10820_v4 }
 0x14e   : > { %13285 = vmatpush3.bf16.msra.mxu1 %v14811_v39  ;;  %13301 = vmatpush3.bf16.msra.mxu0 %v14811_v39 }
 0x14f   : > { %13287 = vmatprep.subr.bf16.mxu1 %v14809_v36  ;;  %13303 = vmatprep.subr.bf16.mxu0 %v14809_v36 }
 0x150   : > { %12237 = vmatprep.mubr.msk.f32.mxu1 %vm766_vm1, %v10823_v5  ;;  %12256 = vmatprep.mubr.msk.f32.mxu0 %vm766_vm1, %v10827_v6 }
 0x152   : > { %13289 = vmatpush3.bf16.msra.mxu1 %v14809_v36  ;;  %13305 = vmatpush3.bf16.msra.mxu0 %v14809_v36 }
 0x153   : > { %13291 = vmatprep.subr.bf16.mxu1 %v14823_v54  ;;  %13307 = vmatprep.subr.bf16.mxu0 %v14823_v54 }
 0x156   : > { %13293 = vmatpush3.bf16.msra.mxu1 %v14823_v54  ;;  %13309 = vmatpush3.bf16.msra.mxu0 %v14823_v54 }
 0x157   : > { %13295 = vmatprep.subr.bf16.mxu1 %v14819_v53  ;;  %13311 = vmatprep.subr.bf16.mxu0 %v14819_v53 }
 0x15a   : > { %13297 = vmatpush3.bf16.msra.mxu1 %v14819_v53  ;;  %13313 = vmatpush3.bf16.msra.mxu0 %v14819_v53 }
 0x15b   : > { %13315 = vmatprep.subr.bf16.mxu1 %v14811_v39  ;;  %13331 = vmatprep.subr.bf16.mxu0 %v14811_v39 }
 0x15d   : > { %12238 = vmatmul.mubr.msk.f32.vlgmr.msra.gmra.mrb[8].mxu1 %vm766_vm1, %v10824_v7  ;;  %12257 = vmatmul.mubr.msk.f32.vlgmr.msra.gmra.mrb[16].mxu0 %vm766_vm1, %v10828_v8  ;;  %v14365_v8 = vld [vmem:[%s17343_s19 + $0x28] sm:$0xff]  }
 0x15e   : > { %13317 = vmatpush3.bf16.msra.mxu1 %v14811_v39  ;;  %13333 = vmatpush3.bf16.msra.mxu0 %v14811_v39 }
 0x15f   : > { %13319 = vmatprep.subr.bf16.mxu1 %v14809_v36  ;;  %13335 = vmatprep.subr.bf16.mxu0 %v14809_v36 }
 0x160   : > { %12275 = vmatprep.mubr.msk.f32.mxu1 %vm766_vm1, %v10831_v9  ;;  %12294 = vmatprep.mubr.msk.f32.mxu0 %vm766_vm1, %v10835_v10  ;;  %v14366_v9 = vld [vmem:[%s17343_s19 + $0x70] sm:$0xff]  }
 0x161   : > { %v14367_v10 = vld [vmem:[%s17343_s19 + $0x30] sm:$0xff]  }
 0x162   : > { %13321 = vmatpush3.bf16.msra.mxu1 %v14809_v36  ;;  %13337 = vmatpush3.bf16.msra.mxu0 %v14809_v36 }
 0x163   : > { %13323 = vmatprep.subr.bf16.mxu1 %v14823_v54  ;;  %13339 = vmatprep.subr.bf16.mxu0 %v14823_v54 }
 0x166   : > { %13325 = vmatpush3.bf16.msra.mxu1 %v14823_v54  ;;  %13341 = vmatpush3.bf16.msra.mxu0 %v14823_v54 }
 0x167   : > { %13327 = vmatprep.subr.bf16.mxu1 %v14819_v53  ;;  %13343 = vmatprep.subr.bf16.mxu0 %v14819_v53 }
 0x16a   : > { %13329 = vmatpush3.bf16.msra.mxu1 %v14819_v53  ;;  %13345 = vmatpush3.bf16.msra.mxu0 %v14819_v53 }
 0x16b   : > { %13347 = vmatprep.subr.bf16.mxu1 %v14811_v39  ;;  %13363 = vmatprep.subr.bf16.mxu0 %v14811_v39 }
 0x16d   : > { %12276 = vmatmul.mubr.msk.f32.vlgmr.msra.gmra.mrb[10].mxu1 %vm766_vm1, %v10832_v11  ;;  %12295 = vmatmul.mubr.msk.f32.vlgmr.msra.gmra.mrb[18].mxu0 %vm766_vm1, %v10836_v12  ;;  %v14368_v11 = vld [vmem:[%s17343_s19 + $0x78] sm:$0xff]  }
 0x16e   : > { %13349 = vmatpush3.bf16.msra.mxu1 %v14811_v39  ;;  %13365 = vmatpush3.bf16.msra.mxu0 %v14811_v39  ;;  %v14369_v12 = vld [vmem:[%s17343_s19 + $0x38] sm:$0xff]  }
 0x16f   : > { %13351 = vmatprep.subr.bf16.mxu1 %v14809_v36  ;;  %13367 = vmatprep.subr.bf16.mxu0 %v14809_v36 }
 0x170   : > { %12313 = vmatprep.mubr.msk.f32.mxu1 %vm766_vm1, %v10839_v13  ;;  %12332 = vmatprep.mubr.msk.f32.mxu0 %vm766_vm1, %v10843_v14 }
 0x172   : > { %13353 = vmatpush3.bf16.msra.mxu1 %v14809_v36  ;;  %13369 = vmatpush3.bf16.msra.mxu0 %v14809_v36 }
 0x173   : > { %13355 = vmatprep.subr.bf16.mxu1 %v14823_v54  ;;  %13371 = vmatprep.subr.bf16.mxu0 %v14823_v54 }
 0x176   : > { %13357 = vmatpush3.bf16.msra.mxu1 %v14823_v54  ;;  %13373 = vmatpush3.bf16.msra.mxu0 %v14823_v54 }
 0x177   : > { %13359 = vmatprep.subr.bf16.mxu1 %v14819_v53  ;;  %13375 = vmatprep.subr.bf16.mxu0 %v14819_v53 }
 0x17a   : > { %13361 = vmatpush3.bf16.msra.mxu1 %v14819_v53  ;;  %13377 = vmatpush3.bf16.msra.mxu0 %v14819_v53 }
 0x17b   : > { %13379 = vmatprep.subr.bf16.mxu1 %v14811_v39  ;;  %13395 = vmatprep.subr.bf16.mxu0 %v14811_v39 }
 0x17d   : > { %12314 = vmatmul.mubr.msk.f32.vlgmr.msra.gmra.mrb[12].mxu1 %vm766_vm1, %v10840_v15  ;;  %12333 = vmatmul.mubr.msk.f32.vlgmr.msra.gmra.mrb[20].mxu0 %vm766_vm1, %v10844_v16 }
 0x17e   : > { %13381 = vmatpush3.bf16.msra.mxu1 %v14811_v39  ;;  %13397 = vmatpush3.bf16.msra.mxu0 %v14811_v39 }
 0x17f   : > { %13383 = vmatprep.subr.bf16.mxu1 %v14809_v36  ;;  %13399 = vmatprep.subr.bf16.mxu0 %v14809_v36 }
 0x180   : > { %12351 = vmatprep.mubr.msk.f32.mxu1 %vm766_vm1, %v10847_v17  ;;  %12370 = vmatprep.mubr.msk.f32.mxu0 %vm766_vm1, %v10851_v18 }
 0x182   : > { %13385 = vmatpush3.bf16.msra.mxu1 %v14809_v36  ;;  %13401 = vmatpush3.bf16.msra.mxu0 %v14809_v36 }
 0x183   : > { %13387 = vmatprep.subr.bf16.mxu1 %v14823_v54  ;;  %13403 = vmatprep.subr.bf16.mxu0 %v14823_v54 }
 0x186   : > { %13389 = vmatpush3.bf16.msra.mxu1 %v14823_v54  ;;  %13405 = vmatpush3.bf16.msra.mxu0 %v14823_v54 }
 0x187   : > { %13391 = vmatprep.subr.bf16.mxu1 %v14819_v53  ;;  %13407 = vmatprep.subr.bf16.mxu0 %v14819_v53 }
 0x18a   : > { %13393 = vmatpush3.bf16.msra.mxu1 %v14819_v53  ;;  %13409 = vmatpush3.bf16.msra.mxu0 %v14819_v53 }
 0x18b   : > { %11601 = vmatprep.subr.bf16.mxu1 %v14354_v49 }
 0x18d   : > { %12352 = vmatmul.mubr.msk.f32.vlgmr.msra.gmra.mrb[14].mxu1 %vm766_vm1, %v10848_v19  ;;  %12371 = vmatmul.mubr.msk.f32.vlgmr.msra.gmra.mrb[22].mxu0 %vm766_vm1, %v10852_v20 }
 0x18e   : > { %11602 = vmatpush3.bf16.msra.mxu1 %v14355_v52 }
 0x18f   : > { %11603 = vmatprep.subr.bf16.mxu1 %v14356_v57 }
 0x192   : > { %11604 = vmatpush3.bf16.msra.mxu1 %v14357_v58 }
 0x193   : > { %11605 = vmatprep.subr.bf16.mxu1 %v14358_v59 }
 0x196   : > { %11606 = vmatpush3.bf16.msra.mxu1 %v14359_v60 }
 0x197   : > { %11607 = vmatprep.subr.bf16.mxu1 %v14360_v61 }
 0x19a   : > { %11608 = vmatpush3.bf16.msra.mxu1 %v14361_v62 }
 0x19b   : > { %11609 = vmatprep.subr.bf16.mxu1 %v14362_v63 }
 0x19e   : > { %11610 = vmatpush3.bf16.msra.mxu1 %v14363_v0 }
 0x19f   : > { %11611 = vmatprep.subr.bf16.mxu1 %v14364_v1 }
 0x1a2   : > { %11612 = vmatpush3.bf16.msra.mxu1 %v14365_v8 }
 0x1a3   : > { %11613 = vmatprep.subr.bf16.mxu1 %v14366_v9 }
 0x1a6   : > { %11614 = vmatpush3.bf16.msra.mxu1 %v14367_v10 }
 0x1a7   : > { %11615 = vmatprep.subr.bf16.mxu1 %v14368_v11 }
 0x1aa   : > { %11616 = vmatpush3.bf16.msra.mxu1 %v14369_v12 }
 0x1f0   : > { %v15065_v21 = vpop.f32.mrb[0].mxu1  ;;  %v12106_v22 = vpop.f32.mrb[8].mxu0 }
 0x1f1   : > { %v15067_v23 = vpop.f32.mrb[1].mxu1  ;;  %v923_v24 = vpop.f32.mrb[9].mxu0 }
 0x1f2   : > { %v13841_v25 = vpack.i.bf16 %v12106_v22, %v923_v24 }
 0x1f4   : > { %13842 = vrot.lane.b32.xlu0 %v13841_v25, %s17308_s24 }
 0x200   : > { %v12125_v26 = vpop.f32.mrb[2].mxu1  ;;  %v12144_v27 = vpop.f32.mrb[10].mxu0 }
 0x201   : > { %v1007_v28 = vpop.f32.mrb[3].mxu1  ;;  %v1091_v29 = vpop.f32.mrb[11].mxu0 }
 0x202   : > { %v13846_v30 = vpack.i.bf16 %v12125_v26, %v1007_v28  ;;  %v13851_v31 = vpack.i.bf16 %v12144_v27, %v1091_v29 }
 0x204   : > { %13847 = vrot.lane.b32.xlu1 %v13846_v30, %s17312_s25 }
 0x208   : > { %13852 = vrot.lane.b32.xlu1 %v13851_v31, %s17310_s27 }
 0x210   : > { %v12163_v32 = vpop.f32.mrb[4].mxu1  ;;  %v12182_v33 = vpop.f32.mrb[12].mxu0 }
 0x211   : > { %v1175_v34 = vpop.f32.mrb[5].mxu1  ;;  %v1259_v35 = vpop.f32.mrb[13].mxu0 }
 0x212   : > { %v13856_v36 = vpack.i.bf16 %v12163_v32, %v1175_v34  ;;  %v13861_v37 = vpack.i.bf16 %v12182_v33, %v1259_v35 }
 0x214   : > { %13857 = vrot.lane.b32.xlu1 %v13856_v36, %s17306_s29  ;;  %s17346_s29 = smov 80  }
 0x218   : > { %13862 = vrot.lane.b32.xlu1 %v13861_v37, %s17304_s1  ;;  %s17315_s1 = smov 112  }
 0x220   : > { %v12201_v38 = vpop.f32.mrb[6].mxu1  ;;  %v12220_v39 = vpop.f32.mrb[14].mxu0 }
 0x221   : > { %v1343_v40 = vpop.f32.mrb[7].mxu1  ;;  %v1427_v41 = vpop.f32.mrb[15].mxu0 }
 0x222   : > { %v13876_v42 = vpack.i.bf16 %v12201_v38, %v1343_v40  ;;  %v13906_v43 = vpack.i.bf16 %v12220_v39, %v1427_v41 }
 0x230   : > { %v15074_v44 = vpop.f32.mrb[8].mxu1  ;;  %v12258_v45 = vpop.f32.mrb[16].mxu0 }
 0x231   : > { %v15076_v46 = vpop.f32.mrb[9].mxu1  ;;  %v1595_v47 = vpop.f32.mrb[17].mxu0 }
 0x232   : > { %v13866_v48 = vpack.i.bf16 %v12258_v45, %v1595_v47 }
 0x234   : > { %13867 = vrot.lane.b32.xlu0 %v13866_v48, %s17308_s24 }
 0x240   : > { %v12277_v50 = vpop.f32.mrb[10].mxu1  ;;  %v12296_v51 = vpop.f32.mrb[18].mxu0 }
 0x241   : > { %v1679_v53 = vpop.f32.mrb[11].mxu1  ;;  %v1763_v54 = vpop.f32.mrb[19].mxu0 }
 0x242   : > { %v13871_v55 = vpack.i.bf16 %v12277_v50, %v1679_v53  ;;  %v13881_v56 = vpack.i.bf16 %v12296_v51, %v1763_v54 }
 0x244   : > { %13872 = vrot.lane.b32.xlu1 %v13871_v55, %s17312_s25  ;;  %13882 = vrot.lane.b32.xlu0 %v13881_v56, %s17344_s22  ;;  %s15520_s25 = sand.u32 1, %s14610_s28  }
 0x245   : > { %s17321_s27 = sshll.u32 %s15520_s25, 4 }
 0x246   : > { %s15534_s19 = scalar_lea.vmem [#allocation2], %s17321_s27  ;;  %s10780_s27 = sshll.u32 %s14751_s0, 1 }
 0x247   : > { %p604_p11 = scmp.lt.s32.totalorder %s10780_s27, 3 }
 0x248   : > { %13877 = vrot.lane.b32.xlu1 %v13876_v42, %s17317_s21  ;;  %s11432_s21 = sshll.u32 %s14751_s0, 8 }
 0x249   : > { %s17366_s27 = smov (!%p604_p11, %s10780_s27), 3 }
 0x24c   : > { %13907 = vrot.lane.b32.xlu1 %v13906_v43, %s17315_s1  ;;  %s17350_s1 = smov 32  }
 0x250   : > { %v12315_v2 = vpop.f32.mrb[12].mxu1  ;;  %v12334_v3 = vpop.f32.mrb[20].mxu0 }
 0x251   : > { %v1847_v4 = vpop.f32.mrb[13].mxu1  ;;  %v1931_v5 = vpop.f32.mrb[21].mxu0 }
 0x252   : > { %v13886_v6 = vpack.i.bf16 %v12315_v2, %v1847_v4  ;;  %v13891_v7 = vpack.i.bf16 %v12334_v3, %v1931_v5 }
 0x254   : > { %13887 = vrot.lane.b32.xlu0 %v13886_v6, %s17345_s23 }
 0x258   : > { %13892 = vrot.lane.b32.xlu0 %v13891_v7, %s17346_s29 }
 0x260   : > { %v12353_v13 = vpop.f32.mrb[14].mxu1  ;;  %v12372_v14 = vpop.f32.mrb[22].mxu0 }
 0x261   : > { %v2015_v15 = vpop.f32.mrb[15].mxu1  ;;  %v2099_v16 = vpop.f32.mrb[23].mxu0 }
 0x262   : > { %v13896_v17 = vpack.i.bf16 %v12353_v13, %v2015_v15  ;;  %v13901_v18 = vpack.i.bf16 %v12372_v14, %v2099_v16 }
 0x264   : > { %13897 = vrot.lane.b32.xlu0 %v13896_v17, %s17347_s20 }
 0x266   : > { %v13843_v25 = vpop.permute.xlu0 %13842 }
 0x267   : > { %v13845_v27 = vunpack.i.h.bf16 %v13843_v25  ;;  %v13844_v28 = vunpack.i.l.bf16 %v13843_v25 }
 0x268   : > { %13902 = vrot.lane.b32.xlu0 %v13901_v18, %s17348_s9 }
 0x269   : > { %v2221_v36 = vsel %vm2220_vm2, %v15067_v23, %v13844_v28  ;;  %v2222_v37 = vsel %vm2220_vm2, %v15065_v21, %v13845_v27 }
 0x276   : > { %v13848_v19 = vpop.permute.xlu1 %13847 }
 0x277   : > { %v13850_v29 = vunpack.i.h.bf16 %v13848_v19  ;;  %v13849_v30 = vunpack.i.l.bf16 %v13848_v19 }
 0x279   : > { %v2225_v40 = vsel %vm2223_vm3, %v2222_v37, %v13850_v29  ;;  %v2224_v41 = vsel %vm2223_vm3, %v2221_v36, %v13849_v30  ;;  %v15170_v29 = vld [vmem:[%s17288_s10] sm:$0xff]  ;;  %v15177_v30 = vld [vmem:[%s17288_s10 + $0x70] sm:$0xff] }
 0x27a   : > { %v13853_v20 = vpop.permute.xlu1 %13852  ;;  %12377 = vmatprep.mubr.msk.f32.mxu0 %vm2220_vm2, %v15170_v29  ;;  %v10872_v36 = vld [vmem:[%s17291_s13 + $0x3] ss:$0 sm:$0xff] }
 0x27b   : > { %v13855_v31 = vunpack.i.h.bf16 %v13853_v20  ;;  %v13854_v32 = vunpack.i.l.bf16 %v13853_v20 }
 0x27d   : > { %v2226_v45 = vsel %vm652_vm0, %v2224_v41, %v13854_v32  ;;  %v2227_v47 = vsel %vm652_vm0, %v2225_v40, %v13855_v31 }
 0x286   : > { %v13858_v22 = vpop.permute.xlu1 %13857 }
 0x287   : > { %v13860_v33 = vunpack.i.h.bf16 %v13858_v22  ;;  %v13859_v34 = vunpack.i.l.bf16 %v13858_v22 }
 0x289   : > { %v2229_v48 = vsel %vm766_vm1, %v2227_v47, %v13860_v33  ;;  %v2228_v23 = vsel %vm766_vm1, %v2226_v45, %v13859_v34  ;;  %v10871_v33 = vld [vmem:[%s17291_s13 + $0x2] ss:$0 sm:$0xff] }
 0x28a   : > { %v13863_v24 = vpop.permute.xlu1 %13862 }
 0x28b   : > { %v13865_v38 = vunpack.i.h.bf16 %v13863_v24  ;;  %v13864_v39 = vunpack.i.l.bf16 %v13863_v24 }
 0x28d   : > { %v2231_v21 = vsel %vm2230_vm4, %v2228_v23, %v13864_v39  ;;  %v2232_v50 = vsel %vm2230_vm4, %v2229_v48, %v13865_v38 }
 0x2a6   : > { %v13868_v58 = vpop.permute.xlu0 %13867 }
 0x2a7   : > { %v13870_v61 = vunpack.i.h.bf16 %v13868_v58  ;;  %v13869_v62 = vunpack.i.l.bf16 %v13868_v58  ;;  %v15268_v58 = vld [vmem:[%s17288_s10 + $0x50] sm:$0xff] }
 0x2a9   : > { %v2239_v2 = vsel %vm2220_vm2, %v15076_v46, %v13869_v62  ;;  %v2240_v3 = vsel %vm2220_vm2, %v15074_v44, %v13870_v61  ;;  %v15291_v61 = vld [vmem:[%s17288_s10 + $0x68] sm:$0xff]  ;;  %v15296_v62 = vld [vmem:[%s17288_s10 + $0x80] sm:$0xff] }
 0x2b6   : > { %v13873_v26 = vpop.permute.xlu1 %13872  ;;  %v13883_v59 = vpop.permute.xlu0 %13882 }
 0x2b7   : > { %v13875_v63 = vunpack.i.h.bf16 %v13873_v26  ;;  %v13874_v0 = vunpack.i.l.bf16 %v13873_v26  ;;  %v13885_v4 = vunpack.i.h.bf16 %v13883_v59  ;;  %v13884_v5 = vunpack.i.l.bf16 %v13883_v59  ;;  %v15277_v59 = vld [vmem:[%s17288_s10 + $0x58] sm:$0xff] }
 0x2b9   : > { %v2242_v6 = vsel %vm2223_vm3, %v2240_v3, %v13875_v63  ;;  %v2241_v7 = vsel %vm2223_vm3, %v2239_v2, %v13874_v0  ;;  %v15305_v63 = vld [vmem:[%s17288_s10 + $0x88] sm:$0xff]  ;;  %v14370_v0 = vld [vmem:[%s17281_s3] sm:$0xff]   ;;  %v14372_v3 = vld [vmem:[%s17281_s3 + $0x10] sm:$0xff]  }
 0x2ba   : > { %v13878_v35 = vpop.permute.xlu1 %13877  ;;  %v2243_v15 = vsel %vm652_vm0, %v2241_v7, %v13884_v5  ;;  %v2244_v46 = vsel %vm652_vm0, %v2242_v6, %v13885_v4  ;;  %v14371_v2 = vld [vmem:[%s17281_s3 + $0x8] sm:$0xff]   ;;  %v14373_v4 = vld [vmem:[%s17281_s3 + $0x18] sm:$0xff]   ;;  %v14374_v7 = vld [vmem:[%s17281_s3 + $0x20] sm:$0xff]  }
 0x2bb   : > { %v13880_v42 = vunpack.i.h.bf16 %v13878_v35  ;;  %v13879_v43 = vunpack.i.l.bf16 %v13878_v35 }
 0x2bd   : > { %v2235_v53 = vsel %vm2233_vm5, %v2232_v50, %v13880_v42  ;;  %v2234_v54 = vsel %vm2233_vm5, %v2231_v21, %v13879_v43  ;;  %v15205_v21 = vld [vmem:[%s17288_s10 + $0x78] sm:$0xff]  ;;  %v15210_v50 = vld [vmem:[%s17288_s10 + $0x10] sm:$0xff] }
 0x2be   : > { %v13908_v49 = vpop.permute.xlu1 %13907 }
 0x2bf   : > { %v13910_v51 = vunpack.i.h.bf16 %v13908_v49  ;;  %v13909_v52 = vunpack.i.l.bf16 %v13908_v49  ;;  %v15200_v49 = vld [vmem:[%s17288_s10 + $0x8] sm:$0xff] }
 0x2c1   : > { %v2237_v55 = vsel %vm2236_vm6, %v2234_v54, %v13909_v52  ;;  %v2238_v56 = vsel %vm2236_vm6, %v2235_v53, %v13910_v51  ;;  %v15221_v51 = vld [vmem:[%s17288_s10 + $0x18] sm:$0xff]  ;;  %v15226_v52 = vld [vmem:[%s17288_s10 + $0x20] sm:$0xff]  ;;  %v15235_v53 = vld [vmem:[%s17288_s10 + $0x28] sm:$0xff] }
 0x2c2   : > { %v2285_v57 = vpack.c.bf16 %v2238_v56, %v2237_v55  ;;  %v15240_v54 = vld [vmem:[%s17288_s10 + $0x30] sm:$0xff]  ;;  %v15249_v55 = vld [vmem:[%s17288_s10 + $0x38] sm:$0xff]  ;;  %v15254_v56 = vld [vmem:[%s17288_s10 + $0x40] sm:$0xff] }
 0x2c6   : > { %v13888_v60 = vpop.permute.xlu0 %13887 }
 0x2c7   : > { %v13890_v8 = vunpack.i.h.bf16 %v13888_v60  ;;  %v13889_v9 = vunpack.i.l.bf16 %v13888_v60  ;;  %v15282_v60 = vld [vmem:[%s17288_s10 + $0x60] sm:$0xff] }
 0x2c9   : > { %v2246_v16 = vsel %vm766_vm1, %v2244_v46, %v13890_v8  ;;  %v2245_v44 = vsel %vm766_vm1, %v2243_v15, %v13889_v9  ;;  %v14376_v46 = vld [vmem:[%s17281_s3 + $0x30] sm:$0xff]  }
 0x2ca   : > { %v13893_v1 = vpop.permute.xlu0 %13892 }
 0x2cb   : > { %v13895_v11 = vunpack.i.h.bf16 %v13893_v1  ;;  %v13894_v12 = vunpack.i.l.bf16 %v13893_v1  ;;  %v14627_v1 = vmov 0  }
 0x2cd   : > { %v2247_v18 = vsel %vm2230_vm4, %v2245_v44, %v13894_v12  ;;  %v2248_v19 = vsel %vm2230_vm4, %v2246_v16, %v13895_v11  ;;  %v14375_v12 = vld [vmem:[%s17281_s3 + $0x28] sm:$0xff]  }
 0x2d6   : > { %v13898_v10 = vpop.permute.xlu0 %13897 }
 0x2d7   : > { %v13900_v13 = vunpack.i.h.bf16 %v13898_v10  ;;  %v13899_v14 = vunpack.i.l.bf16 %v13898_v10 }
 0x2d9   : > { %v2250_v24 = vsel %vm2233_vm5, %v2248_v19, %v13900_v13  ;;  %v2249_v25 = vsel %vm2233_vm5, %v2247_v18, %v13899_v14  ;;  %v14377_v18 = vld [vmem:[%s17281_s3 + $0x38] sm:$0xff]  }
 0x2da   : > { %v13903_v17 = vpop.permute.xlu0 %13902 }
 0x2db   : > { %v13905_v20 = vunpack.i.h.bf16 %v13903_v17  ;;  %v13904_v22 = vunpack.i.l.bf16 %v13903_v17 }
 0x2dd   : > { %v2251_v26 = vsel %vm2236_vm6, %v2249_v25, %v13904_v22  ;;  %v2252_v27 = vsel %vm2236_vm6, %v2250_v24, %v13905_v20  ;;  %v14378_v24 = vld [vmem:[%s17281_s3 + $0x40] sm:$0xff]  }
 0x2de   : > { %v2286_v28 = vpack.c.bf16 %v2252_v27, %v2251_v26 }
 0x2e0   : > { %2415 = vmatprep.mubr.bf16.mxu1 %v2286_v28 }
 0x2e1   : > { %2416 = vmatmul.mubr.bf16.vlgmr.msra.gmra.mrb[16].mxu1 %v2285_v57  ;;  %v15263_v57 = vld [vmem:[%s17288_s10 + $0x48] sm:$0xff] }
 0x2e2   : > { %12426 = vmatprep.mubr.msk.f32.mxu1 %vm2220_vm2, %v15177_v30 }
 0x3b4   : > { %v11617_v31 = vpop.f32.mrb[16].mxu1 }
 0x3b5   : > { %v11618_v32 = vpop.f32.mrb[17].mxu1 }
 0x3b6   : > { %v11619_v34 = vadd.f32 %v11618_v32, %v11617_v31  ;;  %v11620_v35 = vpop.f32.mrb[18].mxu1 }
 0x3b7   : > { %v11621_v37 = vpop.f32.mrb[19].mxu1 }
 0x3b8   : > { %v2429_v38 = vmul.f32 %v11619_v34, %v10871_v33  ;;  %v11622_v39 = vadd.f32 %v11621_v37, %v11620_v35 }
 0x3ba   : > { %v15187_v40 = vadd.f32 %v10872_v36, %v2429_v38  ;;  %v2430_v41 = vmul.f32 %v11622_v39, %v10871_v33 }
 0x3bc   : > { %v2438_v42 = vmax.f32 %v15187_v40, 0.0  ;;  %v15190_v43 = vadd.f32 %v10872_v36, %v2430_v41 }
 0x3be   : > { %v2439_v45 = vmax.f32 %v15190_v43, 0.0  ;;  %v2440_v47 = vmax.f32 %v2438_v42, 0.0  ;;  %v14380_v43 = vld [vmem:[%s17281_s3 + $0x48] sm:$0xff]  }
 0x3c0   : > { %v2441_v48 = vmax.f32 %v2439_v45, 0.0 }
 0x3c2   : > { %v13410_v23 = vpack.c.bf16 %v2441_v48, %v2440_v47 }
 0x3c4   : > { %13411 = vmatprep.subr.bf16.mxu0 %v13410_v23  ;;  %13439 = vmatprep.subr.bf16.mxu1 %v13410_v23 }
 0x3c5   : > { %13413 = vmatpush3.bf16.msra.mxu0 %v13410_v23  ;;  %13441 = vmatpush3.bf16.msra.mxu1 %v13410_v23 }
 0x3c6   : > { %13415 = vmatprep.subr.bf16.mxu0 %v13410_v23  ;;  %3344 = vmatprep.subr.bf16.mxu1 %v14627_v1 }
 0x3c8   : > { %12378 = vmatmul.mubr.msk.f32.vlgmr.msra.gmra.mrb[24].mxu0 %vm2220_vm2, %v15200_v49  ;;  %12427 = vmatmul.mubr.msk.f32.vlgmr.msra.gmra.mrb[20].mxu1 %vm2220_vm2, %v15205_v21 }
 0x3c9   : > { %13417 = vmatpush3.bf16.msra.mxu0 %v13410_v23  ;;  %12384 = vmatprep.mubr.msk.f32.mxu0 %vm2220_vm2, %v15210_v50 }
 0x3ca   : > { %13419 = vmatprep.subr.bf16.mxu0 %v13410_v23  ;;  %3345 = vmatpush1.bf16.msra.mxu1 %v14370_v0 }
 0x3cb   : > { %3346 = vmatprep.subr.bf16.mxu1 %v14627_v1 }
 0x3cc   : > { %12385 = vmatmul.mubr.msk.f32.vlgmr.msra.gmra.mrb[26].mxu0 %vm2220_vm2, %v15221_v51 }
 0x3cd   : > { %13421 = vmatpush3.bf16.msra.mxu0 %v13410_v23  ;;  %12391 = vmatprep.mubr.msk.f32.mxu0 %vm2220_vm2, %v15226_v52 }
 0x3ce   : > { %13423 = vmatprep.subr.bf16.mxu0 %v13410_v23  ;;  %3347 = vmatpush1.bf16.msra.mxu1 %v14371_v2 }
 0x3cf   : > { %3348 = vmatprep.subr.bf16.mxu1 %v14627_v1 }
 0x3d0   : > { %12392 = vmatmul.mubr.msk.f32.vlgmr.msra.gmra.mrb[28].mxu0 %vm2220_vm2, %v15235_v53 }
 0x3d1   : > { %13425 = vmatpush3.bf16.msra.mxu0 %v13410_v23  ;;  %12398 = vmatprep.mubr.msk.f32.mxu0 %vm2220_vm2, %v15240_v54 }
 0x3d2   : > { %13427 = vmatprep.subr.bf16.mxu0 %v13410_v23  ;;  %3349 = vmatpush1.bf16.msra.mxu1 %v14372_v3 }
 0x3d3   : > { %3350 = vmatprep.subr.bf16.mxu1 %v14627_v1 }
 0x3d4   : > { %12399 = vmatmul.mubr.msk.f32.vlgmr.msra.gmra.mrb[30].mxu0 %vm2220_vm2, %v15249_v55 }
 0x3d5   : > { %13429 = vmatpush3.bf16.msra.mxu0 %v13410_v23  ;;  %12405 = vmatprep.mubr.msk.f32.mxu0 %vm2220_vm2, %v15254_v56 }
 0x3d6   : > { %13431 = vmatprep.subr.bf16.mxu0 %v13410_v23  ;;  %3351 = vmatpush1.bf16.msra.mxu1 %v14373_v4 }
 0x3d7   : > { %3352 = vmatprep.subr.bf16.mxu1 %v14627_v1 }
 0x3d8   : > { %12406 = vmatmul.mubr.msk.f32.vlgmr.msra.gmra.mrb[32].mxu0 %vm2220_vm2, %v15263_v57 }
 0x3d9   : > { %13433 = vmatpush3.bf16.msra.mxu0 %v13410_v23  ;;  %12412 = vmatprep.mubr.msk.f32.mxu0 %vm2220_vm2, %v15268_v58 }
 0x3da   : > { %13435 = vmatprep.subr.bf16.mxu0 %v13410_v23  ;;  %3353 = vmatpush1.bf16.msra.mxu1 %v14374_v7 }
 0x3db   : > { %3354 = vmatprep.subr.bf16.mxu1 %v14627_v1 }
 0x3dc   : > { %12413 = vmatmul.mubr.msk.f32.vlgmr.msra.gmra.mrb[34].mxu0 %vm2220_vm2, %v15277_v59 }
 0x3dd   : > { %13437 = vmatpush3.bf16.msra.mxu0 %v13410_v23  ;;  %12419 = vmatprep.mubr.msk.f32.mxu0 %vm2220_vm2, %v15282_v60 }
 0x3de   : > { %13443 = vmatprep.subr.bf16.mxu0 %v13410_v23  ;;  %3355 = vmatpush1.bf16.msra.mxu1 %v14375_v12 }
 0x3df   : > { %3356 = vmatprep.subr.bf16.mxu1 %v14627_v1 }
 0x3e0   : > { %12420 = vmatmul.mubr.msk.f32.vlgmr.msra.gmra.mrb[36].mxu0 %vm2220_vm2, %v15291_v61 }
 0x3e1   : > { %13445 = vmatpush3.bf16.msra.mxu0 %v13410_v23  ;;  %12433 = vmatprep.mubr.msk.f32.mxu0 %vm2220_vm2, %v15296_v62 }
 0x3e2   : > { %3357 = vmatpush1.bf16.msra.mxu1 %v14376_v46 }
 0x3e3   : > { %3358 = vmatprep.subr.bf16.mxu1 %v14627_v1 }
 0x3e4   : > { %12434 = vmatmul.mubr.msk.f32.vlgmr.msra.gmra.mrb[38].mxu0 %vm2220_vm2, %v15305_v63 }
 0x3e6   : > { %3359 = vmatpush1.bf16.msra.mxu1 %v14377_v18 }
 0x3e7   : > { %3360 = vmatprep.subr.bf16.mxu1 %v14627_v1 }
 0x3ea   : > { %3361 = vmatpush1.bf16.msra.mxu1 %v14378_v24 }
 0x49b   : > { %v12379_v5 = vpop.f32.mrb[24].mxu0  ;;  %v12428_v6 = vpop.f32.mrb[20].mxu1 }
 0x49c   : > { %v2516_v8 = vpop.f32.mrb[25].mxu0  ;;  %v3104_v9 = vpop.f32.mrb[21].mxu1 }
 0x49d   : > { %v13941_v10 = vpack.i.bf16 %v12428_v6, %v3104_v9 }
 0x49f   : > { %v12386_v11 = vpop.f32.mrb[26].mxu0 }
 0x4a0   : > { %v2600_v13 = vpop.f32.mrb[27].mxu0 }
 0x4a1   : > { %v13911_v14 = vpack.i.bf16 %v12386_v11, %v2600_v13 }
 0x4a3   : > { %13912 = vrot.lane.b32.xlu0 %v13911_v14, %s17349_s26  ;;  %v12393_v15 = vpop.f32.mrb[28].mxu0 }
 0x4a4   : > { %v2684_v16 = vpop.f32.mrb[29].mxu0 }
 0x4a5   : > { %v13916_v44 = vpack.i.bf16 %v12393_v15, %v2684_v16 }
 0x4a7   : > { %13917 = vrot.lane.b32.xlu1 %v13916_v44, %s17350_s1  ;;  %v12400_v17 = vpop.f32.mrb[30].mxu0 }
 0x4a8   : > { %v2768_v19 = vpop.f32.mrb[31].mxu0 }
 0x4a9   : > { %v13921_v20 = vpack.i.bf16 %v12400_v17, %v2768_v19 }
 0x4ab   : > { %13922 = vrot.lane.b32.xlu0 %v13921_v20, %s17344_s22  ;;  %v12407_v22 = vpop.f32.mrb[32].mxu0 }
 0x4ac   : > { %v2852_v25 = vpop.f32.mrb[33].mxu0 }
 0x4ad   : > { %v13926_v26 = vpack.i.bf16 %v12407_v22, %v2852_v25 }
 0x4af   : > { %13927 = vrot.lane.b32.xlu1 %v13926_v26, %s17345_s23  ;;  %v12414_v27 = vpop.f32.mrb[34].mxu0 }
 0x4b0   : > { %v2936_v28 = vpop.f32.mrb[35].mxu0 }
 0x4b1   : > { %v13931_v31 = vpack.i.bf16 %v12414_v27, %v2936_v28 }
 0x4b3   : > { %13932 = vrot.lane.b32.xlu0 %v13931_v31, %s17346_s29  ;;  %v12421_v32 = vpop.f32.mrb[36].mxu0 }
 0x4b4   : > { %v3020_v33 = vpop.f32.mrb[37].mxu0 }
 0x4b5   : > { %v13936_v34 = vpack.i.bf16 %v12421_v32, %v3020_v33  ;;  %v14379_v33 = vld [vmem:[%s17282_s4] sm:$0xff]  }
 0x4b7   : > { %13942 = vrot.lane.b32.xlu0 %v13941_v10, %s17348_s9  ;;  %13937 = vrot.lane.b32.xlu1 %v13936_v34, %s17347_s20  ;;  %v12435_v35 = vpop.f32.mrb[38].mxu0  ;;  %v14628_v34 = vmov 0.0  }
 0x4b8   : > { %v3188_v36 = vpop.f32.mrb[39].mxu0  ;;  %12436 = vmatprep.subr.bf16.mxu0 %v14628_v34  ;;  %12438 = vmatprep.mubr.msk.bf16.mxu0 %vm14629_vm7, %v14628_v34 }
 0x4b9   : > { %v3286_v37 = vpack.c.bf16 %v12435_v35, %v3188_v36  ;;  %12437 = vmatpush3.bf16.msra.mxu0 %v14379_v33  ;;  %v10917_v35 = vld [vmem:[%s17291_s13 + $0x4] ss:$0 sm:$0xff] }
 0x4bb   : > { %10916 = vmatprep.mubr.msk.bf16.mxu1 %vm2220_vm2, %v3286_v37  ;;  %v10918_v37 = vld [vmem:[%s17291_s13 + $0x5] ss:$0 sm:$0xff] }
 0x515   : > { %v13913_v38 = vpop.permute.xlu0 %13912 }
 0x516   : > { %v13915_v47 = vunpack.i.h.bf16 %v13913_v38  ;;  %v13914_v48 = vunpack.i.l.bf16 %v13913_v38 }
 0x518   : > { %v3254_v10 = vsel %vm2220_vm2, %v12379_v5, %v13915_v47  ;;  %v3253_v11 = vsel %vm2220_vm2, %v2516_v8, %v13914_v48 }
 0x519   : > { %v13918_v39 = vpop.permute.xlu1 %13917 }
 0x51a   : > { %v13920_v0 = vunpack.i.h.bf16 %v13918_v39  ;;  %v13919_v2 = vunpack.i.l.bf16 %v13918_v39 }
 0x51c   : > { %v3256_v12 = vsel %vm2223_vm3, %v3254_v10, %v13920_v0  ;;  %v3255_v13 = vsel %vm2223_vm3, %v3253_v11, %v13919_v2  ;;  %v10922_v11 = vld [vmem:[%s17291_s13 + $0x7] ss:$0 sm:$0xff] }
 0x51d   : > { %v13923_v41 = vpop.permute.xlu0 %13922 }
 0x51e   : > { %v13925_v3 = vunpack.i.h.bf16 %v13923_v41  ;;  %v13924_v4 = vunpack.i.l.bf16 %v13923_v41 }
 0x520   : > { %v3258_v46 = vsel %vm652_vm0, %v3256_v12, %v13925_v3  ;;  %v3257_v16 = vsel %vm652_vm0, %v3255_v13, %v13924_v4 }
 0x521   : > { %v13928_v23 = vpop.permute.xlu1 %13927 }
 0x522   : > { %v13930_v6 = vunpack.i.h.bf16 %v13928_v23  ;;  %v13929_v7 = vunpack.i.l.bf16 %v13928_v23 }
 0x524   : > { %v3260_v44 = vsel %vm766_vm1, %v3258_v46, %v13930_v6  ;;  %v3259_v17 = vsel %vm766_vm1, %v3257_v16, %v13929_v7  ;;  %v10921_v7 = vld [vmem:[%s17291_s13 + $0x6] ss:$0 sm:$0xff] }
 0x525   : > { %v13933_v9 = vpop.permute.xlu0 %13932 }
 0x526   : > { %v13935_v14 = vunpack.i.h.bf16 %v13933_v9  ;;  %v13934_v15 = vunpack.i.l.bf16 %v13933_v9 }
 0x528   : > { %v3262_v24 = vsel %vm2230_vm4, %v3260_v44, %v13935_v14  ;;  %v3261_v25 = vsel %vm2230_vm4, %v3259_v17, %v13934_v15 }
 0x529   : > { %v13943_v18 = vpop.permute.xlu0 %13942  ;;  %v13938_v19 = vpop.permute.xlu1 %13937 }
 0x52a   : > { %v13945_v20 = vunpack.i.h.bf16 %v13943_v18  ;;  %v13944_v5 = vunpack.i.l.bf16 %v13943_v18  ;;  %v13940_v22 = vunpack.i.h.bf16 %v13938_v19  ;;  %v13939_v8 = vunpack.i.l.bf16 %v13938_v19  ;;  %v14382_v18 = vld [vmem:[%s17281_s3 + $0x58] sm:$0xff]   ;;  %v14383_v19 = vld [vmem:[%s17281_s3 + $0x60] sm:$0xff]  }
 0x52c   : > { %v3264_v26 = vsel %vm2233_vm5, %v3262_v24, %v13940_v22  ;;  %v3263_v27 = vsel %vm2233_vm5, %v3261_v25, %v13939_v8  ;;  %v14384_v22 = vld [vmem:[%s17281_s3 + $0x68] sm:$0xff]  }
 0x52d   : > { %v3265_v28 = vsel %vm2236_vm6, %v3263_v27, %v13944_v5  ;;  %v3266_v31 = vsel %vm2236_vm6, %v3264_v26, %v13945_v20  ;;  %v14385_v26 = vld [vmem:[%s17281_s3 + $0x70] sm:$0xff]  }
 0x52e   : > { %v3285_v32 = vpack.c.bf16 %v3266_v31, %v3265_v28 }
 0x530   : > { %3377 = vmatmul.mubr.bf16.vlgmr.msra.gmra.mrb[24].mxu1 %v3285_v32  ;;  %v14386_v32 = vld [vmem:[%s17281_s3 + $0x78] sm:$0xff]  }
 0x531   : > { %12502 = vmatprep.mubr.msk.f32.mxu1 %vm2220_vm2, %v15296_v62 }
 0x603   : > { %v3378_v36 = vpop.f32.mrb[24].mxu1 }
 0x604   : > { %v3390_v38 = vmul.f32 %v10917_v35, %v3378_v36  ;;  %v3380_v39 = vpop.f32.mrb[25].mxu1 }
 0x605   : > { %v3381_v41 = vpop.f32.mrb[26].mxu1 }
 0x606   : > { %v3397_v47 = vadd.f32 %v10918_v37, %v3390_v38  ;;  %v3391_v48 = vmul.f32 %v10917_v35, %v3381_v41  ;;  %v3383_v23 = vpop.f32.mrb[27].mxu1 }
 0x607   : > { %v14388_v23 = vld [vmem:[%s17281_s3 + $0x88] sm:$0xff]  }
 0x608   : > { %v3398_v0 = vadd.f32 %v10918_v37, %v3391_v48  ;;  %v3399_v2 = vmax.f32 %v3397_v47, 0.0  ;;  %v14387_v37 = vld [vmem:[%s17281_s3 + $0x80] sm:$0xff]  }
 0x60a   : > { %v3400_v3 = vmax.f32 %v3398_v0, 0.0 }
 0x60c   : > { %v3403_v4 = vpack.c.bf16 %v3400_v3, %v3399_v2 }
 0x60e   : > { %12439 = vmatmul.mubr.msk.bf16.vlgmr.msra.gmra.mrb[40].mxu0 %vm2220_vm2, %v3403_v4 }
 0x60f   : > { %12446 = vmatprep.mubr.msk.f32.mxu0 %vm2220_vm2, %v15170_v29 }
 0x6e1   : > { %v3447_v6 = vpop.f32.mrb[40].mxu0 }
 0x6e2   : > { %v3454_v9 = vadd.f32 %v3447_v6, %v2438_v42  ;;  %v12440_v10 = vpop.f32.mrb[41].mxu0 }
 0x6e3   : > { %v3450_v12 = vpop.f32.mrb[42].mxu0 }
 0x6e4   : > { %v3461_v13 = vmul.f32 %v10921_v7, %v3454_v9  ;;  %v3455_v14 = vadd.f32 %v3450_v12, %v2439_v45  ;;  %v12441_v15 = vpop.f32.mrb[43].mxu0  ;;  %v14381_v45 = vld [vmem:[%s17281_s3 + $0x50] sm:$0xff]  }
 0x6e6   : > { %v15394_v46 = vadd.f32 %v10922_v11, %v3461_v13  ;;  %v3462_v16 = vmul.f32 %v10921_v7, %v3455_v14 }
 0x6e8   : > { %v15396_v44 = vadd.f32 %v10922_v11, %v3462_v16  ;;  %v3470_v17 = vmax.f32 %v15394_v46, 0.0 }
 0x6ea   : > { %v3471_v40 = vmax.f32 %v15396_v44, 0.0 }
 0x6ec   : > { %v13446_v42 = vpack.c.bf16 %v3471_v40, %v3470_v17 }
 0x6ee   : > { %13447 = vmatprep.subr.bf16.mxu0 %v13446_v42  ;;  %13479 = vmatprep.subr.bf16.mxu1 %v13446_v42 }
 0x6ef   : > { %13449 = vmatpush3.bf16.msra.mxu0 %v13446_v42  ;;  %13481 = vmatpush3.bf16.msra.mxu1 %v13446_v42 }
 0x6f0   : > { %13451 = vmatprep.subr.bf16.mxu0 %v13446_v42  ;;  %12505 = vmatprep.subr.bf16.mxu1 %v14628_v34 }
 0x6f2   : > { %12447 = vmatmul.mubr.msk.f32.vlgmr.msra.gmra.mrb[44].mxu0 %vm2220_vm2, %v15200_v49  ;;  %12503 = vmatmul.mubr.msk.f32.vlgmr.msra.gmra.mrb[22].mxu1 %vm2220_vm2, %v15305_v63 }
 0x6f3   : > { %13453 = vmatpush3.bf16.msra.mxu0 %v13446_v42  ;;  %12453 = vmatprep.mubr.msk.f32.mxu0 %vm2220_vm2, %v15210_v50 }
 0x6f4   : > { %13455 = vmatprep.subr.bf16.mxu0 %v13446_v42  ;;  %12507 = vmatprep.mubr.msk.bf16.mxu1 %vm14629_vm7, %v14628_v34 }
 0x6f6   : > { %12454 = vmatmul.mubr.msk.f32.vlgmr.msra.gmra.mrb[46].mxu0 %vm2220_vm2, %v15221_v51 }
 0x6f7   : > { %13457 = vmatpush3.bf16.msra.mxu0 %v13446_v42  ;;  %12460 = vmatprep.mubr.msk.f32.mxu0 %vm2220_vm2, %v15226_v52 }
 0x6f8   : > { %13459 = vmatprep.subr.bf16.mxu0 %v13446_v42 }
 0x6fa   : > { %12461 = vmatmul.mubr.msk.f32.vlgmr.msra.gmra.mrb[48].mxu0 %vm2220_vm2, %v15235_v53 }
 0x6fb   : > { %13461 = vmatpush3.bf16.msra.mxu0 %v13446_v42  ;;  %12467 = vmatprep.mubr.msk.f32.mxu0 %vm2220_vm2, %v15240_v54 }
 0x6fc   : > { %13463 = vmatprep.subr.bf16.mxu0 %v13446_v42 }
 0x6fe   : > { %12468 = vmatmul.mubr.msk.f32.vlgmr.msra.gmra.mrb[50].mxu0 %vm2220_vm2, %v15249_v55 }
 0x6ff   : > { %13465 = vmatpush3.bf16.msra.mxu0 %v13446_v42  ;;  %12474 = vmatprep.mubr.msk.f32.mxu0 %vm2220_vm2, %v15254_v56 }
 0x700   : > { %13467 = vmatprep.subr.bf16.mxu0 %v13446_v42 }
 0x702   : > { %12475 = vmatmul.mubr.msk.f32.vlgmr.msra.gmra.mrb[52].mxu0 %vm2220_vm2, %v15263_v57 }
 0x703   : > { %13469 = vmatpush3.bf16.msra.mxu0 %v13446_v42  ;;  %12481 = vmatprep.mubr.msk.f32.mxu0 %vm2220_vm2, %v15268_v58 }
 0x704   : > { %13471 = vmatprep.subr.bf16.mxu0 %v13446_v42 }
 0x706   : > { %12482 = vmatmul.mubr.msk.f32.vlgmr.msra.gmra.mrb[54].mxu0 %vm2220_vm2, %v15277_v59 }
 0x707   : > { %13473 = vmatpush3.bf16.msra.mxu0 %v13446_v42  ;;  %12488 = vmatprep.mubr.msk.f32.mxu0 %vm2220_vm2, %v15282_v60 }
 0x708   : > { %13475 = vmatprep.subr.bf16.mxu0 %v13446_v42 }
 0x70a   : > { %12489 = vmatmul.mubr.msk.f32.vlgmr.msra.gmra.mrb[56].mxu0 %vm2220_vm2, %v15291_v61 }
 0x70b   : > { %13477 = vmatpush3.bf16.msra.mxu0 %v13446_v42  ;;  %12495 = vmatprep.mubr.msk.f32.mxu0 %vm2220_vm2, %v15177_v30 }
 0x70c   : > { %4295 = vmatprep.subr.bf16.mxu0 %v14627_v1 }
 0x70e   : > { %12496 = vmatmul.mubr.msk.f32.vlgmr.msra.gmra.mrb[58].mxu0 %vm2220_vm2, %v15205_v21 }
 0x70f   : > { %4296 = vmatpush1.bf16.msra.mxu0 %v14380_v43 }
 0x710   : > { %4297 = vmatprep.subr.bf16.mxu0 %v14627_v1 }
 0x713   : > { %4298 = vmatpush1.bf16.msra.mxu0 %v14381_v45 }
 0x714   : > { %4299 = vmatprep.subr.bf16.mxu0 %v14627_v1 }
 0x717   : > { %4300 = vmatpush1.bf16.msra.mxu0 %v14382_v18 }
 0x718   : > { %4301 = vmatprep.subr.bf16.mxu0 %v14627_v1 }
 0x71b   : > { %4302 = vmatpush1.bf16.msra.mxu0 %v14383_v19 }
 0x71c   : > { %4303 = vmatprep.subr.bf16.mxu0 %v14627_v1 }
 0x71f   : > { %4304 = vmatpush1.bf16.msra.mxu0 %v14384_v22 }
 0x720   : > { %4305 = vmatprep.subr.bf16.mxu0 %v14627_v1 }
 0x723   : > { %4306 = vmatpush1.bf16.msra.mxu0 %v14385_v26 }
 0x724   : > { %4307 = vmatprep.subr.bf16.mxu0 %v14627_v1 }
 0x727   : > { %4308 = vmatpush1.bf16.msra.mxu0 %v14386_v32 }
 0x728   : > { %4309 = vmatprep.subr.bf16.mxu0 %v14627_v1 }
 0x72b   : > { %4310 = vmatpush1.bf16.msra.mxu0 %v14387_v37 }
 0x72c   : > { %4311 = vmatprep.subr.bf16.mxu0 %v14627_v1 }
 0x72f   : > { %4312 = vmatpush1.bf16.msra.mxu0 %v14388_v23 }
 0x7c5   : > { %v15451_v20 = vpop.f32.mrb[44].mxu0  ;;  %v12504_v47 = vpop.f32.mrb[22].mxu1 }
 0x7c6   : > { %v15453_v5 = vpop.f32.mrb[45].mxu0  ;;  %v4138_v48 = vpop.f32.mrb[23].mxu1 }
 0x7c7   : > { %v4237_v2 = vpack.c.bf16 %v12504_v47, %v4138_v48 }
 0x7c9   : > { %v12455_v8 = vpop.f32.mrb[46].mxu0  ;;  %10968 = vmatprep.mubr.msk.bf16.mxu0 %vm2220_vm2, %v4237_v2 }
 0x7ca   : > { %v3613_v24 = vpop.f32.mrb[47].mxu0 }
 0x7cb   : > { %v13946_v25 = vpack.i.bf16 %v12455_v8, %v3613_v24 }
 0x7cd   : > { %13947 = vrot.lane.b32.xlu1 %v13946_v25, %s17349_s26  ;;  %v12462_v27 = vpop.f32.mrb[48].mxu0 }
 0x7ce   : > { %v3688_v28 = vpop.f32.mrb[49].mxu0 }
 0x7cf   : > { %v13951_v31 = vpack.i.bf16 %v12462_v27, %v3688_v28 }
 0x7d1   : > { %13952 = vrot.lane.b32.xlu0 %v13951_v31, %s17350_s1  ;;  %v12469_v33 = vpop.f32.mrb[50].mxu0 }
 0x7d2   : > { %v3763_v35 = vpop.f32.mrb[51].mxu0 }
 0x7d3   : > { %v13956_v36 = vpack.i.bf16 %v12469_v33, %v3763_v35 }
 0x7d5   : > { %13957 = vrot.lane.b32.xlu1 %v13956_v36, %s17344_s22  ;;  %v12476_v38 = vpop.f32.mrb[52].mxu0 }
 0x7d6   : > { %v3838_v39 = vpop.f32.mrb[53].mxu0 }
 0x7d7   : > { %v13961_v41 = vpack.i.bf16 %v12476_v38, %v3838_v39 }
 0x7d9   : > { %13962 = vrot.lane.b32.xlu0 %v13961_v41, %s17345_s23  ;;  %v12483_v0 = vpop.f32.mrb[54].mxu0 }
 0x7da   : > { %v3913_v3 = vpop.f32.mrb[55].mxu0 }
 0x7db   : > { %v13966_v4 = vpack.i.bf16 %v12483_v0, %v3913_v3 }
 0x7dd   : > { %13967 = vrot.lane.b32.xlu1 %v13966_v4, %s17346_s29  ;;  %v12490_v6 = vpop.f32.mrb[56].mxu0 }
 0x7de   : > { %v3988_v7 = vpop.f32.mrb[57].mxu0 }
 0x7df   : > { %v13971_v9 = vpack.i.bf16 %v12490_v6, %v3988_v7  ;;  %v14389_v6 = vld [vmem:[%s17282_s4 + $0x8] sm:$0xff]  }
 0x7e0   : > { %12506 = vmatpush3.bf16.msra.mxu1 %v14389_v6  ;;  %v10969_v7 = vld [vmem:[%s17291_s13 + $0x8] ss:$0 sm:$0xff] }
 0x7e1   : > { %13972 = vrot.lane.b32.xlu0 %v13971_v9, %s17347_s20  ;;  %v12497_v10 = vpop.f32.mrb[58].mxu0 }
 0x7e2   : > { %v4063_v11 = vpop.f32.mrb[59].mxu0 }
 0x7e3   : > { %v13976_v12 = vpack.i.bf16 %v12497_v10, %v4063_v11  ;;  %v10970_v10 = vld [vmem:[%s17291_s13 + $0x9] ss:$0 sm:$0xff] }
 0x7e5   : > { %13977 = vrot.lane.b32.xlu1 %v13976_v12, %s17348_s9 }
 0x83f   : > { %v13948_v13 = vpop.permute.xlu1 %13947 }
 0x840   : > { %v13950_v17 = vunpack.i.h.bf16 %v13948_v13  ;;  %v13949_v40 = vunpack.i.l.bf16 %v13948_v13 }
 0x842   : > { %v4204_v25 = vsel %vm2220_vm2, %v15451_v20, %v13950_v17  ;;  %v4203_v26 = vsel %vm2220_vm2, %v15453_v5, %v13949_v40 }
 0x843   : > { %v13953_v14 = vpop.permute.xlu0 %13952 }
 0x844   : > { %v13955_v42 = vunpack.i.h.bf16 %v13953_v14  ;;  %v13954_v43 = vunpack.i.l.bf16 %v13953_v14 }
 0x846   : > { %v4206_v31 = vsel %vm2223_vm3, %v4204_v25, %v13955_v42  ;;  %v4205_v32 = vsel %vm2223_vm3, %v4203_v26, %v13954_v43  ;;  %v4424_v43 = vld [vmem:[%s17351_s7] sm:$0xff] }
 0x847   : > { %v13958_v15 = vpop.permute.xlu1 %13957 }
 0x848   : > { %v13960_v18 = vunpack.i.h.bf16 %v13958_v15  ;;  %v13959_v19 = vunpack.i.l.bf16 %v13958_v15 }
 0x84a   : > { %v4208_v36 = vsel %vm652_vm0, %v4206_v31, %v13960_v18  ;;  %v4207_v37 = vsel %vm652_vm0, %v4205_v32, %v13959_v19  ;;  %v4507_v19 = vmul.f32 %v4424_v43, %v4424_v43  ;;  %v10976_v32 = vld [vmem:[%s17291_s13 + $0xb] ss:$0 sm:$0xff] }
 0x84b   : > { %v13963_v16 = vpop.permute.xlu0 %13962 }
 0x84c   : > { %v13965_v22 = vunpack.i.h.bf16 %v13963_v16  ;;  %v13964_v8 = vunpack.i.l.bf16 %v13963_v16 }
 0x84e   : > { %v4210_v38 = vsel %vm766_vm1, %v4208_v36, %v13965_v22  ;;  %v4209_v39 = vsel %vm766_vm1, %v4207_v37, %v13964_v8  ;;  %v4510_v8 = vsel %vm4509_vm8, %v4507_v19, 0.0 }
 0x84f   : > { %v13968_v45 = vpop.permute.xlu1 %13967 }
 0x850   : > { %v13970_v27 = vunpack.i.h.bf16 %v13968_v45  ;;  %v13969_v28 = vunpack.i.l.bf16 %v13968_v45  ;;  %v4425_v45 = vld [vmem:[%s17351_s7 + $0x8] sm:$0xff]  ;;  %s10781_s7 = sshll.u32 %s17366_s27, 3 }
 0x851   : > { %v13482_v18 = vpack.c.bf16 %v4425_v45, %v4424_v43  ;;  %v4508_v22 = vmul.f32 %v4425_v45, %v4425_v45  ;;  %s607_s18 = scalar_lea.vmem %s17353_s17, %s10781_s7  ;;  %s17354_s7 = sshll.u32 %s15520_s25, 4 }
 0x852   : > { %v4212_v41 = vsel %vm2230_vm4, %v4210_v38, %v13970_v27  ;;  %v4211_v5 = vsel %vm2230_vm4, %v4209_v39, %v13969_v28  ;;  %v10975_v27 = vld [vmem:[%s17291_s13 + $0xa] ss:$0 sm:$0xff]  ;;  %s15565_s27 = scalar_lea.vmem [#allocation4], %s17354_s7  ;;  %s10604_s7 = sshll.u32 %s15534_s19, 4  ;;  %s17085_s7 = int_to_ptr.vmem [resolvable:$true] %s10604_s7 }
 0x853   : > { %v13973_v24 = vpop.permute.xlu0 %13972  ;;  %13483 = vmatprep.subr.bf16.mxu1 %v13482_v18  ;;  %s10620_s30 = sshll.u32 %s15565_s27, 4  ;;  %s17087_s30 = int_to_ptr.vmem [resolvable:$true] %s10620_s30 }
 0x854   : > { %v13975_v33 = vunpack.i.h.bf16 %v13973_v24  ;;  %v13974_v35 = vunpack.i.l.bf16 %v13973_v24  ;;  %v4511_v24 = vsel %vm4509_vm8, %v4508_v22, 0.0 }
 0x855   : > { %v4512_v25 = vadd.f32 %v4511_v24, %v4510_v8 }
 0x856   : > { %v4214_v23 = vsel %vm2233_vm5, %v4212_v41, %v13975_v33  ;;  %v4213_v0 = vsel %vm2233_vm5, %v4211_v5, %v13974_v35 }
 0x857   : > { %v13978_v20 = vpop.permute.xlu1 %13977 }
 0x858   : > { %v13980_v47 = vunpack.i.h.bf16 %v13978_v20  ;;  %v13979_v48 = vunpack.i.l.bf16 %v13978_v20 }
 0x85a   : > { %v4216_v2 = vsel %vm2236_vm6, %v4214_v23, %v13980_v47  ;;  %v4215_v3 = vsel %vm2236_vm6, %v4213_v0, %v13979_v48 }
 0x85b   : > { %v4236_v4 = vpack.c.bf16 %v4216_v2, %v4215_v3 }
 0x85d   : > { %4328 = vmatmul.mubr.bf16.vlgmr.msra.gmra.mrb[60].mxu0 %v4236_v4 }
 0x85e   : > { %12571 = vmatprep.mubr.msk.f32.mxu0 %vm2220_vm2, %v15282_v60 }
 0x930   : > { %v4329_v9 = vpop.f32.mrb[60].mxu0 }
 0x931   : > { %v4341_v11 = vmul.f32 %v10969_v7, %v4329_v9  ;;  %v4331_v12 = vpop.f32.mrb[61].mxu0 }
 0x932   : > { %v4332_v13 = vpop.f32.mrb[62].mxu0 }
 0x933   : > { %v4348_v14 = vadd.f32 %v10970_v10, %v4341_v11  ;;  %v4342_v15 = vmul.f32 %v10969_v7, %v4332_v13  ;;  %v4334_v60 = vpop.f32.mrb[63].mxu0 }
 0x935   : > { %v4349_v16 = vadd.f32 %v10970_v10, %v4342_v15  ;;  %v4350_v17 = vmax.f32 %v4348_v14, 0.0  ;;  %v4523_v10 = vlaneseq }
 0x937   : > { %v4351_v40 = vmax.f32 %v4349_v16, 0.0  ;;  %v4524_v11 = vand.u32 127, %v4523_v10 }
 0x939   : > { %v4355_v42 = vpack.c.bf16 %v4351_v40, %v4350_v17 }
 0x93b   : > { %12508 = vmatmul.mubr.msk.bf16.vlgmr.msra.gmra.mrb[28].mxu1 %vm2220_vm2, %v4355_v42 }
 0x93c   : > { %13485 = vmatpush3.bf16.msra.mxu1 %v13482_v18 }
 0xa0e   : > { %v4399_v26 = vpop.f32.mrb[28].mxu1 }
 0xa0f   : > { %v4406_v28 = vadd.f32 %v4399_v26, %v15394_v46  ;;  %v12509_v31 = vpop.f32.mrb[29].mxu1  ;;  %v4513_v46 = vrot.slane %v4512_v25, 4 }
 0xa10   : > { %v4402_v33 = vpop.f32.mrb[30].mxu1 }
 0xa11   : > { %v4413_v35 = vmul.f32 %v10975_v27, %v4406_v28  ;;  %v4407_v36 = vadd.f32 %v4402_v33, %v15396_v44  ;;  %v12510_v37 = vpop.f32.mrb[31].mxu1  ;;  %v4514_v41 = vadd.f32 %v4513_v46, %v4512_v25  ;;  %v4575_v28 = vld [vmem:[%s17352_s8 + $0x8] sm:$0x3] }
 0xa13   : > { %v4420_v38 = vadd.f32 %v10976_v32, %v4413_v35  ;;  %v4414_v39 = vmul.f32 %v10975_v27, %v4407_v36  ;;  %v4515_v44 = vrot.slane %v4514_v41, 2  ;;  %v4574_v27 = vld [vmem:[%s17352_s8] sm:$0xff] }
 0xa14   : > { %v13486_v31 = vpack.c.bf16 %v4575_v28, %v4574_v27 }
 0xa15   : > { %v4421_v20 = vadd.f32 %v10976_v32, %v4414_v39  ;;  %12515 = vmatprep.mubr.msk.f32.mxu1 %vm2220_vm2, %v4420_v38  ;;  %4422 = vst.msk [vmem:[%s15534_s19] sm:$0xff] %vm2220_vm2, %v4420_v38  ;;  %v4516_v5 = vadd.f32 %v4515_v44, %v4514_v41 }
 0xa16   : > { %13488 = vmatprep.subr.msk.bf16.mxu1 %vm13487_vm15, %v13486_v31 }
 0xa17   : > { %12516 = vmatmul.mubr.msk.f32.vlgmr.msra.gmra.mrb[32].mxu1 %vm2220_vm2, %v4421_v20  ;;  %4423 = vst.msk [vmem:[%s15534_s19 + $0x8] sm:$0xff] %vm2220_vm2, %v4421_v20  ;;  %v4517_v47 = vrot.slane %v4516_v5, 1  ;;  %s10576_s19 = scalar_lea.sflag [#allocation3], %s15520_s25 }
 0xa18   : > { %13491 = vmatpush3.bf16.msk.msra.mxu1 %vm13487_vm15, %v13486_v31 }
 0xa19   : > { %v4518_v48 = vadd.f32 %v4517_v47, %v4516_v5 }
 0xaea   : > { %v12517_v23 = vpop.f32.mrb[32].mxu1 }
 0xaeb   : > { %v4520_v0 = vmul.f32 2.0, %v12517_v23  ;;  %v4498_v2 = vpop.f32.mrb[33].mxu1 }
 0xaec   : > { %v4519_v3 = vmul.f32 2.0, %v4498_v2 }
 0xaed   : > { %v4522_v4 = vsub.f32 %v4518_v48, %v4520_v0 }
 0xaee   : > { %v4521_v6 = vsub.f32 %v4518_v48, %v4519_v3 }
 0xaef   : > { %v4528_v7 = vsel %vm4509_vm8, %v4522_v4, inf }
 0xaf0   : > { %4529 = vmin.xlane.f32.xlu1 %v4528_v7  ;;  %v4525_v9 = vsel %vm4509_vm8, %v4521_v6, inf }
 0xaf1   : > { %4526 = vmin.xlane.f32.xlu0 %v4525_v9 }
 0xb7d   : > { %v4530_v12 = vpop.xlane.xlu1 %4529 }
 0xb7e   : > { %vm4532_vm9 = vcmp.eq.f32.partialorder %v4522_v4, %v4530_v12  ;;  %v4527_v13 = vpop.xlane.xlu0 %4526  ;;  %v14397_v4 = vld [vmem:[%s17281_s3 + $0xc8] sm:$0xff]   ;;  %v14398_v12 = vld [vmem:[%s17281_s3 + $0xd0] sm:$0xff]  }
 0xb7f   : > { %v4534_v14 = vsel %vm4532_vm9, %v4524_v11, 10  ;;  %vm4531_vm10 = vcmp.eq.f32.partialorder %v4521_v6, %v4527_v13  ;;  %vm4565_vm9 = vcmask 7168  }
 0xb80   : > { %v4533_v15 = vsel %vm4531_vm10, %v4524_v11, 10  ;;  %v4550_v60 = vsel %vm4509_vm8, %v4534_v14, 2147483647 }
 0xb81   : > { %v4535_v16 = vsel %vm4509_vm8, %v4533_v15, 2147483647  ;;  %v4552_v42 = vshra.s32 %v4550_v60, 16  ;;  %v4551_v22 = vand.u32 65535, %v4550_v60 }
 0xb82   : > { %v4537_v17 = vshra.s32 %v4535_v16, 16  ;;  %v4536_v45 = vand.u32 65535, %v4535_v16 }
 0xb83   : > { %v4554_v43 = vcvt.s32.f32 %v4552_v42  ;;  %v4553_v25 = vcvt.s32.f32 %v4551_v22 }
 0xb84   : > { %v4539_v40 = vcvt.s32.f32 %v4537_v17  ;;  %v4538_v19 = vcvt.s32.f32 %v4536_v45 }
 0xb86   : > { %4540 = vmin.xlane.f32.xlu0 %v4539_v40 }
 0xb8a   : > { %4555 = vmin.xlane.f32.xlu0 %v4554_v43 }
 0xc13   : > { %v4541_v18 = vpop.xlane.xlu0 %4540 }
 0xc14   : > { %vm4542_vm11 = vcmp.eq.f32.partialorder %v4539_v40, %v4541_v18  ;;  %v4547_v32 = vcvt.f32.s32 %v4541_v18 }
 0xc15   : > { %v4543_v8 = vsel %vm4542_vm11, %v4538_v19, inf }
 0xc16   : > { %4544 = vmin.xlane.f32.xlu1 %v4543_v8  ;;  %v4548_v35 = vshll.u32 %v4547_v32, 16 }
 0xc17   : > { %v4556_v24 = vpop.xlane.xlu0 %4555 }
 0xc18   : > { %vm4557_vm12 = vcmp.eq.f32.partialorder %v4554_v43, %v4556_v24  ;;  %v4562_v36 = vcvt.f32.s32 %v4556_v24 }
 0xc19   : > { %v4558_v26 = vsel %vm4557_vm12, %v4553_v25, inf }
 0xc1a   : > { %4559 = vmin.xlane.f32.xlu0 %v4558_v26  ;;  %v4563_v20 = vshll.u32 %v4562_v36, 16 }
 0xca3   : > { %v4545_v33 = vpop.xlane.xlu1 %4544 }
 0xca4   : > { %v4546_v37 = vcvt.f32.s32 %v4545_v33 }
 0xca6   : > { %v4549_v38 = vadd.s32 %v4548_v35, %v4546_v37 }
 0xca7   : > { %v4560_v39 = vpop.xlane.xlu0 %4559 }
 0xca8   : > { %4566 = vst.msk [vmem:[%s607_s18] sm:$0xff] %vm4565_vm9, %v4549_v38  ;;  %v4561_v46 = vcvt.f32.s32 %v4560_v39  ;;  %vm4568_vm10 = vcmp.eq.s32.totalorder %v4524_v11, %v4549_v38 }
 0xca9   : > { %v10979_v41 = vsel %vm4568_vm10, 1.0, %v14628_v34 }
 0xcaa   : > { %v4564_v44 = vadd.s32 %v4563_v20, %v4561_v46  ;;  %12522 = vmatprep.mubr.msk.f32.mxu1 %vm4509_vm8, %v10979_v41 }
 0xcac   : > { %4567 = vst.msk [vmem:[%s607_s18 + $0x8] sm:$0xff] %vm4565_vm9, %v4564_v44  ;;  %vm4569_vm11 = vcmp.eq.s32.totalorder %v4524_v11, %v4564_v44 }
 0xcad   : > { %v10980_v5 = vsel %vm4569_vm11, 1.0, %v14628_v34 }
 0xcae   : > { %12523 = vmatmul.mubr.msk.f32.vlgmr.msra.gmra.mrb[34].mxu1 %vm4509_vm8, %v10980_v5 }
 0xcaf   : > { %12529 = vmatprep.mubr.msk.f32.mxu1 %vm2220_vm2, %v15170_v29 }
 0xd81   : > { %v15561_v47 = vpop.f32.mrb[34].mxu1 }
 0xd82   : > { %4662 = vst.msk [vmem:[%s15565_s27 + $0x8] sm:$0xff] %vm2220_vm2, %v15561_v47  ;;  %v4664_v48 = vmax.f32 %v15561_v47, 0.0  ;;  %v15571_v23 = vpop.f32.mrb[35].mxu1 }
 0xd83   : > { %4661 = vst.msk [vmem:[%s15565_s27] sm:$0xff] %vm2220_vm2, %v15571_v23  ;;  %v4663_v0 = vmax.f32 %v15571_v23, 0.0  ;;  %s14524_s27 = scalar_lea.vmem %s17085_s7, 256 }
 0xd84   : > { %p14525_p12 = scmp.ne.s32.totalorder %s17085_s7, %s14524_s27 }
 0xd85   : > { %v13492_v29 = vpack.c.bf16 %v4664_v48, %v4663_v0 }
 0xd86   : > { %p14526_p13 = pnand %p14525_p12, %p14768_p5 }
 0xd87   : > { %13493 = vmatprep.subr.bf16.mxu1 %v13492_v29  ;;  %13517 = vmatprep.subr.bf16.mxu0 %v13492_v29 }
 0xd88   : > { %13495 = vmatpush3.bf16.msra.mxu1 %v13492_v29  ;;  %13519 = vmatpush3.bf16.msra.mxu0 %v13492_v29  ;;  %p14527_p0 = pneg %p14526_p13 }
 0xd89   : > { %13497 = vmatprep.subr.bf16.mxu1 %v13492_v29  ;;  %13525 = vmatprep.subr.bf16.mxu0 %v13492_v29 }
 0xd8b   : > { %12530 = vmatmul.mubr.msk.f32.vlgmr.msra.gmra.mrb[36].mxu1 %vm2220_vm2, %v15200_v49  ;;  %12572 = vmatmul.mubr.msk.f32.vlgmr.msra.gmra.mrb[64].mxu0 %vm2220_vm2, %v15291_v61  ;;  %v14390_v49 = vld [vmem:[%s17281_s3 + $0x90] sm:$0xff]  }
 0xd8c   : > { %13499 = vmatpush3.bf16.msra.mxu1 %v13492_v29  ;;  %13527 = vmatpush3.bf16.msra.mxu0 %v13492_v29 }
 0xd8d   : > { %13501 = vmatprep.subr.bf16.mxu1 %v13492_v29  ;;  %12536 = vmatprep.mubr.msk.f32.mxu1 %vm2220_vm2, %v15210_v50  ;;  %v14391_v50 = vld [vmem:[%s17281_s3 + $0x98] sm:$0xff]  }
 0xd8e   : > { %12585 = vmatprep.mubr.msk.f32.mxu0 %vm2220_vm2, %v15296_v62  ;;  %12588 = vmatprep.subr.bf16.mxu0 %v14628_v34  ;;  %v14396_v62 = vld [vmem:[%s17281_s3 + $0xc0] sm:$0xff]  }
 0xd8f   : > { %12537 = vmatmul.mubr.msk.f32.vlgmr.msra.gmra.mrb[38].mxu1 %vm2220_vm2, %v15221_v51  ;;  %12586 = vmatmul.mubr.msk.f32.vlgmr.msra.gmra.mrb[66].mxu0 %vm2220_vm2, %v15305_v63  ;;  %v14394_v51 = vld [vmem:[%s17281_s3 + $0xb0] sm:$0xff]  }
 0xd90   : > { %13503 = vmatpush3.bf16.msra.mxu1 %v13492_v29  ;;  %12543 = vmatprep.mubr.msk.f32.mxu1 %vm2220_vm2, %v15226_v52 }
 0xd91   : > { %13505 = vmatprep.subr.bf16.mxu1 %v13492_v29  ;;  %12590 = vmatprep.mubr.msk.bf16.mxu0 %vm14629_vm7, %v14628_v34 }
 0xd93   : > { %12544 = vmatmul.mubr.msk.f32.vlgmr.msra.gmra.mrb[40].mxu1 %vm2220_vm2, %v15235_v53 }
 0xd94   : > { %13507 = vmatpush3.bf16.msra.mxu1 %v13492_v29  ;;  %12550 = vmatprep.mubr.msk.f32.mxu1 %vm2220_vm2, %v15240_v54 }
 0xd95   : > { %13509 = vmatprep.subr.bf16.mxu1 %v13492_v29 }
 0xd97   : > { %12551 = vmatmul.mubr.msk.f32.vlgmr.msra.gmra.mrb[42].mxu1 %vm2220_vm2, %v15249_v55 }
 0xd98   : > { %13511 = vmatpush3.bf16.msra.mxu1 %v13492_v29  ;;  %12557 = vmatprep.mubr.msk.f32.mxu1 %vm2220_vm2, %v15254_v56 }
 0xd99   : > { %13513 = vmatprep.subr.bf16.mxu1 %v13492_v29 }
 0xd9b   : > { %12558 = vmatmul.mubr.msk.f32.vlgmr.msra.gmra.mrb[44].mxu1 %vm2220_vm2, %v15263_v57  ;;  %v14395_v57 = vld [vmem:[%s17281_s3 + $0xb8] sm:$0xff]  }
 0xd9c   : > { %13515 = vmatpush3.bf16.msra.mxu1 %v13492_v29  ;;  %12564 = vmatprep.mubr.msk.f32.mxu1 %vm2220_vm2, %v15268_v58 }
 0xd9d   : > { %13521 = vmatprep.subr.bf16.mxu1 %v13492_v29 }
 0xd9f   : > { %12565 = vmatmul.mubr.msk.f32.vlgmr.msra.gmra.mrb[46].mxu1 %vm2220_vm2, %v15277_v59 }
 0xda0   : > { %13523 = vmatpush3.bf16.msra.mxu1 %v13492_v29  ;;  %12578 = vmatprep.mubr.msk.f32.mxu1 %vm2220_vm2, %v15177_v30  ;;  %v14392_v30 = vld [vmem:[%s17281_s3 + $0xa0] sm:$0xff]  }
 0xda1   : > { %5560 = vmatprep.subr.bf16.mxu1 %v14627_v1 }
 0xda3   : > { %12579 = vmatmul.mubr.msk.f32.vlgmr.msra.gmra.mrb[48].mxu1 %vm2220_vm2, %v15205_v21  ;;  %v14393_v21 = vld [vmem:[%s17281_s3 + $0xa8] sm:$0xff]  }
 0xda4   : > { %5561 = vmatpush1.bf16.msra.mxu1 %v14390_v49 }
 0xda5   : > { %5562 = vmatprep.subr.bf16.mxu1 %v14627_v1 }
 0xda8   : > { %5563 = vmatpush1.bf16.msra.mxu1 %v14391_v50 }
 0xda9   : > { %5564 = vmatprep.subr.bf16.mxu1 %v14627_v1 }
 0xdac   : > { %5565 = vmatpush1.bf16.msra.mxu1 %v14392_v30 }
 0xdad   : > { %5566 = vmatprep.subr.bf16.mxu1 %v14627_v1 }
 0xdb0   : > { %5567 = vmatpush1.bf16.msra.mxu1 %v14393_v21 }
 0xdb1   : > { %5568 = vmatprep.subr.bf16.mxu1 %v14627_v1 }
 0xdb4   : > { %5569 = vmatpush1.bf16.msra.mxu1 %v14394_v51 }
 0xdb5   : > { %5570 = vmatprep.subr.bf16.mxu1 %v14627_v1 }
 0xdb8   : > { %5571 = vmatpush1.bf16.msra.mxu1 %v14395_v57 }
 0xdb9   : > { %5572 = vmatprep.subr.bf16.mxu1 %v14627_v1 }
 0xdbc   : > { %5573 = vmatpush1.bf16.msra.mxu1 %v14396_v62 }
 0xdbd   : > { %5574 = vmatprep.subr.bf16.mxu1 %v14627_v1 }
 0xdc0   : > { %5575 = vmatpush1.bf16.msra.mxu1 %v14397_v4 }
 0xdc1   : > { %5576 = vmatprep.subr.bf16.mxu1 %v14627_v1 }
 0xdc4   : > { %5577 = vmatpush1.bf16.msra.mxu1 %v14398_v12 }
 0xe5e   : > { %v12531_v52 = vpop.f32.mrb[36].mxu1  ;;  %v12573_v53 = vpop.f32.mrb[64].mxu0 }
 0xe5f   : > { %v4739_v54 = vpop.f32.mrb[37].mxu1  ;;  %v5237_v55 = vpop.f32.mrb[65].mxu0 }
 0xe60   : > { %v14001_v56 = vpack.i.bf16 %v12573_v53, %v5237_v55 }
 0xe62   : > { %v12538_v58 = vpop.f32.mrb[38].mxu1  ;;  %v12587_v10 = vpop.f32.mrb[66].mxu0 }
 0xe63   : > { %v4822_v59 = vpop.f32.mrb[39].mxu1  ;;  %v5403_v11 = vpop.f32.mrb[67].mxu0 }
 0xe64   : > { %v13981_v61 = vpack.i.bf16 %v12538_v58, %v4822_v59  ;;  %v5502_v14 = vpack.c.bf16 %v12587_v10, %v5403_v11  ;;  %v15673_v58 = vld [vmem:[%s17288_s10 + $0x80] sm:$0xff]  ;;  %v14399_v59 = vld [vmem:[%s17282_s4 + $0x10] sm:$0xff]  }
 0xe65   : > { %12589 = vmatpush3.bf16.msra.mxu0 %v14399_v59 }
 0xe66   : > { %13982 = vrot.lane.b32.xlu1 %v13981_v61, %s17349_s26  ;;  %v12545_v63 = vpop.f32.mrb[40].mxu1  ;;  %11045 = vmatprep.mubr.msk.bf16.mxu1 %vm2220_vm2, %v5502_v14  ;;  %v11046_v61 = vld [vmem:[%s17291_s13 + $0xc] ss:$0 sm:$0xff]  ;;  %v15690_v14 = vld [vmem:[%s17288_s10] sm:$0xff] }
 0xe67   : > { %v4905_v2 = vpop.f32.mrb[41].mxu1 }
 0xe68   : > { %v13986_v3 = vpack.i.bf16 %v12545_v63, %v4905_v2  ;;  %v11047_v63 = vld [vmem:[%s17291_s13 + $0xd] ss:$0 sm:$0xff] }
 0xe6a   : > { %13987 = vrot.lane.b32.xlu0 %v13986_v3, %s17350_s1  ;;  %v12552_v6 = vpop.f32.mrb[42].mxu1 }
 0xe6b   : > { %v4988_v7 = vpop.f32.mrb[43].mxu1 }
 0xe6c   : > { %v13991_v9 = vpack.i.bf16 %v12552_v6, %v4988_v7 }
 0xe6e   : > { %13992 = vrot.lane.b32.xlu1 %v13991_v9, %s17344_s22  ;;  %v12559_v13 = vpop.f32.mrb[44].mxu1 }
 0xe6f   : > { %v5071_v15 = vpop.f32.mrb[45].mxu1 }
 0xe70   : > { %v13996_v60 = vpack.i.bf16 %v12559_v13, %v5071_v15 }
 0xe72   : > { %13997 = vrot.lane.b32.xlu1 %v13996_v60, %s17345_s23  ;;  %v12566_v16 = vpop.f32.mrb[46].mxu1  ;;  %v11052_v60 = vld [vmem:[%s17291_s13 + $0xe] ss:$0 sm:$0xff] }
 0xe73   : > { %v5154_v17 = vpop.f32.mrb[47].mxu1 }
 0xe74   : > { %v14006_v40 = vpack.i.bf16 %v12566_v16, %v5154_v17 }
 0xe76   : > { %14007 = vrot.lane.b32.xlu0 %v14006_v40, %s17346_s29  ;;  %v12580_v42 = vpop.f32.mrb[48].mxu1  ;;  %14002 = vrot.lane.b32.xlu1 %v14001_v56, %s17347_s20  ;;  %v11053_v40 = vld [vmem:[%s17291_s13 + $0xf] ss:$0 sm:$0xff] }
 0xe77   : > { %v5320_v43 = vpop.f32.mrb[49].mxu1 }
 0xe78   : > { %v14011_v45 = vpack.i.bf16 %v12580_v42, %v5320_v43 }
 0xe7a   : > { %14012 = vrot.lane.b32.xlu0 %v14011_v45, %s17348_s9 }
 0xed8   : > { %v13983_v18 = vpop.permute.xlu1 %13982 }
 0xed9   : > { %v13985_v8 = vunpack.i.h.bf16 %v13983_v18  ;;  %v13984_v24 = vunpack.i.l.bf16 %v13983_v18 }
 0xedb   : > { %v5469_v35 = vsel %vm2220_vm2, %v12531_v52, %v13985_v8  ;;  %v5468_v36 = vsel %vm2220_vm2, %v4739_v54, %v13984_v24 }
 0xedc   : > { %v13988_v22 = vpop.permute.xlu0 %13987 }
 0xedd   : > { %v13990_v25 = vunpack.i.h.bf16 %v13988_v22  ;;  %v13989_v26 = vunpack.i.l.bf16 %v13988_v22 }
 0xedf   : > { %v5471_v37 = vsel %vm2223_vm3, %v5469_v35, %v13990_v25  ;;  %v5470_v38 = vsel %vm2223_vm3, %v5468_v36, %v13989_v26  ;;  %v15719_v26 = vld [vmem:[%s17288_s10 + $0x88] sm:$0xff]  ;;  %v15763_v35 = vld [vmem:[%s17288_s10 + $0x38] sm:$0xff]  ;;  %v15770_v36 = vld [vmem:[%s17288_s10 + $0x40] sm:$0xff] }
 0xee0   : > { %v13993_v19 = vpop.permute.xlu1 %13992 }
 0xee1   : > { %v13995_v28 = vunpack.i.h.bf16 %v13993_v19  ;;  %v13994_v31 = vunpack.i.l.bf16 %v13993_v19 }
 0xee3   : > { %v5473_v46 = vsel %vm652_vm0, %v5471_v37, %v13995_v28  ;;  %v5472_v41 = vsel %vm652_vm0, %v5470_v38, %v13994_v31  ;;  %v15735_v28 = vld [vmem:[%s17288_s10 + $0x18] sm:$0xff]  ;;  %v15742_v31 = vld [vmem:[%s17288_s10 + $0x20] sm:$0xff]  ;;  %v15777_v37 = vld [vmem:[%s17288_s10 + $0x48] sm:$0xff] }
 0xee4   : > { %v13998_v27 = vpop.permute.xlu1 %13997  ;;  %v15784_v38 = vld [vmem:[%s17288_s10 + $0x50] sm:$0xff] }
 0xee5   : > { %v14000_v32 = vunpack.i.h.bf16 %v13998_v27  ;;  %v13999_v33 = vunpack.i.l.bf16 %v13998_v27  ;;  %v15726_v27 = vld [vmem:[%s17288_s10 + $0x10] sm:$0xff] }
 0xee7   : > { %v5475_v48 = vsel %vm766_vm1, %v5473_v46, %v14000_v32  ;;  %v5474_v0 = vsel %vm766_vm1, %v5472_v41, %v13999_v33  ;;  %v15749_v32 = vld [vmem:[%s17288_s10 + $0x28] sm:$0xff]  ;;  %v15756_v33 = vld [vmem:[%s17288_s10 + $0x30] sm:$0xff] }
 0xee8   : > { %v14008_v39 = vpop.permute.xlu0 %14007  ;;  %v14003_v20 = vpop.permute.xlu1 %14002  ;;  %v15805_v46 = vld [vmem:[%s17288_s10 + $0x68] sm:$0xff]  ;;  %v15812_v41 = vld [vmem:[%s17288_s10 + $0x70] sm:$0xff] }
 0xee9   : > { %v14010_v44 = vunpack.i.h.bf16 %v14008_v39  ;;  %v14009_v5 = vunpack.i.l.bf16 %v14008_v39  ;;  %v14005_v29 = vunpack.i.h.bf16 %v14003_v20  ;;  %v14004_v49 = vunpack.i.l.bf16 %v14003_v20  ;;  %v15791_v39 = vld [vmem:[%s17288_s10 + $0x58] sm:$0xff]  ;;  %v15798_v20 = vld [vmem:[%s17288_s10 + $0x60] sm:$0xff] }
 0xeeb   : > { %v5477_v50 = vsel %vm2230_vm4, %v5475_v48, %v14010_v44  ;;  %v5476_v30 = vsel %vm2230_vm4, %v5474_v0, %v14009_v5  ;;  %v15820_v44 = vld [vmem:[%s17288_s10 + $0x78] sm:$0xff]  ;;  %v14401_v48 = vld [vmem:[%s17281_s3 + $0xe0] sm:$0xff]   ;;  %v14402_v0 = vld [vmem:[%s17281_s3 + $0xe8] sm:$0xff]  }
 0xeec   : > { %v14013_v21 = vpop.permute.xlu0 %14012  ;;  %v5479_v53 = vsel %vm2233_vm5, %v5477_v50, %v14005_v29  ;;  %v5478_v54 = vsel %vm2233_vm5, %v5476_v30, %v14004_v49  ;;  %v14400_v5 = vld [vmem:[%s17281_s3 + $0xd8] sm:$0xff]   ;;  %v14403_v29 = vld [vmem:[%s17281_s3 + $0xf0] sm:$0xff]  }
 0xeed   : > { %v14015_v51 = vunpack.i.h.bf16 %v14013_v21  ;;  %v14014_v52 = vunpack.i.l.bf16 %v14013_v21  ;;  %v14404_v30 = vld [vmem:[%s17281_s3 + $0xf8] sm:$0xff]  }
 0xeef   : > { %v5480_v55 = vsel %vm2236_vm6, %v5478_v54, %v14014_v52  ;;  %v5481_v56 = vsel %vm2236_vm6, %v5479_v53, %v14015_v51  ;;  %v14405_v53 = vld [vmem:[%s17281_s3 + $0x100] sm:$0xff]  }
 0xef0   : > { %v5501_v57 = vpack.c.bf16 %v5481_v56, %v5480_v55 }
 0xef2   : > { %5593 = vmatmul.mubr.bf16.vlgmr.msra.gmra.mrb[52].mxu1 %v5501_v57  ;;  %v14406_v57 = vld [vmem:[%s17281_s3 + $0x108] sm:$0xff]  }
 0xef3   : > { %12654 = vmatprep.mubr.msk.f32.mxu1 %vm2220_vm2, %v15673_v58 }
 0xfc5   : > { %v5594_v62 = vpop.f32.mrb[52].mxu1 }
 0xfc6   : > { %v5606_v2 = vmul.f32 %v11046_v61, %v5594_v62  ;;  %v5596_v3 = vpop.f32.mrb[53].mxu1 }
 0xfc7   : > { %v5597_v4 = vpop.f32.mrb[54].mxu1 }
 0xfc8   : > { %v5613_v6 = vadd.f32 %v11047_v63, %v5606_v2  ;;  %v5607_v7 = vmul.f32 %v11046_v61, %v5597_v4  ;;  %v5599_v9 = vpop.f32.mrb[55].mxu1 }
 0xfc9   : > { %v14408_v9 = vld [vmem:[%s17281_s3 + $0x118] sm:$0xff]  }
 0xfca   : > { %v5614_v10 = vadd.f32 %v11047_v63, %v5607_v7  ;;  %v5615_v11 = vmax.f32 %v5613_v6, 0.0  ;;  %v14407_v63 = vld [vmem:[%s17281_s3 + $0x110] sm:$0xff]  }
 0xfcc   : > { %v5616_v12 = vmax.f32 %v5614_v10, 0.0 }
 0xfce   : > { %v5620_v13 = vpack.c.bf16 %v5616_v12, %v5615_v11 }
 0xfd0   : > { %12591 = vmatmul.mubr.msk.bf16.vlgmr.msra.gmra.mrb[68].mxu0 %vm2220_vm2, %v5620_v13 }
 0xfd1   : > { %12598 = vmatprep.mubr.msk.f32.mxu0 %vm2220_vm2, %v15690_v14 }
0x10a3   : > { %v5664_v15 = vpop.f32.mrb[68].mxu0 }
0x10a4   : > { %v5671_v16 = vadd.f32 %v5664_v15, %v15571_v23  ;;  %v12592_v17 = vpop.f32.mrb[69].mxu0 }
0x10a5   : > { %v5667_v42 = vpop.f32.mrb[70].mxu0 }
0x10a6   : > { %v5678_v43 = vmul.f32 %v11052_v60, %v5671_v16  ;;  %v5672_v45 = vadd.f32 %v15561_v47, %v5667_v42  ;;  %v12593_v18 = vpop.f32.mrb[71].mxu0  ;;  %v15712_v47 = vld [vmem:[%s17288_s10 + $0x8] sm:$0xff] }
0x10a8   : > { %v15702_v19 = vadd.f32 %v11053_v40, %v5678_v43  ;;  %v5679_v22 = vmul.f32 %v11052_v60, %v5672_v45 }
0x10aa   : > { %v15704_v8 = vadd.f32 %v11053_v40, %v5679_v22  ;;  %v5687_v24 = vmax.f32 %v15702_v19, 0.0 }
0x10ac   : > { %v5688_v25 = vmax.f32 %v15704_v8, 0.0 }
0x10ae   : > { %v13528_v23 = vpack.c.bf16 %v5688_v25, %v5687_v24 }
0x10b0   : > { %13529 = vmatprep.subr.bf16.mxu0 %v13528_v23  ;;  %13561 = vmatprep.subr.bf16.mxu1 %v13528_v23 }
0x10b1   : > { %13531 = vmatpush3.bf16.msra.mxu0 %v13528_v23  ;;  %13563 = vmatpush3.bf16.msra.mxu1 %v13528_v23 }
0x10b2   : > { %13533 = vmatprep.subr.bf16.mxu0 %v13528_v23  ;;  %12657 = vmatprep.subr.bf16.mxu1 %v14628_v34 }
0x10b4   : > { %12599 = vmatmul.mubr.msk.f32.vlgmr.msra.gmra.mrb[72].mxu0 %vm2220_vm2, %v15712_v47  ;;  %12655 = vmatmul.mubr.msk.f32.vlgmr.msra.gmra.mrb[50].mxu1 %vm2220_vm2, %v15719_v26 }
0x10b5   : > { %13535 = vmatpush3.bf16.msra.mxu0 %v13528_v23  ;;  %12605 = vmatprep.mubr.msk.f32.mxu0 %vm2220_vm2, %v15726_v27 }
0x10b6   : > { %13537 = vmatprep.subr.bf16.mxu0 %v13528_v23  ;;  %12659 = vmatprep.mubr.msk.bf16.mxu1 %vm14629_vm7, %v14628_v34 }
0x10b8   : > { %12606 = vmatmul.mubr.msk.f32.vlgmr.msra.gmra.mrb[74].mxu0 %vm2220_vm2, %v15735_v28 }
0x10b9   : > { %13539 = vmatpush3.bf16.msra.mxu0 %v13528_v23  ;;  %12612 = vmatprep.mubr.msk.f32.mxu0 %vm2220_vm2, %v15742_v31 }
0x10ba   : > { %13541 = vmatprep.subr.bf16.mxu0 %v13528_v23 }
0x10bc   : > { %12613 = vmatmul.mubr.msk.f32.vlgmr.msra.gmra.mrb[76].mxu0 %vm2220_vm2, %v15749_v32 }
0x10bd   : > { %13543 = vmatpush3.bf16.msra.mxu0 %v13528_v23  ;;  %12619 = vmatprep.mubr.msk.f32.mxu0 %vm2220_vm2, %v15756_v33 }
0x10be   : > { %13545 = vmatprep.subr.bf16.mxu0 %v13528_v23 }
0x10c0   : > { %12620 = vmatmul.mubr.msk.f32.vlgmr.msra.gmra.mrb[78].mxu0 %vm2220_vm2, %v15763_v35 }
0x10c1   : > { %13547 = vmatpush3.bf16.msra.mxu0 %v13528_v23  ;;  %12626 = vmatprep.mubr.msk.f32.mxu0 %vm2220_vm2, %v15770_v36 }
0x10c2   : > { %13549 = vmatprep.subr.bf16.mxu0 %v13528_v23 }
0x10c4   : > { %12627 = vmatmul.mubr.msk.f32.vlgmr.msra.gmra.mrb[80].mxu0 %vm2220_vm2, %v15777_v37 }
0x10c5   : > { %13551 = vmatpush3.bf16.msra.mxu0 %v13528_v23  ;;  %12633 = vmatprep.mubr.msk.f32.mxu0 %vm2220_vm2, %v15784_v38 }
0x10c6   : > { %13553 = vmatprep.subr.bf16.mxu0 %v13528_v23 }
0x10c8   : > { %12634 = vmatmul.mubr.msk.f32.vlgmr.msra.gmra.mrb[82].mxu0 %vm2220_vm2, %v15791_v39 }
0x10c9   : > { %13555 = vmatpush3.bf16.msra.mxu0 %v13528_v23  ;;  %12640 = vmatprep.mubr.msk.f32.mxu0 %vm2220_vm2, %v15798_v20 }
0x10ca   : > { %13557 = vmatprep.subr.bf16.mxu0 %v13528_v23 }
0x10cc   : > { %12641 = vmatmul.mubr.msk.f32.vlgmr.msra.gmra.mrb[84].mxu0 %vm2220_vm2, %v15805_v46 }
0x10cd   : > { %13559 = vmatpush3.bf16.msra.mxu0 %v13528_v23  ;;  %12647 = vmatprep.mubr.msk.f32.mxu0 %vm2220_vm2, %v15812_v41 }
0x10ce   : > { %6512 = vmatprep.subr.bf16.mxu0 %v14627_v1 }
0x10d0   : > { %12648 = vmatmul.mubr.msk.f32.vlgmr.msra.gmra.mrb[86].mxu0 %vm2220_vm2, %v15820_v44 }
0x10d1   : > { %6513 = vmatpush1.bf16.msra.mxu0 %v14400_v5 }
0x10d2   : > { %6514 = vmatprep.subr.bf16.mxu0 %v14627_v1 }
0x10d5   : > { %6515 = vmatpush1.bf16.msra.mxu0 %v14401_v48 }
0x10d6   : > { %6516 = vmatprep.subr.bf16.mxu0 %v14627_v1 }
0x10d9   : > { %6517 = vmatpush1.bf16.msra.mxu0 %v14402_v0 }
0x10da   : > { %6518 = vmatprep.subr.bf16.mxu0 %v14627_v1 }
0x10dd   : > { %6519 = vmatpush1.bf16.msra.mxu0 %v14403_v29 }
0x10de   : > { %6520 = vmatprep.subr.bf16.mxu0 %v14627_v1 }
0x10e1   : > { %6521 = vmatpush1.bf16.msra.mxu0 %v14404_v30 }
0x10e2   : > { %6522 = vmatprep.subr.bf16.mxu0 %v14627_v1 }
0x10e5   : > { %6523 = vmatpush1.bf16.msra.mxu0 %v14405_v53 }
0x10e6   : > { %6524 = vmatprep.subr.bf16.mxu0 %v14627_v1 }
0x10e9   : > { %6525 = vmatpush1.bf16.msra.mxu0 %v14406_v57 }
0x10ea   : > { %6526 = vmatprep.subr.bf16.mxu0 %v14627_v1 }
0x10ed   : > { %6527 = vmatpush1.bf16.msra.mxu0 %v14407_v63 }
0x10ee   : > { %6528 = vmatprep.subr.bf16.mxu0 %v14627_v1 }
0x10f1   : > { %6529 = vmatpush1.bf16.msra.mxu0 %v14408_v9 }
0x1187   : > { %v15839_v49 = vpop.f32.mrb[72].mxu0  ;;  %v12656_v6 = vpop.f32.mrb[50].mxu1 }
0x1188   : > { %v15841_v50 = vpop.f32.mrb[73].mxu0  ;;  %v6355_v7 = vpop.f32.mrb[51].mxu1 }
0x1189   : > { %v6454_v11 = vpack.c.bf16 %v12656_v6, %v6355_v7 }
0x118b   : > { %v12607_v21 = vpop.f32.mrb[74].mxu0  ;;  %11099 = vmatprep.mubr.msk.bf16.mxu0 %vm2220_vm2, %v6454_v11 }
0x118c   : > { %v5830_v51 = vpop.f32.mrb[75].mxu0 }
0x118d   : > { %v14016_v52 = vpack.i.bf16 %v12607_v21, %v5830_v51 }
0x118f   : > { %14017 = vrot.lane.b32.xlu1 %v14016_v52, %s17349_s26  ;;  %v12614_v54 = vpop.f32.mrb[76].mxu0 }
0x1190   : > { %v5905_v55 = vpop.f32.mrb[77].mxu0 }
0x1191   : > { %v14021_v56 = vpack.i.bf16 %v12614_v54, %v5905_v55 }
0x1193   : > { %14022 = vrot.lane.b32.xlu0 %v14021_v56, %s17350_s1  ;;  %v12621_v59 = vpop.f32.mrb[78].mxu0 }
0x1194   : > { %v5980_v61 = vpop.f32.mrb[79].mxu0 }
0x1195   : > { %v14026_v62 = vpack.i.bf16 %v12621_v59, %v5980_v61 }
0x1197   : > { %14027 = vrot.lane.b32.xlu1 %v14026_v62, %s17344_s22  ;;  %v12628_v2 = vpop.f32.mrb[80].mxu0 }
0x1198   : > { %v6055_v3 = vpop.f32.mrb[81].mxu0 }
0x1199   : > { %v14031_v4 = vpack.i.bf16 %v12628_v2, %v6055_v3 }
0x119b   : > { %14032 = vrot.lane.b32.xlu0 %v14031_v4, %s17345_s23  ;;  %v12635_v10 = vpop.f32.mrb[82].mxu0  ;;  %s17098_s23 = scalar_lea.hbm %s17294_s16, %s11432_s21 }
0x119c   : > { %v6130_v12 = vpop.f32.mrb[83].mxu0 }
0x119d   : > { %v14036_v13 = vpack.i.bf16 %v12635_v10, %v6130_v12 }
0x119f   : > { %14037 = vrot.lane.b32.xlu1 %v14036_v13, %s17346_s29  ;;  %v12642_v15 = vpop.f32.mrb[84].mxu0  ;;  %v14409_v13 = vld [vmem:[%s17282_s4 + $0x18] sm:$0xff]   ;;  %s14631_s29 = smov [#allocation2]  }
0x11a0   : > { %v6205_v60 = vpop.f32.mrb[85].mxu0  ;;  %12658 = vmatpush3.bf16.msra.mxu1 %v14409_v13 }
0x11a1   : > { %v14041_v16 = vpack.i.bf16 %v12642_v15, %v6205_v60  ;;  %v11100_v15 = vld [vmem:[%s17291_s13 + $0x10] ss:$0 sm:$0xff] }
0x11a3   : > { %14042 = vrot.lane.b32.xlu0 %v14041_v16, %s17347_s20  ;;  %v12649_v1 = vpop.f32.mrb[86].mxu0  ;;  %v11101_v16 = vld [vmem:[%s17291_s13 + $0x11] ss:$0 sm:$0xff]  ;;  %s14528_s20 = sshll.u32 %s14631_s29, 4  ;;  %s14529_s20 = int_to_ptr.vmem [resolvable:$false] %s14528_s20 }
0x11a4   : > { %v6280_v17 = vpop.f32.mrb[87].mxu0  ;;  %p14531_p1 = scmp.lt.s32.totalorder %s17085_s7, %s14529_s20 }
0x11a5   : > { %v14046_v40 = vpack.i.bf16 %v12649_v1, %v6280_v17 }
0x11a7   : > { %14047 = vrot.lane.b32.xlu1 %v14046_v40, %s17348_s9  ;;  %s14530_s9 = scalar_lea.vmem %s14529_s20, 512 }
0x11a8   : > { %p14532_p2 = scmp.lt.s32.totalorder %s14530_s9, %s14524_s27 }
0x11aa   : > { %p14533_p3 = por %p14532_p2, %p14531_p1 }
0x11ac   : > { %p14534_p4 = pnand %p14533_p3, %p14527_p0 }
0x1201   : > { %v14018_v42 = vpop.permute.xlu1 %14017 }
0x1202   : > { %v14020_v22 = vunpack.i.h.bf16 %v14018_v42  ;;  %v14019_v24 = vunpack.i.l.bf16 %v14018_v42 }
0x1204   : > { %v6421_v51 = vsel %vm2220_vm2, %v15839_v49, %v14020_v22  ;;  %v6420_v52 = vsel %vm2220_vm2, %v15841_v50, %v14019_v24 }
0x1205   : > { %v14023_v43 = vpop.permute.xlu0 %14022 }
0x1206   : > { %v14025_v25 = vunpack.i.h.bf16 %v14023_v43  ;;  %v14024_v23 = vunpack.i.l.bf16 %v14023_v43 }
0x1208   : > { %v6423_v55 = vsel %vm2223_vm3, %v6421_v51, %v14025_v25  ;;  %v6422_v56 = vsel %vm2223_vm3, %v6420_v52, %v14024_v23  ;;  %v11106_v23 = vld [vmem:[%s17291_s13 + $0x12] ss:$0 sm:$0xff]  ;;  %v11107_v51 = vld [vmem:[%s17291_s13 + $0x13] ss:$0 sm:$0xff] }
0x1209   : > { %v14028_v45 = vpop.permute.xlu1 %14027 }
0x120a   : > { %v14030_v48 = vunpack.i.h.bf16 %v14028_v45  ;;  %v14029_v0 = vunpack.i.l.bf16 %v14028_v45 }
0x120c   : > { %v6425_v61 = vsel %vm652_vm0, %v6423_v55, %v14030_v48  ;;  %v6424_v62 = vsel %vm652_vm0, %v6422_v56, %v14029_v0  ;;  %v14416_v55 = vld [vmem:[%s17283_s5 + $0x10] sm:$0xff]  }
0x120d   : > { %v14033_v18 = vpop.permute.xlu0 %14032 }
0x120e   : > { %v14035_v29 = vunpack.i.h.bf16 %v14033_v18  ;;  %v14034_v30 = vunpack.i.l.bf16 %v14033_v18 }
0x1210   : > { %v6427_v63 = vsel %vm766_vm1, %v6425_v61, %v14035_v29  ;;  %v6426_v2 = vsel %vm766_vm1, %v6424_v62, %v14034_v30  ;;  %v14418_v62 = vld [vmem:[%s17283_s5 + $0x18] sm:$0xff]  }
0x1211   : > { %v14038_v5 = vpop.permute.xlu1 %14037 }
0x1212   : > { %v14040_v53 = vunpack.i.h.bf16 %v14038_v5  ;;  %v14039_v54 = vunpack.i.l.bf16 %v14038_v5 }
0x1214   : > { %v6429_v3 = vsel %vm2230_vm4, %v6427_v63, %v14040_v53  ;;  %v6428_v50 = vsel %vm2230_vm4, %v6426_v2, %v14039_v54 }
0x1215   : > { %v14043_v21 = vpop.permute.xlu0 %14042 }
0x1216   : > { %v14045_v57 = vunpack.i.h.bf16 %v14043_v21  ;;  %v14044_v59 = vunpack.i.l.bf16 %v14043_v21 }
0x1218   : > { %v6431_v7 = vsel %vm2233_vm5, %v6429_v3, %v14045_v57  ;;  %v6430_v9 = vsel %vm2233_vm5, %v6428_v50, %v14044_v59 }
0x1219   : > { %v14048_v49 = vpop.permute.xlu1 %14047 }
0x121a   : > { %v14050_v4 = vunpack.i.h.bf16 %v14048_v49  ;;  %v14049_v6 = vunpack.i.l.bf16 %v14048_v49 }
0x121c   : > { %v6433_v10 = vsel %vm2236_vm6, %v6431_v7, %v14050_v4  ;;  %v6432_v11 = vsel %vm2236_vm6, %v6430_v9, %v14049_v6 }
0x121d   : > { %v6453_v12 = vpack.c.bf16 %v6433_v10, %v6432_v11 }
0x121f   : > { %6545 = vmatmul.mubr.bf16.vlgmr.msra.gmra.mrb[88].mxu0 %v6453_v12 }
0x1220   : > { %12723 = vmatprep.mubr.msk.f32.mxu0 %vm2220_vm2, %v15673_v58 }
0x12f2   : > { %v6546_v60 = vpop.f32.mrb[88].mxu0 }
0x12f3   : > { %v6558_v1 = vmul.f32 %v11100_v15, %v6546_v60  ;;  %v6548_v17 = vpop.f32.mrb[89].mxu0 }
0x12f4   : > { %v6549_v40 = vpop.f32.mrb[90].mxu0 }
0x12f5   : > { %v6565_v42 = vadd.f32 %v11101_v16, %v6558_v1  ;;  %v6559_v43 = vmul.f32 %v11100_v15, %v6549_v40  ;;  %v6551_v58 = vpop.f32.mrb[91].mxu0 }
0x12f7   : > { %v6566_v45 = vadd.f32 %v11101_v16, %v6559_v43  ;;  %v6567_v18 = vmax.f32 %v6565_v42, 0.0 }
0x12f9   : > { %v6568_v22 = vmax.f32 %v6566_v45, 0.0 }
0x12fb   : > { %v6572_v24 = vpack.c.bf16 %v6568_v22, %v6567_v18 }
0x12fd   : > { %12660 = vmatmul.mubr.msk.bf16.vlgmr.msra.gmra.mrb[56].mxu1 %vm2220_vm2, %v6572_v24 }
0x12fe   : > { %12667 = vmatprep.mubr.msk.f32.mxu1 %vm2220_vm2, %v15690_v14 }
0x13d0   : > { %v6616_v25 = vpop.f32.mrb[56].mxu1 }
0x13d1   : > { %v6623_v5 = vadd.f32 %v6616_v25, %v15702_v19  ;;  %v12661_v48 = vpop.f32.mrb[57].mxu1  ;;  %v14410_v19 = vld [vmem:[%s17283_s5 + $0x20] sm:$0xff]  }
0x13d2   : > { %v6619_v0 = vpop.f32.mrb[58].mxu1 }
0x13d3   : > { %v6630_v29 = vmul.f32 %v11106_v23, %v6623_v5  ;;  %v6624_v30 = vadd.f32 %v6619_v0, %v15704_v8  ;;  %v12662_v21 = vpop.f32.mrb[59].mxu1  ;;  %v14417_v5 = vld [vmem:[%s17283_s5 + $0x40] sm:$0xff]  }
0x13d5   : > { %v6631_v52 = vmul.f32 %v11106_v23, %v6624_v30  ;;  %v6637_v53 = vadd.f32 %v11107_v51, %v6630_v29 }
0x13d7   : > { %v6638_v14 = vadd.f32 %v11107_v51, %v6631_v52 }
0x13d9   : > { %v13564_v54 = vpack.c.bf16 %v6638_v14, %v6637_v53 }
0x13db   : > { %13565 = vmatprep.subr.bf16.mxu1 %v13564_v54  ;;  %13597 = vmatprep.subr.bf16.mxu0 %v13564_v54 }
0x13dc   : > { %13567 = vmatpush3.bf16.msra.mxu1 %v13564_v54  ;;  %13599 = vmatpush3.bf16.msra.mxu0 %v13564_v54 }
0x13dd   : > { %13569 = vmatprep.subr.bf16.mxu1 %v13564_v54  ;;  %12738 = vmatprep.subr.bf16.mxu0 %v14628_v34 }
0x13df   : > { %12668 = vmatmul.mubr.msk.f32.vlgmr.msra.gmra.mrb[60].mxu1 %vm2220_vm2, %v15712_v47  ;;  %12724 = vmatmul.mubr.msk.f32.vlgmr.msra.gmra.mrb[92].mxu0 %vm2220_vm2, %v15719_v26 }
0x13e0   : > { %13571 = vmatpush3.bf16.msra.mxu1 %v13564_v54  ;;  %12674 = vmatprep.mubr.msk.f32.mxu1 %vm2220_vm2, %v15726_v27 }
0x13e1   : > { %13573 = vmatprep.subr.bf16.mxu1 %v13564_v54  ;;  %12746 = vmatprep.mubr.msk.bf16.mxu0 %vm14629_vm7, %v14628_v34 }
0x13e2   : > { %12739 = vmatpush3.bf16.msra.mxu0 %v14410_v19 }
0x13e3   : > { %12675 = vmatmul.mubr.msk.f32.vlgmr.msra.gmra.mrb[62].mxu1 %vm2220_vm2, %v15735_v28  ;;  %12740 = vmatprep.subr.bf16.mxu0 %v14628_v34  ;;  %v14411_v28 = vld [vmem:[%s17283_s5 + $0x28] sm:$0xff]  }
0x13e4   : > { %13575 = vmatpush3.bf16.msra.mxu1 %v13564_v54  ;;  %12681 = vmatprep.mubr.msk.f32.mxu1 %vm2220_vm2, %v15742_v31  ;;  %v14412_v31 = vld [vmem:[%s17283_s5] sm:$0xff]  }
0x13e5   : > { %13577 = vmatprep.subr.bf16.mxu1 %v13564_v54 }
0x13e6   : > { %12741 = vmatpush3.bf16.msra.mxu0 %v14411_v28 }
0x13e7   : > { %12682 = vmatmul.mubr.msk.f32.vlgmr.msra.gmra.mrb[64].mxu1 %vm2220_vm2, %v15749_v32  ;;  %12742 = vmatprep.subr.bf16.mxu0 %v14628_v34 }
0x13e8   : > { %13579 = vmatpush3.bf16.msra.mxu1 %v13564_v54  ;;  %12688 = vmatprep.mubr.msk.f32.mxu1 %vm2220_vm2, %v15756_v33 }
0x13e9   : > { %13581 = vmatprep.subr.bf16.mxu1 %v13564_v54 }
0x13eb   : > { %12689 = vmatmul.mubr.msk.f32.vlgmr.msra.gmra.mrb[66].mxu1 %vm2220_vm2, %v15763_v35 }
0x13ec   : > { %13583 = vmatpush3.bf16.msra.mxu1 %v13564_v54  ;;  %12695 = vmatprep.mubr.msk.f32.mxu1 %vm2220_vm2, %v15770_v36 }
0x13ed   : > { %13585 = vmatprep.subr.bf16.mxu1 %v13564_v54 }
0x13ef   : > { %12696 = vmatmul.mubr.msk.f32.vlgmr.msra.gmra.mrb[68].mxu1 %vm2220_vm2, %v15777_v37  ;;  %v14413_v37 = vld [vmem:[%s17283_s5 + $0x30] sm:$0xff]  }
0x13f0   : > { %13587 = vmatpush3.bf16.msra.mxu1 %v13564_v54  ;;  %12702 = vmatprep.mubr.msk.f32.mxu1 %vm2220_vm2, %v15784_v38 }
0x13f1   : > { %13589 = vmatprep.subr.bf16.mxu1 %v13564_v54  ;;  %12743 = vmatpush3.bf16.msra.mxu0 %v14413_v37 }
0x13f2   : > { %12744 = vmatprep.subr.bf16.mxu0 %v14628_v34 }
0x13f3   : > { %12703 = vmatmul.mubr.msk.f32.vlgmr.msra.gmra.mrb[70].mxu1 %vm2220_vm2, %v15791_v39  ;;  %v14414_v39 = vld [vmem:[%s17283_s5 + $0x8] sm:$0xff]  }
0x13f4   : > { %13591 = vmatpush3.bf16.msra.mxu1 %v13564_v54  ;;  %12709 = vmatprep.mubr.msk.f32.mxu1 %vm2220_vm2, %v15798_v20 }
0x13f5   : > { %13593 = vmatprep.subr.bf16.mxu1 %v13564_v54 }
0x13f7   : > { %12710 = vmatmul.mubr.msk.f32.vlgmr.msra.gmra.mrb[72].mxu1 %vm2220_vm2, %v15805_v46 }
0x13f8   : > { %13595 = vmatpush3.bf16.msra.mxu1 %v13564_v54  ;;  %12716 = vmatprep.mubr.msk.f32.mxu1 %vm2220_vm2, %v15812_v41  ;;  %v14415_v41 = vld [vmem:[%s17283_s5 + $0x38] sm:$0xff]  }
0x13f9   : > { %12726 = vmatprep.subr.bf16.mxu1 %v14628_v34  ;;  %12745 = vmatpush3.bf16.msra.mxu0 %v14415_v41 }
0x13fa   : > { %12782 = vmatprep.subr.bf16.mxu0 %v14628_v34 }
0x13fb   : > { %12717 = vmatmul.mubr.msk.f32.vlgmr.msra.gmra.mrb[74].mxu1 %vm2220_vm2, %v15820_v44 }
0x13fc   : > { %12734 = vmatprep.mubr.msk.bf16.mxu1 %vm14629_vm7, %v14628_v34  ;;  %12727 = vmatpush3.bf16.msra.mxu1 %v14412_v31 }
0x13fd   : > { %12728 = vmatprep.subr.bf16.mxu1 %v14628_v34 }
0x1400   : > { %12729 = vmatpush3.bf16.msra.mxu1 %v14414_v39  ;;  %v14420_v39 = vld [vmem:[%s17283_s5 + $0x50] sm:$0xff]  }
0x1401   : > { %12730 = vmatprep.subr.bf16.mxu1 %v14628_v34 }
0x1404   : > { %12731 = vmatpush3.bf16.msra.mxu1 %v14416_v55 }
0x1405   : > { %12732 = vmatprep.subr.bf16.mxu1 %v14628_v34 }
0x1408   : > { %12733 = vmatpush3.bf16.msra.mxu1 %v14418_v62 }
0x14b2   : > { %v15950_v8 = vpop.f32.mrb[60].mxu1  ;;  %v12725_v47 = vpop.f32.mrb[92].mxu0 }
0x14b3   : > { %v15952_v26 = vpop.f32.mrb[61].mxu1  ;;  %v7305_v27 = vpop.f32.mrb[93].mxu0 }
0x14b4   : > { %v14106_v32 = vpack.i.bf16 %v12725_v47, %v7305_v27  ;;  %v14419_v47 = vld [vmem:[%s17283_s5 + $0x48] sm:$0xff]  }
0x14b6   : > { %v12676_v33 = vpop.f32.mrb[62].mxu1 }
0x14b7   : > { %v6780_v35 = vpop.f32.mrb[63].mxu1 }
0x14b8   : > { %v14066_v36 = vpack.i.bf16 %v12676_v33, %v6780_v35 }
0x14ba   : > { %v12683_v38 = vpop.f32.mrb[64].mxu1 }
0x14bb   : > { %v6855_v20 = vpop.f32.mrb[65].mxu1 }
0x14bc   : > { %v14051_v46 = vpack.i.bf16 %v12683_v38, %v6855_v20 }
0x14be   : > { %14052 = vrot.lane.b32.xlu0 %v14051_v46, %s17349_s26  ;;  %v15975_v44 = vpop.f32.mrb[66].mxu1 }
0x14bf   : > { %v15980_v56 = vpop.f32.mrb[67].mxu1 }
0x14c0   : > { %v14071_v57 = vpack.i.bf16 %v15975_v44, %v15980_v56 }
0x14c2   : > { %v15986_v59 = vpop.f32.mrb[68].mxu1 }
0x14c3   : > { %v15988_v61 = vpop.f32.mrb[69].mxu1 }
0x14c4   : > { %v14056_v63 = vpack.i.bf16 %v15986_v59, %v15988_v61 }
0x14c6   : > { %14057 = vrot.lane.b32.xlu1 %v14056_v63, %s17350_s1  ;;  %v12704_v2 = vpop.f32.mrb[70].mxu1 }
0x14c7   : > { %v7080_v49 = vpop.f32.mrb[71].mxu1 }
0x14c8   : > { %v14096_v3 = vpack.i.bf16 %v12704_v2, %v7080_v49  ;;  %v14421_v49 = vld [vmem:[%s17283_s5 + $0x58] sm:$0xff]  }
0x14ca   : > { %14067 = vrot.lane.b32.xlu1 %v14066_v36, %s17349_s26  ;;  %14062 = vrot.lane.b32.xlu0 %v14096_v3, %s17344_s22  ;;  %v12711_v50 = vpop.f32.mrb[72].mxu1 }
0x14cb   : > { %v7155_v4 = vpop.f32.mrb[73].mxu1 }
0x14cc   : > { %v14086_v6 = vpack.i.bf16 %v12711_v50, %v7155_v4 }
0x14ce   : > { %14077 = vrot.lane.b32.xlu1 %v14056_v63, %s17344_s22  ;;  %14072 = vrot.lane.b32.xlu0 %v14071_v57, %s17350_s1  ;;  %v12718_v7 = vpop.f32.mrb[74].mxu1 }
0x14cf   : > { %v7230_v9 = vpop.f32.mrb[75].mxu1 }
0x14d0   : > { %v14101_v10 = vpack.i.bf16 %v12718_v7, %v7230_v9 }
0x14d2   : > { %14082 = vrot.lane.b32.xlu0 %v14056_v63, %s17349_s26  ;;  %14087 = vrot.lane.b32.xlu1 %v14086_v6, %s17350_s1 }
0x14d6   : > { %14097 = vrot.lane.b32.xlu1 %v14096_v3, %s17349_s26  ;;  %14092 = vrot.lane.b32.xlu0 %v14101_v10, %s17344_s22 }
0x14da   : > { %14102 = vrot.lane.b32.xlu0 %v14101_v10, %s17350_s1  ;;  %14107 = vrot.lane.b32.xlu1 %v14106_v32, %s17344_s22 }
0x1530   : > { %v14053_v11 = vpop.permute.xlu0 %14052 }
0x1531   : > { %v14055_v13 = vunpack.i.h.bf16 %v14053_v11  ;;  %v14054_v15 = vunpack.i.l.bf16 %v14053_v11 }
0x1533   : > { %v7468_v40 = vsel %vm2220_vm2, %v12676_v33, %v14055_v13  ;;  %v7467_v42 = vsel %vm2220_vm2, %v6780_v35, %v14054_v15 }
0x1538   : > { %v14058_v12 = vpop.permute.xlu1 %14057 }
0x1539   : > { %v14060_v60 = vunpack.i.h.bf16 %v14058_v12  ;;  %v14059_v16 = vunpack.i.l.bf16 %v14058_v12 }
0x153b   : > { %v7470_v45 = vsel %vm2223_vm3, %v7468_v40, %v14060_v60  ;;  %v7469_v18 = vsel %vm2223_vm3, %v7467_v42, %v14059_v16  ;;  %v14422_v60 = vld [vmem:[%s17283_s5 + $0x60] sm:$0xff]   ;;  %v14425_v40 = vld [vmem:[%s17283_s5 + $0x78] sm:$0xff]  }
0x153c   : > { %v14068_v1 = vpop.permute.xlu1 %14067  ;;  %v14063_v17 = vpop.permute.xlu0 %14062  ;;  %v11146_v42 = vld [vmem:[%s17289_s11 + $0x40] sm:$0xff] }
0x153d   : > { %v14065_v43 = vunpack.i.h.bf16 %v14063_v17  ;;  %v14064_v58 = vunpack.i.l.bf16 %v14063_v17  ;;  %v14070_v22 = vunpack.i.h.bf16 %v14068_v1  ;;  %v14069_v24 = vunpack.i.l.bf16 %v14068_v1 }
0x153f   : > { %v7472_v25 = vsel %vm652_vm0, %v7470_v45, %v14065_v43  ;;  %v7471_v23 = vsel %vm652_vm0, %v7469_v18, %v14064_v58  ;;  %v7339_v53 = vsel %vm2220_vm2, %v15950_v8, %v14070_v22  ;;  %v7338_v14 = vsel %vm2220_vm2, %v15952_v26, %v14069_v24  ;;  %v16082_v43 = vld [vmem:[%s17291_s13 + $0x14] ss:$0 sm:$0xff]  ;;  %v16087_v58 = vld [vmem:[%s17291_s13 + $0x15] ss:$0 sm:$0xff] }
0x1540   : > { %v7482_v48 = vpack.c.bf16 %v7472_v25, %v7471_v23  ;;  %v14078_v0 = vpop.permute.xlu1 %14077  ;;  %v14073_v29 = vpop.permute.xlu0 %14072 }
0x1541   : > { %v14080_v30 = vunpack.i.h.bf16 %v14078_v0  ;;  %v14079_v21 = vunpack.i.l.bf16 %v14078_v0  ;;  %v14075_v51 = vunpack.i.h.bf16 %v14073_v29  ;;  %v14074_v52 = vunpack.i.l.bf16 %v14073_v29 }
0x1542   : > { %12747 = vmatmul.mubr.msk.bf16.vlgmr.msra.gmra.mrb[96].mxu0 %vm766_vm1, %v7482_v48 }
0x1543   : > { %v7341_v54 = vsel %vm2223_vm3, %v7339_v53, %v14075_v51  ;;  %v7340_v19 = vsel %vm2223_vm3, %v7338_v14, %v14074_v52  ;;  %12783 = vmatpush3.bf16.msra.mxu0 %v14417_v5  ;;  %12790 = vmatprep.mubr.msk.bf16.mxu0 %vm14629_vm7, %v14628_v34 }
0x1544   : > { %v7343_v27 = vsel %vm652_vm0, %v7341_v54, %v14080_v30  ;;  %v7342_v8 = vsel %vm652_vm0, %v7340_v19, %v14079_v21  ;;  %v14083_v28 = vpop.permute.xlu0 %14082  ;;  %v14088_v26 = vpop.permute.xlu1 %14087  ;;  %12784 = vmatprep.subr.bf16.mxu0 %v14628_v34 }
0x1545   : > { %v7352_v31 = vpack.c.bf16 %v7343_v27, %v7342_v8  ;;  %v14085_v32 = vunpack.i.h.bf16 %v14083_v28  ;;  %v14084_v33 = vunpack.i.l.bf16 %v14083_v28  ;;  %v14090_v35 = vunpack.i.h.bf16 %v14088_v26  ;;  %v11147_v8 = vld [vmem:[%s17289_s11 + $0x48] sm:$0xff]  ;;  %v11148_v28 = vld [vmem:[%s17289_s11 + $0x50] sm:$0xff] }
0x1546   : > { %v14089_v36 = vunpack.i.l.bf16 %v14088_v26 }
0x1547   : > { %v7847_v37 = vsel %vm2220_vm2, %v15975_v44, %v14085_v32  ;;  %v7846_v38 = vsel %vm2220_vm2, %v15980_v56, %v14084_v33  ;;  %12785 = vmatpush3.bf16.msra.mxu0 %v14419_v47  ;;  %12735 = vmatmul.mubr.msk.bf16.vlgmr.msra.gmra.mrb[76].mxu1 %vm766_vm1, %v7352_v31  ;;  %v11149_v32 = vld [vmem:[%s17289_s11 + $0x58] sm:$0xff] }
0x1548   : > { %v14098_v20 = vpop.permute.xlu1 %14097  ;;  %v14093_v46 = vpop.permute.xlu0 %14092  ;;  %12786 = vmatprep.subr.bf16.mxu0 %v14628_v34  ;;  %v7849_v57 = vsel %vm2223_vm3, %v7847_v37, %v14090_v35  ;;  %v7848_v44 = vsel %vm2223_vm3, %v7846_v38, %v14089_v36  ;;  %12754 = vmatprep.mubr.msk.f32.mxu1 %vm2220_vm2, %v11146_v42  ;;  %v11150_v36 = vld [vmem:[%s17289_s11 + $0x60] sm:$0xff]  ;;  %v11185_v42 = vld [vmem:[%s17289_s11 + $0x90] sm:$0xff] }
0x1549   : > { %v14095_v41 = vunpack.i.h.bf16 %v14093_v46  ;;  %v14094_v55 = vunpack.i.l.bf16 %v14093_v46  ;;  %v14100_v62 = vunpack.i.h.bf16 %v14098_v20  ;;  %v14099_v63 = vunpack.i.l.bf16 %v14098_v20  ;;  %v11151_v46 = vld [vmem:[%s17289_s11 + $0x68] sm:$0xff] }
0x154b   : > { %v7851_v56 = vsel %vm652_vm0, %v7849_v57, %v14095_v41  ;;  %v7850_v2 = vsel %vm652_vm0, %v7848_v44, %v14094_v55  ;;  %12787 = vmatpush3.bf16.msra.mxu0 %v14420_v39  ;;  %v8103_v11 = vsel %vm2220_vm2, %v15986_v59, %v14100_v62  ;;  %v8102_v12 = vsel %vm2220_vm2, %v15988_v61, %v14099_v63  ;;  %v14423_v59 = vld [vmem:[%s17283_s5 + $0x68] sm:$0xff]   ;;  %v14424_v61 = vld [vmem:[%s17283_s5 + $0x70] sm:$0xff]   ;;  %v11153_v62 = vld [vmem:[%s17289_s11 + $0x78] sm:$0xff] }
0x154c   : > { %v7861_v3 = vpack.c.bf16 %v7851_v56, %v7850_v2  ;;  %v14103_v50 = vpop.permute.xlu0 %14102  ;;  %12788 = vmatprep.subr.bf16.mxu0 %v14628_v34  ;;  %v14108_v4 = vpop.permute.xlu1 %14107  ;;  %v11152_v55 = vld [vmem:[%s17289_s11 + $0x70] sm:$0xff]  ;;  %v7437_v56 = vld [vmem:[%s17289_s11] sm:$0xff]  ;;  %v7438_v2 = vld [vmem:[%s17289_s11 + $0x8] sm:$0xff] }
0x154d   : > { %v14105_v6 = vunpack.i.h.bf16 %v14103_v50  ;;  %v14104_v7 = vunpack.i.l.bf16 %v14103_v50  ;;  %v14110_v9 = vunpack.i.h.bf16 %v14108_v4  ;;  %v14109_v10 = vunpack.i.l.bf16 %v14108_v4  ;;  %v7440_v50 = vld [vmem:[%s17289_s11 + $0x18] sm:$0xff] }
0x154f   : > { %v8105_v13 = vsel %vm2223_vm3, %v8103_v11, %v14105_v6  ;;  %v8104_v15 = vsel %vm2223_vm3, %v8102_v12, %v14104_v7  ;;  %12789 = vmatpush3.bf16.msra.mxu0 %v14421_v49  ;;  %v7439_v49 = vld [vmem:[%s17289_s11 + $0x10] sm:$0xff]  ;;  %v7441_v7 = vld [vmem:[%s17289_s11 + $0x20] sm:$0xff] }
0x1550   : > { %v8107_v16 = vsel %vm652_vm0, %v8105_v13, %v14110_v9  ;;  %v8106_v1 = vsel %vm652_vm0, %v8104_v15, %v14109_v10  ;;  %12810 = vmatprep.subr.bf16.mxu0 %v14628_v34  ;;  %v7442_v13 = vld [vmem:[%s17289_s11 + $0x28] sm:$0xff] }
0x1551   : > { %v8117_v17 = vpack.c.bf16 %v8107_v16, %v8106_v1 }
0x1552   : > { %12791 = vmatmul.mubr.msk.bf16.vlgmr.msra.gmra.mrb[100].mxu0 %vm766_vm1, %v7861_v3 }
0x1553   : > { %12811 = vmatpush3.bf16.msra.mxu0 %v14422_v60  ;;  %12818 = vmatprep.mubr.msk.bf16.mxu0 %vm14629_vm7, %v14628_v34  ;;  %v7443_v60 = vld [vmem:[%s17289_s11 + $0x30] sm:$0xff] }
0x1554   : > { %12812 = vmatprep.subr.bf16.mxu0 %v14628_v34 }
0x1557   : > { %12813 = vmatpush3.bf16.msra.mxu0 %v14423_v59 }
0x1558   : > { %12814 = vmatprep.subr.bf16.mxu0 %v14628_v34 }
0x155b   : > { %12815 = vmatpush3.bf16.msra.mxu0 %v14424_v61  ;;  %v11183_v61 = vld [vmem:[%s17289_s11 + $0x80] sm:$0xff] }
0x155c   : > { %12816 = vmatprep.subr.bf16.mxu0 %v14628_v34 }
0x155f   : > { %12817 = vmatpush3.bf16.msra.mxu0 %v14425_v40  ;;  %v11184_v40 = vld [vmem:[%s17289_s11 + $0x88] sm:$0xff] }
0x1562   : > { %12819 = vmatmul.mubr.msk.bf16.vlgmr.msra.gmra.mrb[104].mxu0 %vm766_vm1, %v8117_v17  ;;  %v7444_v17 = vld [vmem:[%s17289_s11 + $0x38] sm:$0xff] }
0x1615   : > { %v7544_v34 = vpop.f32.mrb[96].mxu0 }
0x1616   : > { %v7551_v45 = vmul.f32 %v16082_v43, %v7544_v34  ;;  %v12748_v18 = vpop.f32.mrb[97].mxu0  ;;  %v11188_v34 = vld [vmem:[%s17289_s11 + $0xa8] sm:$0xff] }
0x1617   : > { %v7547_v22 = vpop.f32.mrb[98].mxu0  ;;  %v11190_v18 = vld [vmem:[%s17289_s11 + $0xb8] sm:$0xff] }
0x1618   : > { %v7553_v24 = vadd.f32 %v16087_v58, %v7551_v45  ;;  %v7552_v25 = vmul.f32 %v16082_v43, %v7547_v22  ;;  %v12749_v23 = vpop.f32.mrb[99].mxu0  ;;  %v11189_v45 = vld [vmem:[%s17289_s11 + $0xb0] sm:$0xff]  ;;  %v11212_v22 = vld [vmem:[%s17289_s11 + $0xc0] sm:$0xff] }
0x1619   : > { %v11215_v23 = vld [vmem:[%s17289_s11 + $0xd8] sm:$0xff] }
0x161a   : > { %v7554_v5 = vadd.f32 %v16087_v58, %v7552_v25  ;;  %v7414_v48 = vpop.f32.mrb[76].mxu1  ;;  %v7555_v30 = vmax.f32 %v7553_v24, 0.0  ;;  %v11213_v24 = vld [vmem:[%s17289_s11 + $0xc8] sm:$0xff]  ;;  %v11214_v25 = vld [vmem:[%s17289_s11 + $0xd0] sm:$0xff] }
0x161b   : > { %v7426_v0 = vmul.f32 %v16082_v43, %v7414_v48  ;;  %v12736_v29 = vpop.f32.mrb[77].mxu1  ;;  %v11217_v48 = vld [vmem:[%s17289_s11 + $0xe8] sm:$0xff] }
0x161c   : > { %v7556_v21 = vmax.f32 %v7554_v5, 0.0  ;;  %v7417_v51 = vpop.f32.mrb[78].mxu1  ;;  %v11216_v5 = vld [vmem:[%s17289_s11 + $0xe0] sm:$0xff]  ;;  %v11219_v29 = vld [vmem:[%s17289_s11 + $0xf8] sm:$0xff] }
0x161d   : > { %v7433_v52 = vadd.f32 %v16087_v58, %v7426_v0  ;;  %v7427_v53 = vmul.f32 %v16082_v43, %v7417_v51  ;;  %v12737_v14 = vpop.f32.mrb[79].mxu1  ;;  %v11218_v0 = vld [vmem:[%s17289_s11 + $0xf0] sm:$0xff] }
0x161e   : > { %v13600_v54 = vpack.c.bf16 %v7556_v21, %v7555_v30  ;;  %v8338_v30 = vld [vmem:[%s17290_s12] sm:$0xff] }
0x161f   : > { %v7434_v19 = vadd.f32 %v16087_v58, %v7427_v53  ;;  %v7435_v47 = vmax.f32 %v7433_v52, 0.0  ;;  %v11252_v21 = vld [vmem:[%s17290_s12 + $0x80] sm:$0xff]  ;;  %12854 = vmatprep.mubr.msk.f32.mxu0 %vm766_vm1, %v8338_v30  ;;  %v11302_v30 = vld [vmem:[%s17290_s12 + $0x150] sm:$0xff] }
0x1620   : > { %13601 = vmatprep.subr.bf16.mxu1 %v13600_v54 }
0x1621   : > { %v7436_v27 = vmax.f32 %v7434_v19, 0.0  ;;  %13603 = vmatpush3.bf16.msra.mxu1 %v13600_v54 }
0x1623   : > { %v13604_v26 = vpack.c.bf16 %v7436_v27, %v7435_v47 }
0x1624   : > { %12755 = vmatmul.mubr.msk.f32.vlgmr.msra.gmra.mrb[80].mxu1 %vm2220_vm2, %v11147_v8 }
0x1625   : > { %v7923_v31 = vpop.f32.mrb[100].mxu0  ;;  %13605 = vmatprep.subr.bf16.mxu1 %v13604_v26  ;;  %12757 = vmatprep.mubr.msk.f32.mxu1 %vm2220_vm2, %v11148_v28 }
0x1626   : > { %v7930_v33 = vmul.f32 %v16082_v43, %v7923_v31  ;;  %v12792_v35 = vpop.f32.mrb[101].mxu0  ;;  %13607 = vmatpush3.bf16.msra.mxu1 %v13604_v26 }
0x1627   : > { %v7926_v37 = vpop.f32.mrb[102].mxu0  ;;  %v8340_v35 = vld [vmem:[%s17290_s12 + $0x10] sm:$0xff] }
0x1628   : > { %v7932_v38 = vadd.f32 %v16087_v58, %v7930_v33  ;;  %v7931_v39 = vmul.f32 %v16082_v43, %v7926_v37  ;;  %v12793_v20 = vpop.f32.mrb[103].mxu0  ;;  %12758 = vmatmul.mubr.msk.f32.gmra.mrb[82].mxu1 %vm2220_vm2, %v11149_v32  ;;  %v8339_v32 = vld [vmem:[%s17290_s12 + $0x8] sm:$0xff]  ;;  %v8341_v37 = vld [vmem:[%s17290_s12 + $0x18] sm:$0xff] }
0x1629   : > { %12760 = vmatprep.mubr.msk.f32.mxu1 %vm2220_vm2, %v11150_v36  ;;  %v11253_v33 = vld [vmem:[%s17290_s12 + $0x88] sm:$0xff]  ;;  %v11254_v36 = vld [vmem:[%s17290_s12 + $0x90] sm:$0xff]  ;;  %v11256_v20 = vld [vmem:[%s17290_s12 + $0xa0] sm:$0xff] }
0x162a   : > { %v7933_v41 = vadd.f32 %v16087_v58, %v7931_v39  ;;  %v7934_v57 = vmax.f32 %v7932_v38, 0.0  ;;  %v11255_v38 = vld [vmem:[%s17290_s12 + $0x98] sm:$0xff]  ;;  %v8342_v39 = vld [vmem:[%s17290_s12 + $0x20] sm:$0xff] }
0x162c   : > { %v7935_v44 = vmax.f32 %v7933_v41, 0.0  ;;  %12761 = vmatmul.mubr.msk.f32.gmra.mrb[84].mxu1 %vm2220_vm2, %v11151_v46  ;;  %v8343_v46 = vld [vmem:[%s17290_s12 + $0x28] sm:$0xff] }
0x162d   : > { %12763 = vmatprep.mubr.msk.f32.mxu1 %vm2220_vm2, %v11152_v55  ;;  %v11257_v41 = vld [vmem:[%s17290_s12 + $0xa8] sm:$0xff]  ;;  %v8344_v55 = vld [vmem:[%s17290_s12 + $0x30] sm:$0xff] }
0x162e   : > { %v13608_v63 = vpack.c.bf16 %v7935_v44, %v7934_v57  ;;  %v11258_v57 = vld [vmem:[%s17290_s12 + $0xb0] sm:$0xff]  ;;  %v8345_v44 = vld [vmem:[%s17290_s12 + $0x38] sm:$0xff] }
0x1630   : > { %13609 = vmatprep.subr.bf16.mxu1 %v13608_v63  ;;  %12764 = vmatmul.mubr.msk.f32.gmra.mrb[86].mxu1 %vm2220_vm2, %v11153_v62  ;;  %v11259_v62 = vld [vmem:[%s17290_s12 + $0xb8] sm:$0xff] }
0x1631   : > { %12770 = vmatprep.mubr.msk.f32.mxu1 %vm2220_vm2, %v7437_v56  ;;  %v11284_v56 = vld [vmem:[%s17290_s12 + $0x100] sm:$0xff] }
0x1634   : > { %12771 = vmatmul.mubr.msk.f32.vlgmr.msra.gmra.mrb[80].mxu1 %vm2220_vm2, %v7438_v2  ;;  %v11237_v2 = vld [vmem:[%s17290_s12 + $0x48] sm:$0xff] }
0x1635   : > { %13611 = vmatpush3.bf16.msra.mxu1 %v13608_v63  ;;  %v8179_v3 = vpop.f32.mrb[104].mxu0  ;;  %12773 = vmatprep.mubr.msk.f32.mxu1 %vm2220_vm2, %v7439_v49  ;;  %v11236_v63 = vld [vmem:[%s17290_s12 + $0x40] sm:$0xff]  ;;  %v11285_v49 = vld [vmem:[%s17290_s12 + $0x108] sm:$0xff] }
0x1636   : > { %v8186_v4 = vmul.f32 %v16082_v43, %v8179_v3  ;;  %v12820_v6 = vpop.f32.mrb[105].mxu0  ;;  %v11238_v3 = vld [vmem:[%s17290_s12 + $0x50] sm:$0xff] }
0x1637   : > { %v8182_v9 = vpop.f32.mrb[106].mxu0  ;;  %v11287_v6 = vld [vmem:[%s17290_s12 + $0x118] sm:$0xff] }
0x1638   : > { %v8188_v10 = vadd.f32 %v16087_v58, %v8186_v4  ;;  %v8187_v11 = vmul.f32 %v16082_v43, %v8182_v9  ;;  %v12821_v12 = vpop.f32.mrb[107].mxu0  ;;  %12774 = vmatmul.mubr.msk.f32.gmra.mrb[82].mxu1 %vm2220_vm2, %v7440_v50  ;;  %v11186_v43 = vld [vmem:[%s17289_s11 + $0x98] sm:$0xff]  ;;  %v11286_v50 = vld [vmem:[%s17290_s12 + $0x110] sm:$0xff]  ;;  %v11288_v9 = vld [vmem:[%s17290_s12 + $0x120] sm:$0xff] }
0x1639   : > { %12776 = vmatprep.mubr.msk.f32.mxu1 %vm2220_vm2, %v7441_v7  ;;  %v11239_v4 = vld [vmem:[%s17290_s12 + $0x58] sm:$0xff]  ;;  %v11240_v7 = vld [vmem:[%s17290_s12 + $0x60] sm:$0xff]  ;;  %v11242_v12 = vld [vmem:[%s17290_s12 + $0x70] sm:$0xff] }
0x163a   : > { %v8189_v15 = vadd.f32 %v16087_v58, %v8187_v11  ;;  %v8190_v16 = vmax.f32 %v8188_v10, 0.0  ;;  %v11187_v58 = vld [vmem:[%s17289_s11 + $0xa0] sm:$0xff]  ;;  %v11241_v10 = vld [vmem:[%s17290_s12 + $0x68] sm:$0xff] }
0x163b   : > { %v11289_v11 = vld [vmem:[%s17290_s12 + $0x128] sm:$0xff] }
0x163c   : > { %v8191_v1 = vmax.f32 %v8189_v15, 0.0  ;;  %12777 = vmatmul.mubr.msk.f32.gmra.mrb[84].mxu1 %vm2220_vm2, %v7442_v13  ;;  %v11290_v13 = vld [vmem:[%s17290_s12 + $0x130] sm:$0xff]  ;;  %v11243_v15 = vld [vmem:[%s17290_s12 + $0x78] sm:$0xff] }
0x163d   : > { %12779 = vmatprep.mubr.msk.f32.mxu1 %vm2220_vm2, %v7443_v60  ;;  %v11291_v60 = vld [vmem:[%s17290_s12 + $0x138] sm:$0xff] }
0x163e   : > { %v13612_v59 = vpack.c.bf16 %v8191_v1, %v8190_v16  ;;  %v11268_v16 = vld [vmem:[%s17290_s12 + $0xc0] sm:$0xff] }
0x163f   : > { %v11316_v1 = vld [vmem:[%s17290_s12 + $0x180] sm:$0xff] }
0x1640   : > { %13613 = vmatprep.subr.bf16.mxu1 %v13612_v59  ;;  %12780 = vmatmul.mubr.msk.f32.gmra.mrb[86].mxu1 %vm2220_vm2, %v7444_v17  ;;  %v11269_v17 = vld [vmem:[%s17290_s12 + $0xc8] sm:$0xff] }
0x1641   : > { %12798 = vmatprep.mubr.msk.f32.mxu1 %vm2220_vm2, %v11183_v61  ;;  %v11270_v61 = vld [vmem:[%s17290_s12 + $0xd0] sm:$0xff] }
0x1644   : > { %12799 = vmatmul.mubr.msk.f32.vlgmr.msra.gmra.mrb[80].mxu1 %vm2220_vm2, %v11184_v40  ;;  %v11318_v40 = vld [vmem:[%s17290_s12 + $0x190] sm:$0xff] }
0x1645   : > { %13615 = vmatpush3.bf16.msra.mxu1 %v13612_v59  ;;  %12801 = vmatprep.mubr.msk.f32.mxu1 %vm2220_vm2, %v11185_v42  ;;  %v11317_v59 = vld [vmem:[%s17290_s12 + $0x188] sm:$0xff]  ;;  %v11271_v42 = vld [vmem:[%s17290_s12 + $0xd8] sm:$0xff] }
0x1648   : > { %12802 = vmatmul.mubr.msk.f32.gmra.mrb[82].mxu1 %vm2220_vm2, %v11186_v43  ;;  %v11319_v43 = vld [vmem:[%s17290_s12 + $0x198] sm:$0xff] }
0x1649   : > { %12804 = vmatprep.mubr.msk.f32.mxu1 %vm2220_vm2, %v11187_v58  ;;  %v11272_v58 = vld [vmem:[%s17290_s12 + $0xe0] sm:$0xff] }
0x164c   : > { %12805 = vmatmul.mubr.msk.f32.gmra.mrb[84].mxu1 %vm2220_vm2, %v11188_v34  ;;  %v11320_v34 = vld [vmem:[%s17290_s12 + $0x1a0] sm:$0xff] }
0x164d   : > { %12807 = vmatprep.mubr.msk.f32.mxu1 %vm2220_vm2, %v11189_v45  ;;  %v11273_v45 = vld [vmem:[%s17290_s12 + $0xe8] sm:$0xff] }
0x1650   : > { %12808 = vmatmul.mubr.msk.f32.gmra.mrb[86].mxu1 %vm2220_vm2, %v11190_v18  ;;  %v11321_v18 = vld [vmem:[%s17290_s12 + $0x1a8] sm:$0xff] }
0x1651   : > { %12826 = vmatprep.mubr.msk.f32.mxu1 %vm2220_vm2, %v11212_v22  ;;  %v11274_v22 = vld [vmem:[%s17290_s12 + $0xf0] sm:$0xff] }
0x1654   : > { %12827 = vmatmul.mubr.msk.f32.vlgmr.msra.gmra.mrb[80].mxu1 %vm2220_vm2, %v11213_v24  ;;  %v11322_v24 = vld [vmem:[%s17290_s12 + $0x1b0] sm:$0xff] }
0x1655   : > { %12829 = vmatprep.mubr.msk.f32.mxu1 %vm2220_vm2, %v11214_v25  ;;  %v11275_v25 = vld [vmem:[%s17290_s12 + $0xf8] sm:$0xff] }
0x1658   : > { %12830 = vmatmul.mubr.msk.f32.gmra.mrb[82].mxu1 %vm2220_vm2, %v11215_v23  ;;  %v11323_v23 = vld [vmem:[%s17290_s12 + $0x1b8] sm:$0xff] }
0x1659   : > { %12832 = vmatprep.mubr.msk.f32.mxu1 %vm2220_vm2, %v11216_v5  ;;  %v11300_v5 = vld [vmem:[%s17290_s12 + $0x140] sm:$0xff] }
0x165c   : > { %12833 = vmatmul.mubr.msk.f32.gmra.mrb[84].mxu1 %vm2220_vm2, %v11217_v48  ;;  %v11348_v48 = vld [vmem:[%s17290_s12 + $0x200] sm:$0xff] }
0x165d   : > { %12835 = vmatprep.mubr.msk.f32.mxu1 %vm2220_vm2, %v11218_v0  ;;  %v11301_v0 = vld [vmem:[%s17290_s12 + $0x148] sm:$0xff] }
0x1660   : > { %12836 = vmatmul.mubr.msk.f32.gmra.mrb[86].mxu1 %vm2220_vm2, %v11219_v29  ;;  %v11349_v29 = vld [vmem:[%s17290_s12 + $0x208] sm:$0xff] }
0x1661   : > { %12910 = vmatprep.mubr.msk.f32.mxu1 %vm766_vm1, %v11252_v21  ;;  %v11350_v21 = vld [vmem:[%s17290_s12 + $0x210] sm:$0xff] }
0x1727   : > { %v12828_v51 = vpop.f32.mrb[80].mxu1 }
0x1728   : > { %v8291_v52 = vpop.f32.mrb[81].mxu1 }
0x1729   : > { %v16237_v53 = vpack.c.bf16 %v12828_v51, %v8291_v52  ;;  %v11303_v51 = vld [vmem:[%s17290_s12 + $0x158] sm:$0xff] }
0x172a   : > { %v11351_v52 = vld [vmem:[%s17290_s12 + $0x218] sm:$0xff] }
0x172b   : > { %v12831_v14 = vpop.f32.mrb[82].mxu1  ;;  %13617 = vmatprep.subr.bf16.mxu0 %v16237_v53  ;;  %13649 = vmatprep.subr.bf16.mxu1 %v16237_v53 }
0x172c   : > { %v8301_v54 = vpop.f32.mrb[83].mxu1  ;;  %13619 = vmatpush3.bf16.msra.mxu0 %v16237_v53  ;;  %13651 = vmatpush3.bf16.msra.mxu1 %v16237_v53 }
0x172d   : > { %v16243_v19 = vpack.c.bf16 %v12831_v14, %v8301_v54  ;;  %v11304_v14 = vld [vmem:[%s17290_s12 + $0x160] sm:$0xff]  ;;  %v11305_v54 = vld [vmem:[%s17290_s12 + $0x168] sm:$0xff] }
0x172f   : > { %v12834_v47 = vpop.f32.mrb[84].mxu1  ;;  %13621 = vmatprep.subr.bf16.mxu0 %v16243_v19  ;;  %13653 = vmatprep.subr.bf16.mxu1 %v16243_v19 }
0x1730   : > { %v8311_v27 = vpop.f32.mrb[85].mxu1  ;;  %13623 = vmatpush3.bf16.msra.mxu0 %v16243_v19  ;;  %13655 = vmatpush3.bf16.msra.mxu1 %v16243_v19 }
0x1731   : > { %v16249_v8 = vpack.c.bf16 %v12834_v47, %v8311_v27  ;;  %v11353_v47 = vld [vmem:[%s17290_s12 + $0x228] sm:$0xff]  ;;  %v11306_v27 = vld [vmem:[%s17290_s12 + $0x170] sm:$0xff] }
0x1733   : > { %v12837_v28 = vpop.f32.mrb[86].mxu1  ;;  %13625 = vmatprep.subr.bf16.mxu0 %v16249_v8  ;;  %13657 = vmatprep.subr.bf16.mxu1 %v16249_v8 }
0x1734   : > { %v8321_v26 = vpop.f32.mrb[87].mxu1  ;;  %13627 = vmatpush3.bf16.msra.mxu0 %v16249_v8  ;;  %13659 = vmatpush3.bf16.msra.mxu1 %v16249_v8 }
0x1735   : > { %v16255_v31 = vpack.c.bf16 %v12837_v28, %v8321_v26  ;;  %v11307_v28 = vld [vmem:[%s17290_s12 + $0x178] sm:$0xff] }
0x1736   : > { %v11355_v26 = vld [vmem:[%s17290_s12 + $0x238] sm:$0xff] }
0x1737   : > { %13629 = vmatprep.subr.bf16.mxu0 %v16255_v31  ;;  %13661 = vmatprep.subr.bf16.mxu1 %v16255_v31 }
0x1738   : > { %13631 = vmatpush3.bf16.msra.mxu0 %v16255_v31  ;;  %13663 = vmatpush3.bf16.msra.mxu1 %v16255_v31 }
0x1739   : > { %13633 = vmatprep.subr.bf16.mxu0 %v16237_v53  ;;  %13681 = vmatprep.subr.bf16.mxu1 %v16237_v53 }
0x173b   : > { %12855 = vmatmul.mubr.msk.f32.vlgmr.msra.gmra.mrb[94].mxu0 %vm766_vm1, %v8339_v32  ;;  %12911 = vmatmul.mubr.msk.f32.vlgmr.msra.gmra.mrb[88].mxu1 %vm766_vm1, %v11253_v33  ;;  %v11332_v32 = vld [vmem:[%s17290_s12 + $0x1c0] sm:$0xff]  ;;  %v11334_v33 = vld [vmem:[%s17290_s12 + $0x1d0] sm:$0xff] }
0x173c   : > { %13635 = vmatpush3.bf16.msra.mxu0 %v16237_v53  ;;  %13683 = vmatpush3.bf16.msra.mxu1 %v16237_v53 }
0x173d   : > { %13637 = vmatprep.subr.bf16.mxu0 %v16243_v19  ;;  %13685 = vmatprep.subr.bf16.mxu1 %v16243_v19 }
0x173e   : > { %12857 = vmatprep.mubr.msk.f32.mxu0 %vm766_vm1, %v8340_v35  ;;  %12913 = vmatprep.mubr.msk.f32.mxu1 %vm766_vm1, %v11254_v36  ;;  %v11335_v35 = vld [vmem:[%s17290_s12 + $0x1d8] sm:$0xff]  ;;  %v11337_v36 = vld [vmem:[%s17290_s12 + $0x1e8] sm:$0xff] }
0x173f   : > { %12858 = vmatmul.mubr.msk.f32.gmra.mrb[108].mxu0 %vm766_vm1, %v8341_v37  ;;  %12914 = vmatmul.mubr.msk.f32.gmra.mrb[90].mxu1 %vm766_vm1, %v11255_v38  ;;  %v11338_v37 = vld [vmem:[%s17290_s12 + $0x1f0] sm:$0xff]  ;;  %v11339_v38 = vld [vmem:[%s17290_s12 + $0x1f8] sm:$0xff] }
0x1740   : > { %13639 = vmatpush3.bf16.msra.mxu0 %v16243_v19  ;;  %13687 = vmatpush3.bf16.msra.mxu1 %v16243_v19 }
0x1741   : > { %13641 = vmatprep.subr.bf16.mxu0 %v16249_v8  ;;  %13689 = vmatprep.subr.bf16.mxu1 %v16249_v8 }
0x1742   : > { %12860 = vmatprep.mubr.msk.f32.mxu0 %vm766_vm1, %v8342_v39  ;;  %12916 = vmatprep.mubr.msk.f32.mxu1 %vm766_vm1, %v11256_v20 }
0x1743   : > { %12861 = vmatmul.mubr.msk.f32.gmra.mrb[110].mxu0 %vm766_vm1, %v8343_v46  ;;  %12917 = vmatmul.mubr.msk.f32.gmra.mrb[92].mxu1 %vm766_vm1, %v11257_v41 }
0x1744   : > { %13643 = vmatpush3.bf16.msra.mxu0 %v16249_v8  ;;  %13691 = vmatpush3.bf16.msra.mxu1 %v16249_v8 }
0x1745   : > { %13645 = vmatprep.subr.bf16.mxu0 %v16255_v31  ;;  %13693 = vmatprep.subr.bf16.mxu1 %v16255_v31 }
0x1746   : > { %12863 = vmatprep.mubr.msk.f32.mxu0 %vm766_vm1, %v8344_v55  ;;  %12919 = vmatprep.mubr.msk.f32.mxu1 %vm766_vm1, %v11258_v57 }
0x1747   : > { %12864 = vmatmul.mubr.msk.f32.gmra.mrb[112].mxu0 %vm766_vm1, %v8345_v44  ;;  %12920 = vmatmul.mubr.msk.f32.gmra.mrb[94].mxu1 %vm766_vm1, %v11259_v62 }
0x1748   : > { %13647 = vmatpush3.bf16.msra.mxu0 %v16255_v31  ;;  %13695 = vmatpush3.bf16.msra.mxu1 %v16255_v31 }
0x1749   : > { %13665 = vmatprep.subr.bf16.mxu0 %v16237_v53  ;;  %13713 = vmatprep.subr.bf16.mxu1 %v16237_v53 }
0x174a   : > { %12882 = vmatprep.mubr.msk.f32.mxu0 %vm766_vm1, %v11236_v63  ;;  %12966 = vmatprep.mubr.msk.f32.mxu1 %vm766_vm1, %v11284_v56 }
0x174b   : > { %12883 = vmatmul.mubr.msk.f32.vlgmr.msra.gmra.mrb[114].mxu0 %vm766_vm1, %v11237_v2  ;;  %12967 = vmatmul.mubr.msk.f32.vlgmr.msra.gmra.mrb[96].mxu1 %vm766_vm1, %v11285_v49 }
0x174c   : > { %13667 = vmatpush3.bf16.msra.mxu0 %v16237_v53  ;;  %13715 = vmatpush3.bf16.msra.mxu1 %v16237_v53 }
0x174d   : > { %13669 = vmatprep.subr.bf16.mxu0 %v16243_v19  ;;  %13717 = vmatprep.subr.bf16.mxu1 %v16243_v19 }
0x174e   : > { %12885 = vmatprep.mubr.msk.f32.mxu0 %vm766_vm1, %v11238_v3  ;;  %12969 = vmatprep.mubr.msk.f32.mxu1 %vm766_vm1, %v11286_v50 }
0x174f   : > { %12886 = vmatmul.mubr.msk.f32.gmra.mrb[116].mxu0 %vm766_vm1, %v11239_v4  ;;  %12970 = vmatmul.mubr.msk.f32.gmra.mrb[98].mxu1 %vm766_vm1, %v11287_v6 }
0x1750   : > { %13671 = vmatpush3.bf16.msra.mxu0 %v16243_v19  ;;  %13719 = vmatpush3.bf16.msra.mxu1 %v16243_v19 }
0x1751   : > { %13673 = vmatprep.subr.bf16.mxu0 %v16249_v8  ;;  %13721 = vmatprep.subr.bf16.mxu1 %v16249_v8 }
0x1752   : > { %12888 = vmatprep.mubr.msk.f32.mxu0 %vm766_vm1, %v11240_v7  ;;  %12972 = vmatprep.mubr.msk.f32.mxu1 %vm766_vm1, %v11288_v9 }
0x1753   : > { %12889 = vmatmul.mubr.msk.f32.gmra.mrb[118].mxu0 %vm766_vm1, %v11241_v10  ;;  %12973 = vmatmul.mubr.msk.f32.gmra.mrb[100].mxu1 %vm766_vm1, %v11289_v11 }
0x1754   : > { %13675 = vmatpush3.bf16.msra.mxu0 %v16249_v8  ;;  %13723 = vmatpush3.bf16.msra.mxu1 %v16249_v8 }
0x1755   : > { %13677 = vmatprep.subr.bf16.mxu0 %v16255_v31  ;;  %13725 = vmatprep.subr.bf16.mxu1 %v16255_v31 }
0x1756   : > { %12891 = vmatprep.mubr.msk.f32.mxu0 %vm766_vm1, %v11242_v12  ;;  %12975 = vmatprep.mubr.msk.f32.mxu1 %vm766_vm1, %v11290_v13 }
0x1757   : > { %12892 = vmatmul.mubr.msk.f32.gmra.mrb[120].mxu0 %vm766_vm1, %v11243_v15  ;;  %12976 = vmatmul.mubr.msk.f32.gmra.mrb[102].mxu1 %vm766_vm1, %v11291_v60 }
0x1758   : > { %13679 = vmatpush3.bf16.msra.mxu0 %v16255_v31  ;;  %13727 = vmatpush3.bf16.msra.mxu1 %v16255_v31 }
0x1759   : > { %13697 = vmatprep.subr.bf16.mxu0 %v16237_v53  ;;  %13745 = vmatprep.subr.bf16.mxu1 %v16237_v53 }
0x175a   : > { %12938 = vmatprep.mubr.msk.f32.mxu0 %vm766_vm1, %v11268_v16  ;;  %13022 = vmatprep.mubr.msk.f32.mxu1 %vm766_vm1, %v11316_v1 }
0x175b   : > { %12939 = vmatmul.mubr.msk.f32.vlgmr.msra.gmra.mrb[122].mxu0 %vm766_vm1, %v11269_v17  ;;  %13023 = vmatmul.mubr.msk.f32.vlgmr.msra.gmra.mrb[104].mxu1 %vm766_vm1, %v11317_v59 }
0x175c   : > { %13699 = vmatpush3.bf16.msra.mxu0 %v16237_v53  ;;  %13747 = vmatpush3.bf16.msra.mxu1 %v16237_v53 }
0x175d   : > { %13701 = vmatprep.subr.bf16.mxu0 %v16243_v19  ;;  %13749 = vmatprep.subr.bf16.mxu1 %v16243_v19 }
0x175e   : > { %12941 = vmatprep.mubr.msk.f32.mxu0 %vm766_vm1, %v11270_v61  ;;  %13025 = vmatprep.mubr.msk.f32.mxu1 %vm766_vm1, %v11318_v40 }
0x175f   : > { %12942 = vmatmul.mubr.msk.f32.gmra.mrb[124].mxu0 %vm766_vm1, %v11271_v42  ;;  %13026 = vmatmul.mubr.msk.f32.gmra.mrb[106].mxu1 %vm766_vm1, %v11319_v43 }
0x1760   : > { %13703 = vmatpush3.bf16.msra.mxu0 %v16243_v19  ;;  %13751 = vmatpush3.bf16.msra.mxu1 %v16243_v19 }
0x1761   : > { %13705 = vmatprep.subr.bf16.mxu0 %v16249_v8  ;;  %13753 = vmatprep.subr.bf16.mxu1 %v16249_v8 }
0x1762   : > { %12944 = vmatprep.mubr.msk.f32.mxu0 %vm766_vm1, %v11272_v58  ;;  %13028 = vmatprep.mubr.msk.f32.mxu1 %vm766_vm1, %v11320_v34 }
0x1763   : > { %12945 = vmatmul.mubr.msk.f32.gmra.mrb[126].mxu0 %vm766_vm1, %v11273_v45  ;;  %13029 = vmatmul.mubr.msk.f32.gmra.mrb[108].mxu1 %vm766_vm1, %v11321_v18 }
0x1764   : > { %13707 = vmatpush3.bf16.msra.mxu0 %v16249_v8  ;;  %13755 = vmatpush3.bf16.msra.mxu1 %v16249_v8 }
0x1765   : > { %13709 = vmatprep.subr.bf16.mxu0 %v16255_v31  ;;  %13757 = vmatprep.subr.bf16.mxu1 %v16255_v31 }
0x1766   : > { %12947 = vmatprep.mubr.msk.f32.mxu0 %vm766_vm1, %v11274_v22  ;;  %13031 = vmatprep.mubr.msk.f32.mxu1 %vm766_vm1, %v11322_v24 }
0x1767   : > { %12948 = vmatmul.mubr.msk.f32.gmra.mrb[128].mxu0 %vm766_vm1, %v11275_v25  ;;  %13032 = vmatmul.mubr.msk.f32.gmra.mrb[110].mxu1 %vm766_vm1, %v11323_v23 }
0x1768   : > { %13711 = vmatpush3.bf16.msra.mxu0 %v16255_v31  ;;  %13759 = vmatpush3.bf16.msra.mxu1 %v16255_v31 }
0x1769   : > { %13729 = vmatprep.subr.bf16.mxu0 %v16237_v53  ;;  %12994 = vmatprep.mubr.msk.f32.mxu0 %vm766_vm1, %v11300_v5 }
0x176a   : > { %13078 = vmatprep.mubr.msk.f32.mxu1 %vm766_vm1, %v11348_v48 }
0x176b   : > { %12995 = vmatmul.mubr.msk.f32.vlgmr.msra.gmra.mrb[130].mxu0 %vm766_vm1, %v11301_v0  ;;  %13079 = vmatmul.mubr.msk.f32.vlgmr.msra.gmra.mrb[112].mxu1 %vm766_vm1, %v11349_v29 }
0x176c   : > { %13731 = vmatpush3.bf16.msra.mxu0 %v16237_v53  ;;  %12997 = vmatprep.mubr.msk.f32.mxu0 %vm766_vm1, %v11302_v30  ;;  %v11352_v53 = vld [vmem:[%s17290_s12 + $0x220] sm:$0xff] }
0x176d   : > { %13733 = vmatprep.subr.bf16.mxu0 %v16243_v19  ;;  %13081 = vmatprep.mubr.msk.f32.mxu1 %vm766_vm1, %v11350_v21 }
0x176f   : > { %12998 = vmatmul.mubr.msk.f32.gmra.mrb[132].mxu0 %vm766_vm1, %v11303_v51  ;;  %13082 = vmatmul.mubr.msk.f32.gmra.mrb[114].mxu1 %vm766_vm1, %v11351_v52 }
0x1770   : > { %13735 = vmatpush3.bf16.msra.mxu0 %v16243_v19  ;;  %13000 = vmatprep.mubr.msk.f32.mxu0 %vm766_vm1, %v11304_v14  ;;  %v11354_v19 = vld [vmem:[%s17290_s12 + $0x230] sm:$0xff] }
0x1771   : > { %13737 = vmatprep.subr.bf16.mxu0 %v16249_v8  ;;  %13084 = vmatprep.mubr.msk.f32.mxu1 %vm766_vm1, %v11352_v53 }
0x1773   : > { %13001 = vmatmul.mubr.msk.f32.gmra.mrb[134].mxu0 %vm766_vm1, %v11305_v54  ;;  %13085 = vmatmul.mubr.msk.f32.gmra.mrb[116].mxu1 %vm766_vm1, %v11353_v47 }
0x1774   : > { %13739 = vmatpush3.bf16.msra.mxu0 %v16249_v8  ;;  %13003 = vmatprep.mubr.msk.f32.mxu0 %vm766_vm1, %v11306_v27  ;;  %v11333_v8 = vld [vmem:[%s17290_s12 + $0x1c8] sm:$0xff] }
0x1775   : > { %13741 = vmatprep.subr.bf16.mxu0 %v16255_v31  ;;  %13087 = vmatprep.mubr.msk.f32.mxu1 %vm766_vm1, %v11354_v19 }
0x1777   : > { %13004 = vmatmul.mubr.msk.f32.gmra.mrb[136].mxu0 %vm766_vm1, %v11307_v28  ;;  %13088 = vmatmul.mubr.msk.f32.gmra.mrb[118].mxu1 %vm766_vm1, %v11355_v26 }
0x1778   : > { %13743 = vmatpush3.bf16.msra.mxu0 %v16255_v31  ;;  %13050 = vmatprep.mubr.msk.f32.mxu0 %vm766_vm1, %v11332_v32  ;;  %v11336_v31 = vld [vmem:[%s17290_s12 + $0x1e0] sm:$0xff] }
0x1779   : > { %v14426_v32 = vld [vmem:[%s17284_s6 + $0x20] sm:$0xff]  }
0x177a   : > { %13106 = vmatprep.subr.bf16.mxu1 %v14426_v32 }
0x177b   : > { %13051 = vmatmul.mubr.msk.f32.vlgmr.msra.gmra.mrb[138].mxu0 %vm766_vm1, %v11333_v8  ;;  %13107 = vmatpush3.bf16.msra.mxu1 %v14426_v32 }
0x177c   : > { %13053 = vmatprep.mubr.msk.f32.mxu0 %vm766_vm1, %v11334_v33 }
0x177f   : > { %13054 = vmatmul.mubr.msk.f32.gmra.mrb[140].mxu0 %vm766_vm1, %v11335_v35 }
0x1780   : > { %13056 = vmatprep.mubr.msk.f32.mxu0 %vm766_vm1, %v11336_v31 }
0x1783   : > { %13057 = vmatmul.mubr.msk.f32.gmra.mrb[142].mxu0 %vm766_vm1, %v11337_v36 }
0x1784   : > { %13059 = vmatprep.mubr.msk.f32.mxu0 %vm766_vm1, %v11338_v37 }
0x1787   : > { %13060 = vmatmul.mubr.msk.f32.gmra.mrb[144].mxu0 %vm766_vm1, %v11339_v38  ;;  %v14427_v38 = vld [vmem:[%s17284_s6 + $0x28] sm:$0xff]  }
0x1788   : > { %13108 = vmatprep.subr.bf16.mxu1 %v14427_v38 }
0x1789   : > { %13109 = vmatpush3.bf16.msra.mxu1 %v14427_v38 }
0x180e   : > { %v12912_v39 = vpop.f32.mrb[88].mxu1  ;;  %v16597_v20 = vpop.f32.mrb[94].mxu0 }
0x180f   : > { %v8712_v46 = vpop.f32.mrb[89].mxu1  ;;  %v16599_v41 = vpop.f32.mrb[95].mxu0 }
0x1810   : > { %v14111_v55 = vpack.i.bf16 %v12912_v39, %v8712_v46 }
0x1812   : > { %14112 = vrot.lane.b32.xlu1 %v14111_v55, %s17349_s26  ;;  %v12915_v57 = vpop.f32.mrb[90].mxu1  ;;  %v16602_v44 = vpop.f32.mrb[108].mxu0  ;;  %v14428_v55 = vld [vmem:[%s17284_s6] sm:$0xff]  }
0x1813   : > { %v8722_v62 = vpop.f32.mrb[91].mxu1  ;;  %v16604_v63 = vpop.f32.mrb[109].mxu0  ;;  %13090 = vmatprep.subr.bf16.mxu0 %v14428_v55 }
0x1814   : > { %v14116_v56 = vpack.i.bf16 %v12915_v57, %v8722_v62  ;;  %13091 = vmatpush3.bf16.msra.mxu0 %v14428_v55 }
0x1816   : > { %14117 = vrot.lane.b32.xlu0 %v14116_v56, %s17349_s26  ;;  %v12918_v2 = vpop.f32.mrb[92].mxu1  ;;  %v16607_v49 = vpop.f32.mrb[110].mxu0 }
0x1817   : > { %v8732_v3 = vpop.f32.mrb[93].mxu1  ;;  %v16609_v50 = vpop.f32.mrb[111].mxu0 }
0x1818   : > { %v14121_v4 = vpack.i.bf16 %v12918_v2, %v8732_v3  ;;  %v14429_v3 = vld [vmem:[%s17284_s6 + $0x30] sm:$0xff]  }
0x1819   : > { %13110 = vmatprep.subr.bf16.mxu1 %v14429_v3 }
0x181a   : > { %14122 = vrot.lane.b32.xlu1 %v14121_v4, %s17349_s26  ;;  %v12921_v6 = vpop.f32.mrb[94].mxu1  ;;  %v16612_v7 = vpop.f32.mrb[112].mxu0  ;;  %v14430_v4 = vld [vmem:[%s17284_s6 + $0x8] sm:$0xff]   ;;  %13111 = vmatpush3.bf16.msra.mxu1 %v14429_v3 }
0x181b   : > { %v8742_v9 = vpop.f32.mrb[95].mxu1  ;;  %v16614_v10 = vpop.f32.mrb[113].mxu0  ;;  %13092 = vmatprep.subr.bf16.mxu0 %v14430_v4 }
0x181c   : > { %v14126_v11 = vpack.i.bf16 %v12921_v6, %v8742_v9  ;;  %13093 = vmatpush3.bf16.msra.mxu0 %v14430_v4 }
0x181e   : > { %14127 = vrot.lane.b32.xlu0 %v14126_v11, %s17349_s26  ;;  %v16617_v12 = vpop.f32.mrb[114].mxu0  ;;  %v16619_v13 = vpop.f32.mrb[96].mxu1 }
0x181f   : > { %v16621_v15 = vpop.f32.mrb[115].mxu0  ;;  %v16623_v60 = vpop.f32.mrb[97].mxu1 }
0x1820   : > { %v14131_v16 = vpack.i.bf16 %v16617_v12, %v16621_v15  ;;  %v14136_v1 = vpack.i.bf16 %v16619_v13, %v16623_v60 }
0x1822   : > { %14137 = vrot.lane.b32.xlu1 %v14136_v1, %s17350_s1  ;;  %14132 = vrot.lane.b32.xlu0 %v14131_v16, %s17349_s26  ;;  %v16631_v17 = vpop.f32.mrb[98].mxu1  ;;  %v16633_v59 = vpop.f32.mrb[116].mxu0 }
0x1823   : > { %v16635_v61 = vpop.f32.mrb[99].mxu1  ;;  %v16637_v40 = vpop.f32.mrb[117].mxu0 }
0x1824   : > { %v14151_v42 = vpack.i.bf16 %v16633_v59, %v16637_v40  ;;  %v14156_v43 = vpack.i.bf16 %v16631_v17, %v16635_v61 }
0x1826   : > { %14142 = vrot.lane.b32.xlu1 %v14136_v1, %s17344_s22  ;;  %v16644_v58 = vpop.f32.mrb[100].mxu1  ;;  %14147 = vrot.lane.b32.xlu0 %v14136_v1, %s17349_s26  ;;  %v16647_v34 = vpop.f32.mrb[118].mxu0 }
0x1827   : > { %v16649_v45 = vpop.f32.mrb[101].mxu1  ;;  %v16651_v18 = vpop.f32.mrb[119].mxu0 }
0x1828   : > { %v14176_v22 = vpack.i.bf16 %v16644_v58, %v16649_v45  ;;  %v14171_v24 = vpack.i.bf16 %v16647_v34, %v16651_v18 }
0x182a   : > { %14177 = vrot.lane.b32.xlu1 %v14176_v22, %s17350_s1  ;;  %14152 = vrot.lane.b32.xlu0 %v14151_v42, %s17349_s26  ;;  %v16659_v25 = vpop.f32.mrb[120].mxu0  ;;  %v16661_v23 = vpop.f32.mrb[102].mxu1 }
0x182b   : > { %v16663_v5 = vpop.f32.mrb[121].mxu0  ;;  %v16665_v48 = vpop.f32.mrb[103].mxu1 }
0x182c   : > { %v14191_v0 = vpack.i.bf16 %v16659_v25, %v16663_v5  ;;  %v16671_v29 = vpack.i.bf16 %v16661_v23, %v16665_v48 }
0x182e   : > { %14182 = vrot.lane.b32.xlu1 %v14176_v22, %s17344_s22  ;;  %14157 = vrot.lane.b32.xlu0 %v14156_v43, %s17350_s1  ;;  %v16675_v30 = vpop.f32.mrb[122].mxu0  ;;  %v13024_v21 = vpop.f32.mrb[104].mxu1 }
0x182f   : > { %v16677_v51 = vpop.f32.mrb[123].mxu0  ;;  %v9264_v52 = vpop.f32.mrb[105].mxu1 }
0x1830   : > { %v14211_v14 = vpack.i.bf16 %v16675_v30, %v16677_v51  ;;  %v14216_v53 = vpack.i.bf16 %v13024_v21, %v9264_v52  ;;  %v14432_v21 = vld [vmem:[%s17284_s6 + $0x10] sm:$0xff]  }
0x1831   : > { %13094 = vmatprep.subr.bf16.mxu0 %v14432_v21 }
0x1832   : > { %14162 = vrot.lane.b32.xlu0 %v14156_v43, %s17344_s22  ;;  %14212 = vrot.lane.b32.xlu1 %v14211_v14, %s17350_s1  ;;  %v16683_v54 = vpop.f32.mrb[124].mxu0  ;;  %v16685_v47 = vpop.f32.mrb[106].mxu1 }
0x1833   : > { %v16687_v27 = vpop.f32.mrb[125].mxu0  ;;  %v16689_v19 = vpop.f32.mrb[107].mxu1  ;;  %13095 = vmatpush3.bf16.msra.mxu0 %v14432_v21 }
0x1834   : > { %v14221_v28 = vpack.i.bf16 %v16683_v54, %v16687_v27  ;;  %v14226_v26 = vpack.i.bf16 %v16685_v47, %v16689_v19 }
0x1836   : > { %14167 = vrot.lane.b32.xlu0 %v14156_v43, %s17349_s26  ;;  %14217 = vrot.lane.b32.xlu1 %v14216_v53, %s17350_s1  ;;  %v16700_v8 = vpop.f32.mrb[126].mxu0  ;;  %v13030_v33 = vpop.f32.mrb[108].mxu1  ;;  %v14431_v43 = vld [vmem:[%s17284_s6 + $0x38] sm:$0xff]  }
0x1837   : > { %v16702_v35 = vpop.f32.mrb[127].mxu0  ;;  %v9284_v31 = vpop.f32.mrb[109].mxu1  ;;  %13112 = vmatprep.subr.bf16.mxu1 %v14431_v43 }
0x1838   : > { %v14231_v36 = vpack.i.bf16 %v16700_v8, %v16702_v35  ;;  %v14236_v37 = vpack.i.bf16 %v13030_v33, %v9284_v31  ;;  %13113 = vmatpush3.bf16.msra.mxu1 %v14431_v43  ;;  %v14433_v31 = vld [vmem:[%s17284_s6 + $0x18] sm:$0xff]  }
0x1839   : > { %13096 = vmatprep.subr.bf16.mxu0 %v14433_v31 }
0x183a   : > { %14172 = vrot.lane.b32.xlu0 %v14171_v24, %s17349_s26  ;;  %14232 = vrot.lane.b32.xlu1 %v14231_v36, %s17350_s1  ;;  %v16711_v39 = vpop.f32.mrb[128].mxu0  ;;  %v16713_v46 = vpop.f32.mrb[110].mxu1 }
0x183b   : > { %v16718_v57 = vpop.f32.mrb[129].mxu0  ;;  %v16720_v62 = vpop.f32.mrb[111].mxu1  ;;  %13097 = vmatpush3.bf16.msra.mxu0 %v14433_v31 }
0x183c   : > { %v14241_v56 = vpack.i.bf16 %v16711_v39, %v16718_v57  ;;  %v14246_v2 = vpack.i.bf16 %v16713_v46, %v16720_v62 }
0x183e   : > { %14187 = vrot.lane.b32.xlu0 %v14176_v22, %s17349_s26  ;;  %14237 = vrot.lane.b32.xlu1 %v14236_v37, %s17350_s1  ;;  %v12996_v6 = vpop.f32.mrb[130].mxu0  ;;  %v13080_v9 = vpop.f32.mrb[112].mxu1 }
0x183f   : > { %v9126_v11 = vpop.f32.mrb[131].mxu0  ;;  %v9540_v16 = vpop.f32.mrb[113].mxu1 }
0x1840   : > { %v14256_v1 = vpack.i.bf16 %v12996_v6, %v9126_v11  ;;  %v14261_v42 = vpack.i.bf16 %v13080_v9, %v9540_v16 }
0x1842   : > { %14192 = vrot.lane.b32.xlu0 %v14191_v0, %s17349_s26  ;;  %14252 = vrot.lane.b32.xlu1 %v14256_v1, %s17344_s22  ;;  %v12999_v22 = vpop.f32.mrb[132].mxu0  ;;  %v13083_v24 = vpop.f32.mrb[114].mxu1 }
0x1843   : > { %v9136_v52 = vpop.f32.mrb[133].mxu0  ;;  %v9550_v14 = vpop.f32.mrb[115].mxu1 }
0x1844   : > { %v14271_v53 = vpack.i.bf16 %v12999_v22, %v9136_v52  ;;  %v14276_v32 = vpack.i.bf16 %v13083_v24, %v9550_v14  ;;  %v16762_v24 = vld [vmem:[%s17284_s6 + $0x60] sm:$0xff]  }
0x1845   : > { %13138 = vmatprep.subr.bf16.mxu1 %v16762_v24  ;;  %v16768_v52 = vld [vmem:[%s17284_s6 + $0x40] sm:$0xff]  }
0x1846   : > { %14197 = vrot.lane.b32.xlu0 %v16671_v29, %s17350_s1  ;;  %14257 = vrot.lane.b32.xlu1 %v14256_v1, %s17349_s26  ;;  %v13002_v0 = vpop.f32.mrb[134].mxu0  ;;  %v13086_v33 = vpop.f32.mrb[116].mxu1 }
0x1847   : > { %v9146_v36 = vpop.f32.mrb[135].mxu0  ;;  %v9560_v37 = vpop.f32.mrb[117].mxu1  ;;  %13122 = vmatprep.subr.bf16.mxu0 %v16768_v52 }
0x1848   : > { %v14286_v38 = vpack.i.bf16 %v13002_v0, %v9146_v36  ;;  %v14291_v55 = vpack.i.bf16 %v13086_v33, %v9560_v37 }
0x184a   : > { %14202 = vrot.lane.b32.xlu0 %v16671_v29, %s17344_s22  ;;  %14262 = vrot.lane.b32.xlu1 %v14261_v42, %s17344_s22  ;;  %v13005_v3 = vpop.f32.mrb[136].mxu0  ;;  %v13089_v4 = vpop.f32.mrb[118].mxu1 }
0x184b   : > { %v9156_v6 = vpop.f32.mrb[137].mxu0  ;;  %v9570_v9 = vpop.f32.mrb[119].mxu1 }
0x184c   : > { %v14301_v11 = vpack.i.bf16 %v13005_v3, %v9156_v6  ;;  %v14346_v16 = vpack.i.bf16 %v13089_v4, %v9570_v9 }
0x184e   : > { %14207 = vrot.lane.b32.xlu0 %v16671_v29, %s17349_s26  ;;  %14267 = vrot.lane.b32.xlu1 %v14271_v53, %s17344_s22  ;;  %v13052_v1 = vpop.f32.mrb[138].mxu0 }
0x184f   : > { %v9402_v43 = vpop.f32.mrb[139].mxu0 }
0x1850   : > { %v14311_v22 = vpack.i.bf16 %v13052_v1, %v9402_v43 }
0x1852   : > { %14222 = vrot.lane.b32.xlu0 %v14221_v28, %s17350_s1  ;;  %14277 = vrot.lane.b32.xlu1 %v14276_v32, %s17344_s22  ;;  %v13055_v42 = vpop.f32.mrb[140].mxu0 }
0x1853   : > { %v9412_v21 = vpop.f32.mrb[141].mxu0 }
0x1854   : > { %v14321_v29 = vpack.i.bf16 %v13055_v42, %v9412_v21 }
0x1856   : > { %14227 = vrot.lane.b32.xlu0 %v14226_v26, %s17350_s1  ;;  %14282 = vrot.lane.b32.xlu1 %v14286_v38, %s17344_s22  ;;  %v13058_v28 = vpop.f32.mrb[142].mxu0 }
0x1857   : > { %v9422_v14 = vpop.f32.mrb[143].mxu0 }
0x1858   : > { %v14331_v32 = vpack.i.bf16 %v13058_v28, %v9422_v14 }
0x185a   : > { %14242 = vrot.lane.b32.xlu0 %v14241_v56, %s17350_s1  ;;  %14287 = vrot.lane.b32.xlu1 %v14286_v38, %s17349_s26  ;;  %v13061_v0 = vpop.f32.mrb[144].mxu0 }
0x185b   : > { %v9432_v33 = vpop.f32.mrb[145].mxu0 }
0x185c   : > { %v14341_v31 = vpack.i.bf16 %v13061_v0, %v9432_v33 }
0x185e   : > { %14247 = vrot.lane.b32.xlu0 %v14246_v2, %s17350_s1  ;;  %14292 = vrot.lane.b32.xlu1 %v14291_v55, %s17344_s22 }
0x1862   : > { %14272 = vrot.lane.b32.xlu0 %v14271_v53, %s17349_s26  ;;  %14297 = vrot.lane.b32.xlu1 %v14301_v11, %s17344_s22 }
0x1866   : > { %14302 = vrot.lane.b32.xlu0 %v14301_v11, %s17349_s26  ;;  %14307 = vrot.lane.b32.xlu1 %v14311_v22, %s17350_s1 }
0x186a   : > { %14312 = vrot.lane.b32.xlu1 %v14311_v22, %s17344_s22  ;;  %14317 = vrot.lane.b32.xlu0 %v14321_v29, %s17350_s1 }
0x186e   : > { %14322 = vrot.lane.b32.xlu0 %v14321_v29, %s17344_s22  ;;  %14327 = vrot.lane.b32.xlu1 %v14331_v32, %s17350_s1 }
0x1872   : > { %14332 = vrot.lane.b32.xlu1 %v14331_v32, %s17344_s22  ;;  %14337 = vrot.lane.b32.xlu0 %v14341_v31, %s17350_s1  ;;  %s17093_s1 = scalar_lea.hbm %s17293_s15, %s11432_s21 }
0x1876   : > { %14347 = vrot.lane.b32.xlu1 %v14346_v16, %s17344_s22  ;;  %14342 = vrot.lane.b32.xlu0 %v14341_v31, %s17344_s22 }
0x1884   : > { %v16798_v47 = vpop.permute.xlu1 %14112 }
0x1888   : > { %v16800_v19 = vpop.permute.xlu0 %14117 }
0x188c   : > { %v16802_v26 = vpop.permute.xlu1 %14122 }
0x1890   : > { %v14128_v46 = vpop.permute.xlu0 %14127 }
0x1891   : > { %v14130_v62 = vunpack.i.h.bf16 %v14128_v46  ;;  %v14129_v56 = vunpack.i.l.bf16 %v14128_v46 }
0x1893   : > { %v16806_v2 = vsel %vm2220_vm2, %v16663_v5, %v14129_v56  ;;  %v16810_v53 = vsel %vm2220_vm2, %v16659_v25, %v14130_v62 }
0x1894   : > { %v14138_v36 = vpop.permute.xlu1 %14137  ;;  %v14133_v37 = vpop.permute.xlu0 %14132 }
0x1895   : > { %v14135_v1 = vunpack.i.h.bf16 %v14133_v37  ;;  %v14134_v43 = vunpack.i.l.bf16 %v14133_v37 }
0x1898   : > { %v14143_v38 = vpop.permute.xlu1 %14142  ;;  %v14148_v55 = vpop.permute.xlu0 %14147 }
0x1899   : > { %v14150_v3 = vunpack.i.h.bf16 %v14148_v55  ;;  %v14149_v4 = vunpack.i.l.bf16 %v14148_v55  ;;  %v14145_v28 = vunpack.i.h.bf16 %v14143_v38  ;;  %v14144_v14 = vunpack.i.l.bf16 %v14143_v38 }
0x189b   : > { %v16814_v6 = vsel %vm2220_vm2, %v16677_v51, %v14149_v4  ;;  %v16818_v9 = vsel %vm2220_vm2, %v16675_v30, %v14150_v3  ;;  %v9676_v51 = vsel %vm2220_vm2, %v16597_v20, %v14135_v1  ;;  %v9675_v30 = vsel %vm2220_vm2, %v16599_v41, %v14134_v43 }
0x189c   : > { %v16820_v5 = vpop.permute.xlu1 %14177  ;;  %v16822_v11 = vpop.permute.xlu0 %14152 }
0x18a0   : > { %v14183_v25 = vpop.permute.xlu1 %14182  ;;  %v16824_v16 = vpop.permute.xlu0 %14157 }
0x18a1   : > { %v14185_v43 = vunpack.i.h.bf16 %v14183_v25 }
0x18a4   : > { %v16826_v22 = vpop.permute.xlu0 %14162  ;;  %v14213_v42 = vpop.permute.xlu1 %14212 }
0x18a5   : > { %v14215_v21 = vunpack.i.h.bf16 %v14213_v42  ;;  %v14214_v29 = vunpack.i.l.bf16 %v14213_v42  ;;  %v14184_v42 = vunpack.i.l.bf16 %v14183_v25 }
0x18a7   : > { %v9684_v32 = vsel %vm2223_vm3, %v9676_v51, %v14215_v21  ;;  %v9683_v0 = vsel %vm2223_vm3, %v9675_v30, %v14214_v29 }
0x18a8   : > { %v16834_v33 = vpop.permute.xlu0 %14167  ;;  %v16836_v31 = vpop.permute.xlu1 %14217  ;;  %v9691_v46 = vsel %vm652_vm0, %v9683_v0, %v14144_v14  ;;  %v9692_v62 = vsel %vm652_vm0, %v9684_v32, %v14145_v28  ;;  %v14115_v28 = vunpack.i.h.bf16 %v16798_v47  ;;  %v14114_v14 = vunpack.i.l.bf16 %v16798_v47 }
0x18a9   : > { %v9707_v56 = vpack.c.bf16 %v9692_v62, %v9691_v46  ;;  %v14140_v32 = vunpack.i.h.bf16 %v14138_v36  ;;  %v14139_v0 = vunpack.i.l.bf16 %v14138_v36 }
0x18aa   : > { %v9925_v47 = vsel %vm2220_vm2, %v16617_v12, %v14115_v28 }
0x18ab   : > { %13098 = vmatprep.mubr.msk.bf16.mxu0 %vm766_vm1, %v9707_v56  ;;  %v9924_v56 = vsel %vm2220_vm2, %v16621_v15, %v14114_v14 }
0x18ac   : > { %v14173_v20 = vpop.permute.xlu0 %14172  ;;  %v14233_v37 = vpop.permute.xlu1 %14232 }
0x18ad   : > { %v14175_v41 = vunpack.i.h.bf16 %v14173_v20  ;;  %v14174_v55 = vunpack.i.l.bf16 %v14173_v20  ;;  %v14235_v38 = vunpack.i.h.bf16 %v14233_v37  ;;  %v14234_v3 = vunpack.i.l.bf16 %v14233_v37 }
0x18ae   : > { %v9932_v37 = vsel %vm2223_vm3, %v9924_v56, %v14139_v0 }
0x18af   : > { %v9680_v4 = vsel %vm2220_vm2, %v16607_v49, %v14175_v41  ;;  %v9679_v1 = vsel %vm2220_vm2, %v16609_v50, %v14174_v55  ;;  %v9933_v41 = vsel %vm2223_vm3, %v9925_v47, %v14140_v32  ;;  %v14155_v47 = vunpack.i.h.bf16 %v16822_v11 }
0x18b0   : > { %v9688_v21 = vsel %vm2223_vm3, %v9680_v4, %v14235_v38  ;;  %v9687_v29 = vsel %vm2223_vm3, %v9679_v1, %v14234_v3  ;;  %v16847_v51 = vpop.permute.xlu0 %14187  ;;  %v16849_v30 = vpop.permute.xlu1 %14237 }
0x18b1   : > { %v16854_v49 = vsel %vm652_vm0, %v9687_v29, %v14184_v42  ;;  %v16857_v50 = vsel %vm652_vm0, %v9688_v21, %v14185_v43  ;;  %v14120_v43 = vunpack.i.h.bf16 %v16800_v19  ;;  %v14119_v42 = vunpack.i.l.bf16 %v16800_v19 }
0x18b2   : > { %v9709_v25 = vpack.c.bf16 %v16857_v50, %v16854_v49  ;;  %v14160_v21 = vunpack.i.h.bf16 %v16824_v16  ;;  %v14159_v29 = vunpack.i.l.bf16 %v16824_v16  ;;  %v14439_v49 = vld [vmem:[%s17284_s6 + $0x50] sm:$0xff]  }
0x18b3   : > { %v9926_v32 = vsel %vm2220_vm2, %v16637_v40, %v14119_v42  ;;  %v9927_v0 = vsel %vm2220_vm2, %v16633_v59, %v14120_v43  ;;  %v14436_v59 = vld [vmem:[%s17284_s6 + $0x68] sm:$0xff]  }
0x18b4   : > { %v16861_v46 = vpop.permute.xlu0 %14192  ;;  %v14253_v62 = vpop.permute.xlu1 %14252  ;;  %v9935_v19 = vsel %vm2223_vm3, %v9927_v0, %v14160_v21  ;;  %v9678_v21 = vsel %vm2220_vm2, %v16602_v44, %v14155_v47  ;;  %v14179_v0 = vunpack.i.l.bf16 %v16820_v5 }
0x18b5   : > { %v14255_v20 = vunpack.i.h.bf16 %v14253_v62  ;;  %v14254_v36 = vunpack.i.l.bf16 %v14253_v62 }
0x18b7   : > { %v9941_v55 = vsel %vm652_vm0, %v9933_v41, %v14255_v20  ;;  %v9940_v38 = vsel %vm652_vm0, %v9932_v37, %v14254_v36  ;;  %v14154_v20 = vunpack.i.l.bf16 %v16822_v11  ;;  %v9934_v36 = vsel %vm2223_vm3, %v9926_v32, %v14159_v29 }
0x18b8   : > { %v9957_v3 = vpack.c.bf16 %v9941_v55, %v9940_v38  ;;  %v16871_v4 = vpop.permute.xlu0 %14197  ;;  %v16873_v1 = vpop.permute.xlu1 %14257  ;;  %v14125_v41 = vunpack.i.h.bf16 %v16802_v26  ;;  %v14124_v11 = vunpack.i.l.bf16 %v16802_v26  ;;  %v14164_v32 = vunpack.i.l.bf16 %v16826_v22 }
0x18b9   : > { %v9677_v29 = vsel %vm2220_vm2, %v16604_v63, %v14154_v20 }
0x18ba   : > { %13114 = vmatprep.mubr.msk.bf16.mxu1 %vm766_vm1, %v9957_v3  ;;  %v14180_v3 = vunpack.i.h.bf16 %v16820_v5  ;;  %v9929_v5 = vsel %vm2220_vm2, %v16647_v34, %v14125_v41 }
0x18bc   : > { %v16876_v15 = vpop.permute.xlu0 %14202  ;;  %v16878_v12 = vpop.permute.xlu1 %14262 }
0x18c0   : > { %v16884_v28 = vpop.permute.xlu0 %14207  ;;  %v14268_v14 = vpop.permute.xlu1 %14267 }
0x18c1   : > { %v14270_v62 = vunpack.i.h.bf16 %v14268_v14  ;;  %v14269_v56 = vunpack.i.l.bf16 %v14268_v14  ;;  %v14165_v14 = vunpack.i.h.bf16 %v16826_v22  ;;  %v9928_v22 = vsel %vm2220_vm2, %v16651_v18, %v14124_v11 }
0x18c3   : > { %v9943_v16 = vsel %vm652_vm0, %v9935_v19, %v14270_v62  ;;  %v9942_v37 = vsel %vm652_vm0, %v9934_v36, %v14269_v56  ;;  %v14438_v36 = vld [vmem:[%s17284_s6 + $0x70] sm:$0xff]  }
0x18c4   : > { %v9958_v40 = vpack.c.bf16 %v9943_v16, %v9942_v37  ;;  %v14223_v55 = vpop.permute.xlu0 %14222  ;;  %v16897_v38 = vpop.permute.xlu1 %14277  ;;  %v9937_v16 = vsel %vm2223_vm3, %v9929_v5, %v14180_v3  ;;  %v14195_v37 = vunpack.i.h.bf16 %v16861_v46  ;;  %v14199_v5 = vunpack.i.l.bf16 %v16871_v4 }
0x18c5   : > { %v14225_v43 = vunpack.i.h.bf16 %v14223_v55  ;;  %v14224_v42 = vunpack.i.l.bf16 %v14223_v55  ;;  %v9936_v55 = vsel %vm2223_vm3, %v9928_v22, %v14179_v0  ;;  %v14239_v22 = vunpack.i.l.bf16 %v16849_v30 }
0x18c6   : > { %13115 = vmatmul.mubr.msk.bf16.vlgmr.msra.gmra.mrb[120].mxu1 %vm766_vm1, %v9958_v40  ;;  %v14194_v40 = vunpack.i.l.bf16 %v16861_v46  ;;  %v14440_v46 = vld [vmem:[%s17284_s6 + $0x78] sm:$0xff]   ;;  %v9682_v50 = vsel %vm2220_vm2, %v16612_v7, %v14195_v37  ;;  %v14170_v7 = vunpack.i.h.bf16 %v16834_v33 }
0x18c7   : > { %v9686_v26 = vsel %vm2223_vm3, %v9678_v21, %v14225_v43  ;;  %v9685_v62 = vsel %vm2223_vm3, %v9677_v29, %v14224_v42  ;;  %13139 = vmatpush3.bf16.msra.mxu1 %v16762_v24  ;;  %v14437_v24 = vld [vmem:[%s17284_s6 + $0x48] sm:$0xff]   ;;  %v14190_v29 = vunpack.i.h.bf16 %v16847_v51 }
0x18c8   : > { %v9694_v56 = vsel %vm652_vm0, %v9686_v26, %v14165_v14  ;;  %v9693_v44 = vsel %vm652_vm0, %v9685_v62, %v14164_v32  ;;  %v16917_v47 = vpop.permute.xlu0 %14227  ;;  %v14283_v63 = vpop.permute.xlu1 %14282  ;;  %13140 = vmatprep.subr.bf16.mxu1 %v14436_v59  ;;  %v14189_v14 = vunpack.i.l.bf16 %v16847_v51  ;;  %v14169_v26 = vunpack.i.l.bf16 %v16834_v33 }
0x18c9   : > { %v9708_v20 = vpack.c.bf16 %v9694_v56, %v9693_v44  ;;  %v14285_v19 = vunpack.i.h.bf16 %v14283_v63  ;;  %v14284_v18 = vunpack.i.l.bf16 %v14283_v63  ;;  %v14220_v51 = vunpack.i.h.bf16 %v16836_v31 }
0x18ca   : > { %v14219_v44 = vunpack.i.l.bf16 %v16836_v31  ;;  %v14240_v63 = vunpack.i.h.bf16 %v16849_v30  ;;  %v14200_v33 = vunpack.i.h.bf16 %v16871_v4  ;;  %v10178_v31 = vsel %vm2220_vm2, %v16700_v8, %v14190_v29 }
0x18cb   : > { %v9945_v34 = vsel %vm652_vm0, %v9937_v16, %v14285_v19  ;;  %13099 = vmatmul.mubr.msk.bf16.vlgmr.msra.gmra.mrb[148].mxu0 %vm766_vm1, %v9708_v20  ;;  %13141 = vmatpush3.bf16.msra.mxu1 %v14436_v59  ;;  %v9944_v41 = vsel %vm652_vm0, %v9936_v55, %v14284_v18  ;;  %v14204_v59 = vunpack.i.l.bf16 %v16876_v15  ;;  %v14441_v19 = vld [vmem:[%s17284_s6 + $0x58] sm:$0xff]   ;;  %v10175_v30 = vsel %vm2220_vm2, %v16687_v27, %v14169_v26 }
0x18cc   : > { %13102 = vmatprep.mubr.msk.bf16.mxu0 %vm766_vm1, %v9709_v25  ;;  %v14243_v11 = vpop.permute.xlu0 %14242  ;;  %v16940_v3 = vpop.permute.xlu1 %14287  ;;  %13123 = vmatpush3.bf16.msra.mxu0 %v16768_v52  ;;  %v9959_v43 = vpack.c.bf16 %v9945_v34, %v9944_v41  ;;  %v9681_v25 = vsel %vm2220_vm2, %v16614_v10, %v14194_v40  ;;  %v14205_v52 = vunpack.i.h.bf16 %v16876_v15  ;;  %v10176_v4 = vsel %vm2220_vm2, %v16683_v54, %v14170_v7 }
0x18cd   : > { %v14245_v42 = vunpack.i.h.bf16 %v14243_v11  ;;  %v14244_v21 = vunpack.i.l.bf16 %v14243_v11  ;;  %13124 = vmatprep.subr.bf16.mxu0 %v14437_v24  ;;  %13142 = vmatprep.subr.bf16.mxu1 %v14438_v36  ;;  %v14259_v16 = vunpack.i.l.bf16 %v16873_v1  ;;  %v10181_v8 = vsel %vm2223_vm3, %v16814_v6, %v14219_v44 }
0x18ce   : > { %13118 = vmatprep.mubr.msk.bf16.mxu1 %vm766_vm1, %v9959_v43  ;;  %v16993_v27 = vsel %vm2223_vm3, %v10178_v31, %v14240_v63  ;;  %v9938_v34 = vsel %vm2223_vm3, %v16806_v2, %v14199_v5  ;;  %v14230_v6 = vunpack.i.h.bf16 %v16917_v47  ;;  %v14265_v43 = vunpack.i.h.bf16 %v16878_v12 }
0x18cf   : > { %v9690_v32 = vsel %vm2223_vm3, %v9682_v50, %v14245_v42  ;;  %v9689_v0 = vsel %vm2223_vm3, %v9681_v25, %v14244_v21  ;;  %13143 = vmatpush3.bf16.msra.mxu1 %v14438_v36  ;;  %v14260_v36 = vunpack.i.h.bf16 %v16873_v1  ;;  %v9939_v1 = vsel %vm2223_vm3, %v16810_v53, %v14200_v33 }
0x18d0   : > { %v16962_v10 = vpop.permute.xlu0 %14247  ;;  %v16964_v62 = vpop.permute.xlu1 %14292  ;;  %v9697_v15 = vsel %vm652_vm0, %v9689_v0, %v14204_v59  ;;  %v9698_v56 = vsel %vm652_vm0, %v9690_v32, %v14205_v52  ;;  %13125 = vmatpush3.bf16.msra.mxu0 %v14437_v24  ;;  %13144 = vmatprep.subr.bf16.mxu1 %v14440_v46  ;;  %v10177_v24 = vsel %vm2220_vm2, %v16702_v35, %v14189_v14  ;;  %v14229_v53 = vunpack.i.l.bf16 %v16917_v47 }
0x18d1   : > { %13126 = vmatprep.subr.bf16.mxu0 %v14439_v49  ;;  %v9710_v20 = vpack.c.bf16 %v9698_v56, %v9697_v15  ;;  %v10182_v35 = vsel %vm2223_vm3, %v16818_v9, %v14220_v51  ;;  %v16996_v54 = vsel %vm2223_vm3, %v10177_v24, %v14239_v22  ;;  %v10415_v9 = vsel %vm2220_vm2, %v16619_v13, %v14260_v36 }
0x18d2   : > { %v14210_v13 = vunpack.i.h.bf16 %v16884_v28  ;;  %v14209_v52 = vunpack.i.l.bf16 %v16884_v28  ;;  %v14280_v59 = vunpack.i.h.bf16 %v16897_v38  ;;  %v14279_v47 = vunpack.i.l.bf16 %v16897_v38 }
0x18d3   : > { %13145 = vmatpush3.bf16.msra.mxu1 %v14440_v46  ;;  %13103 = vmatmul.mubr.msk.bf16.gmra.mrb[152].mxu0 %vm766_vm1, %v9710_v20  ;;  %v10414_v46 = vsel %vm2220_vm2, %v16623_v60, %v14259_v16  ;;  %v10184_v14 = vsel %vm2223_vm3, %v10176_v4, %v14230_v6  ;;  %v10183_v0 = vsel %vm2223_vm3, %v10175_v30, %v14229_v53  ;;  %v14290_v7 = vunpack.i.h.bf16 %v16940_v3 }
0x18d4   : > { %v14273_v37 = vpop.permute.xlu0 %14272  ;;  %v14298_v40 = vpop.permute.xlu1 %14297  ;;  %13127 = vmatpush3.bf16.msra.mxu0 %v14439_v49  ;;  %v14264_v49 = vunpack.i.l.bf16 %v16878_v12  ;;  %v14289_v33 = vunpack.i.l.bf16 %v16940_v3 }
0x18d5   : > { %v14300_v18 = vunpack.i.h.bf16 %v14298_v40  ;;  %v14299_v55 = vunpack.i.l.bf16 %v14298_v40  ;;  %13128 = vmatprep.subr.bf16.mxu0 %v14441_v19  ;;  %v14275_v60 = vunpack.i.h.bf16 %v14273_v37  ;;  %v14274_v29 = vunpack.i.l.bf16 %v14273_v37 }
0x18d6   : > { %v10419_v4 = vsel %vm2220_vm2, %v16644_v58, %v14290_v7  ;;  %v14295_v58 = vunpack.i.h.bf16 %v16964_v62 }
0x18d7   : > { %v9947_v41 = vsel %vm652_vm0, %v9939_v1, %v14300_v18  ;;  %v9946_v11 = vsel %vm652_vm0, %v9938_v34, %v14299_v55  ;;  %v10417_v5 = vsel %vm2220_vm2, %v16631_v17, %v14275_v60  ;;  %v10416_v20 = vsel %vm2220_vm2, %v16635_v61, %v14274_v29 }
0x18d8   : > { %v9960_v42 = vpack.c.bf16 %v9947_v41, %v9946_v11  ;;  %v17011_v21 = vpop.permute.xlu0 %14302  ;;  %v14308_v2 = vpop.permute.xlu1 %14307  ;;  %13129 = vmatpush3.bf16.msra.mxu0 %v14441_v19  ;;  %v10418_v55 = vsel %vm2220_vm2, %v16649_v45, %v14289_v33  ;;  %v14250_v1 = vunpack.i.h.bf16 %v16962_v10 }
0x18d9   : > { %v14310_v50 = vunpack.i.h.bf16 %v14308_v2  ;;  %v14309_v25 = vunpack.i.l.bf16 %v14308_v2  ;;  %v14304_v45 = vunpack.i.l.bf16 %v17011_v21 }
0x18da   : > { %13119 = vmatmul.mubr.msk.bf16.gmra.mrb[124].mxu1 %vm766_vm1, %v9960_v42 }
0x18db   : > { %v10423_v32 = vsel %vm2223_vm3, %v10415_v9, %v14310_v50  ;;  %v10422_v12 = vsel %vm2223_vm3, %v10414_v46, %v14309_v25  ;;  %v14294_v9 = vunpack.i.l.bf16 %v16964_v62  ;;  %v14305_v46 = vunpack.i.h.bf16 %v17011_v21 }
0x18dc   : > { %v14313_v26 = vpop.permute.xlu1 %14312  ;;  %v14318_v15 = vpop.permute.xlu0 %14317  ;;  %v10430_v56 = vsel %vm652_vm0, %v10422_v12, %v14264_v49  ;;  %v10431_v51 = vsel %vm652_vm0, %v10423_v32, %v14265_v43  ;;  %v10180_v62 = vsel %vm2220_vm2, %v16711_v39, %v14210_v13  ;;  %v10420_v32 = vsel %vm2220_vm2, %v16665_v48, %v14304_v45 }
0x18dd   : > { %v14315_v44 = vunpack.i.h.bf16 %v14313_v26  ;;  %v14314_v63 = vunpack.i.l.bf16 %v14313_v26  ;;  %v14320_v22 = vunpack.i.h.bf16 %v14318_v15  ;;  %v14319_v38 = vunpack.i.l.bf16 %v14318_v15 }
0x18de   : > { %v10447_v19 = vpack.c.bf16 %v10431_v51, %v10430_v56 }
0x18df   : > { %v10190_v24 = vsel %vm652_vm0, %v10182_v35, %v14315_v44  ;;  %v10189_v31 = vsel %vm652_vm0, %v10181_v8, %v14314_v63  ;;  %v10425_v36 = vsel %vm2223_vm3, %v10417_v5, %v14320_v22  ;;  %v10424_v30 = vsel %vm2223_vm3, %v10416_v20, %v14319_v38 }
0x18e0   : > { %v10206_v16 = vpack.c.bf16 %v10190_v24, %v10189_v31  ;;  %v10433_v3 = vsel %vm652_vm0, %v10425_v36, %v14280_v59  ;;  %v10432_v17 = vsel %vm652_vm0, %v10424_v30, %v14279_v47  ;;  %13146 = vmatprep.mubr.msk.bf16.mxu1 %vm766_vm1, %v10447_v19  ;;  %v14323_v61 = vpop.permute.xlu0 %14322  ;;  %v14328_v37 = vpop.permute.xlu1 %14327  ;;  %v14249_v59 = vunpack.i.l.bf16 %v16962_v10 }
0x18e1   : > { %v10448_v40 = vpack.c.bf16 %v10433_v3, %v10432_v17  ;;  %v14325_v35 = vunpack.i.h.bf16 %v14323_v61  ;;  %v14324_v18 = vunpack.i.l.bf16 %v14323_v61  ;;  %v14330_v8 = vunpack.i.h.bf16 %v14328_v37 }
0x18e2   : > { %v14329_v34 = vunpack.i.l.bf16 %v14328_v37  ;;  %13130 = vmatprep.mubr.msk.bf16.mxu0 %vm766_vm1, %v10206_v16  ;;  %v10179_v47 = vsel %vm2220_vm2, %v16718_v57, %v14209_v52  ;;  %v10421_v10 = vsel %vm2220_vm2, %v16661_v23, %v14305_v46 }
0x18e3   : > { %v10192_v6 = vsel %vm652_vm0, %v10184_v14, %v14325_v35  ;;  %v10191_v41 = vsel %vm652_vm0, %v10183_v0, %v14324_v18  ;;  %v10427_v11 = vsel %vm2223_vm3, %v10419_v4, %v14330_v8  ;;  %13147 = vmatmul.mubr.msk.bf16.vlgmr.msra.gmra.mrb[128].mxu1 %vm766_vm1, %v10448_v40  ;;  %v10188_v14 = vsel %vm2223_vm3, %v10180_v62, %v14250_v1 }
0x18e4   : > { %v10207_v43 = vpack.c.bf16 %v10192_v6, %v10191_v41  ;;  %v10426_v53 = vsel %vm2223_vm3, %v10418_v55, %v14329_v34  ;;  %v14333_v42 = vpop.permute.xlu1 %14332  ;;  %v14338_v2 = vpop.permute.xlu0 %14337  ;;  %v10435_v25 = vsel %vm652_vm0, %v10427_v11, %v14295_v58 }
0x18e5   : > { %v14335_v49 = vunpack.i.h.bf16 %v14333_v42  ;;  %v14334_v50 = vunpack.i.l.bf16 %v14333_v42  ;;  %v14340_v60 = vunpack.i.h.bf16 %v14338_v2  ;;  %v14339_v29 = vunpack.i.l.bf16 %v14338_v2 }
0x18e6   : > { %13131 = vmatmul.mubr.msk.bf16.vlgmr.msra.gmra.mrb[156].mxu0 %vm766_vm1, %v10207_v43  ;;  %v10434_v21 = vsel %vm652_vm0, %v10426_v53, %v14294_v9 }
0x18e7   : > { %v10194_v39 = vsel %vm652_vm0, %v16993_v27, %v14335_v49  ;;  %v10193_v13 = vsel %vm652_vm0, %v16996_v54, %v14334_v50  ;;  %v10449_v0 = vpack.c.bf16 %v10435_v25, %v10434_v21  ;;  %v10187_v27 = vsel %vm2223_vm3, %v10179_v47, %v14249_v59 }
0x18e8   : > { %v10208_v12 = vpack.c.bf16 %v10194_v39, %v10193_v13  ;;  %v14348_v28 = vpop.permute.xlu1 %14347  ;;  %v14343_v7 = vpop.permute.xlu0 %14342  ;;  %v10429_v54 = vsel %vm2223_vm3, %v10421_v10, %v14340_v60  ;;  %v10428_v23 = vsel %vm2223_vm3, %v10420_v32, %v14339_v29 }
0x18e9   : > { %v14350_v26 = vunpack.i.h.bf16 %v14348_v28  ;;  %v14349_v57 = vunpack.i.l.bf16 %v14348_v28  ;;  %v14345_v52 = vunpack.i.h.bf16 %v14343_v7  ;;  %v14344_v15 = vunpack.i.l.bf16 %v14343_v7  ;;  %13150 = vmatprep.mubr.msk.bf16.mxu1 %vm766_vm1, %v10449_v0 }
0x18ea   : > { %13134 = vmatprep.mubr.msk.bf16.mxu0 %vm766_vm1, %v10208_v12 }
0x18eb   : > { %v10436_v48 = vsel %vm652_vm0, %v10428_v23, %v14349_v57  ;;  %v10437_v56 = vsel %vm652_vm0, %v10429_v54, %v14350_v26  ;;  %v10196_v51 = vsel %vm652_vm0, %v10188_v14, %v14345_v52  ;;  %v10195_v44 = vsel %vm652_vm0, %v10187_v27, %v14344_v15 }
0x18ec   : > { %v10450_v63 = vpack.c.bf16 %v10437_v56, %v10436_v48  ;;  %v10209_v22 = vpack.c.bf16 %v10196_v51, %v10195_v44 }
0x18ee   : > { %13135 = vmatmul.mubr.msk.bf16.gmra.mrb[160].mxu0 %vm766_vm1, %v10209_v22  ;;  %13151 = vmatmul.mubr.msk.bf16.gmra.mrb[132].mxu1 %vm766_vm1, %v10450_v63 }
0x18ef   : > { %14537 = shalt.err (!%p14534_p4)
}
0x18f0   : > { %s14538_s18 = scalar_lea.hbm %s17093_s1, 256  ;;  %s14542_s21 = scalar_lea.hbm %s17293_s15, 512 }
0x18f1   : > { %p14539_p7 = scmp.ne.s32.totalorder %s17093_s1, %s14538_s18  ;;  %p14543_p10 = scmp.lt.u32.totalorder %s17093_s1, %s17293_s15 }
0x18f2   : > { %p14544_p11 = scmp.lt.u32.totalorder %s14542_s21, %s14538_s18  ;;  %p14546_p13 = scmp.lt.u32.totalorder %s14538_s18, %s17093_s1 }
0x18f3   : > { %p14540_p8 = pnand %p14539_p7, %p14768_p5 }
0x18f4   : > { %p14545_p12 = por %p14544_p11, %p14543_p10 }
0x18f5   : > { %p14541_p9 = pneg %p14540_p8 }
0x18f6   : > { %p14547_p0 = por %p14546_p13, %p14545_p12 }
0x18f8   : > { %p14548_p1 = pnand %p14547_p0, %p14541_p9 }
0x18fa   : > { %14551 = shalt.err (!%p14548_p1)
}
0x18fb   : > { %s14632_s24 = smov 128   ;;  %s14633_s8 = smov 8  }
0x18fc   : > { %13784 = dma.vmem_to_hbm [thread:$0]  (%p14768_p5), %s17085_s7, 256, %s17093_s1, %s10576_s19, %s14632_s24, %s14632_s24, %s14633_s8  }
0x18fd   : > { %s10581_s27 = scalar_lea.sflag [#allocation5], %s15520_s25  ;;  %s14552_s29 = scalar_lea.vmem %s17087_s30, 256 }
0x18fe   : > { %p14553_p2 = scmp.ne.s32.totalorder %s17087_s30, %s14552_s29  ;;  %s14634_s20 = smov [#allocation4]  }
0x18ff   : > { %s14556_s9 = sshll.u32 %s14634_s20, 4  ;;  %s14557_s9 = int_to_ptr.vmem [resolvable:$false] %s14556_s9 }
0x1900   : > { %p14554_p3 = pnand %p14553_p2, %p14768_p5  ;;  %s14558_s18 = scalar_lea.vmem %s14557_s9, 512 }
0x1901   : > { %p14559_p7 = scmp.lt.s32.totalorder %s17087_s30, %s14557_s9  ;;  %p14560_p8 = scmp.lt.s32.totalorder %s14558_s18, %s14552_s29 }
0x1902   : > { %p14555_p4 = pneg %p14554_p3 }
0x1903   : > { %p14561_p9 = por %p14560_p8, %p14559_p7 }
0x1905   : > { %p14562_p10 = pnand %p14561_p9, %p14555_p4 }
0x1907   : > { %14565 = shalt.err (!%p14562_p10)
}
0x1908   : > { %s14566_s7 = scalar_lea.hbm %s17098_s23, 256  ;;  %s14570_s17 = scalar_lea.hbm %s17294_s16, 512 }
0x1909   : > { %p14567_p11 = scmp.ne.s32.totalorder %s17098_s23, %s14566_s7  ;;  %p14571_p0 = scmp.lt.u32.totalorder %s17098_s23, %s17294_s16 }
0x190a   : > { %p14572_p1 = scmp.lt.u32.totalorder %s14570_s17, %s14566_s7  ;;  %p14574_p3 = scmp.lt.u32.totalorder %s14566_s7, %s17098_s23 }
0x190b   : > { %p14568_p12 = pnand %p14567_p11, %p14768_p5 }
0x190c   : > { %p14573_p2 = por %p14572_p1, %p14571_p0 }
0x190d   : > { %p14569_p13 = pneg %p14568_p12 }
0x190e   : > { %p14575_p4 = por %p14574_p3, %p14573_p2 }
0x1910   : > { %p14576_p7 = pnand %p14575_p4, %p14569_p13 }
0x1912   : > { %14579 = shalt.err (!%p14576_p7)
}
0x1913   : > { %13785 = dma.vmem_to_hbm [thread:$0]  (%p14768_p5), %s17087_s30, 256, %s17098_s23, %s10581_s27, %s14632_s24, %s14632_s24, %s14633_s8   ;;  %vm9827_vm0 = vcmask 23552  }
0x1914   : > { %s10782_s22 = sshll.u32 %s14751_s0, 5  ;;  %v17158_v38 = vld [vmem:[%s17292_s14] ss:$0 sm:$0xff]  ;;  %s17355_s30 = sld [smem:[#allocation22_spill]] }
0x1915   : > { %p610_p8 = scmp.lt.s32.totalorder %s10782_s22, 63 }
0x1917   : > { %s17368_s22 = smov (!%p610_p8, %s10782_s22), 63 }
0x1918   : > { %s10783_s0 = sshll.u32 %s17368_s22, 3 }
0x191a   : > { %s17171_s23 = scalar_lea.vmem %s17355_s30, %s10783_s0 }
0x1999   : > { %v13116_v33 = vpop.f32.mrb[120].mxu1 }
0x199a   : > { %v10047_v5 = vadd.f32 %v13116_v33, %v17158_v38  ;;  %v10038_v20 = vpop.f32.mrb[121].mxu1 }
0x199b   : > { %v10039_v19 = vadd.f32 %v17158_v38, %v10038_v20  ;;  %v13117_v24 = vpop.f32.mrb[122].mxu1 }
0x199c   : > { %14442 = vtanh.f32 %v10047_v5  ;;  %v10050_v31 = vadd.f32 %v13117_v24, %v17158_v38  ;;  %v10041_v36 = vpop.f32.mrb[123].mxu1 }
0x199d   : > { %14444 = vtanh.f32 %v10039_v19  ;;  %v10042_v30 = vadd.f32 %v17158_v38, %v10041_v36 }
0x199e   : > { %14446 = vtanh.f32 %v10050_v31  ;;  %v13100_v4 = vpop.f32.mrb[148].mxu0 }
0x199f   : > { %14448 = vtanh.f32 %v10042_v30  ;;  %v9797_v16 = vadd.f32 %v13100_v4, %v17158_v38  ;;  %v9788_v3 = vpop.f32.mrb[149].mxu0 }
0x19a0   : > { %v9789_v17 = vadd.f32 %v17158_v38, %v9788_v3  ;;  %v13101_v61 = vpop.f32.mrb[150].mxu0 }
0x19a1   : > { %14450 = vtanh.f32 %v9797_v16  ;;  %v9800_v37 = vadd.f32 %v13101_v61, %v17158_v38  ;;  %v9791_v40 = vpop.f32.mrb[151].mxu0 }
0x19a2   : > { %14452 = vtanh.f32 %v9789_v17  ;;  %v9792_v35 = vadd.f32 %v17158_v38, %v9791_v40 }
0x19a3   : > { %14454 = vtanh.f32 %v9800_v37 }
0x19a4   : > { %14456 = vtanh.f32 %v9792_v35 }
0x19a6   : > { %v14443_v18 = vpop.eup %14442  ;;  %v13104_v55 = vpop.f32.mrb[152].mxu0 }
0x19a7   : > { %v14445_v8 = vpop.eup %14444  ;;  %10079 = vst.msk [vmem:[%s17171_s23 + $0x50] sm:$0xff] %vm9827_vm0, %v14443_v18  ;;  %v9813_v58 = vadd.f32 %v13104_v55, %v17158_v38  ;;  %v9804_v34 = vpop.f32.mrb[153].mxu0 }
0x19a8   : > { %v14447_v1 = vpop.eup %14446  ;;  %10077 = vst.msk [vmem:[%s17171_s23 + $0x40] sm:$0xff] %vm9827_vm0, %v14445_v8  ;;  %v9805_v6 = vadd.f32 %v17158_v38, %v9804_v34  ;;  %v13105_v41 = vpop.f32.mrb[154].mxu0 }
0x19a9   : > { %v14449_v9 = vpop.eup %14448  ;;  %10080 = vst.msk [vmem:[%s17171_s23 + $0x58] sm:$0xff] %vm9827_vm0, %v14447_v1  ;;  %14458 = vtanh.f32 %v9813_v58  ;;  %v9816_v11 = vadd.f32 %v13105_v41, %v17158_v38  ;;  %v9807_v46 = vpop.f32.mrb[155].mxu0 }
0x19aa   : > { %10078 = vst.msk [vmem:[%s17171_s23 + $0x48] sm:$0xff] %vm9827_vm0, %v14449_v9  ;;  %14460 = vtanh.f32 %v9805_v6  ;;  %v9808_v43 = vadd.f32 %v17158_v38, %v9807_v46 }
0x19ab   : > { %v14451_v45 = vpop.eup %14450  ;;  %14462 = vtanh.f32 %v9816_v11 }
0x19ac   : > { %v14453_v53 = vpop.eup %14452  ;;  %9830 = vst.msk [vmem:[%s17171_s23 + $0x10] sm:$0xff] %vm9827_vm0, %v14451_v45  ;;  %14464 = vtanh.f32 %v9808_v43 }
0x19ad   : > { %v14455_v42 = vpop.eup %14454  ;;  %9828 = vst.msk [vmem:[%s17171_s23] sm:$0xff] %vm9827_vm0, %v14453_v53  ;;  %v13120_v2 = vpop.f32.mrb[124].mxu1 }
0x19ae   : > { %v14457_v62 = vpop.eup %14456  ;;  %9831 = vst.msk [vmem:[%s17171_s23 + $0x18] sm:$0xff] %vm9827_vm0, %v14455_v42  ;;  %v10063_v49 = vadd.f32 %v13120_v2, %v17158_v38  ;;  %v10054_v50 = vpop.f32.mrb[125].mxu1 }
0x19af   : > { %9829 = vst.msk [vmem:[%s17171_s23 + $0x8] sm:$0xff] %vm9827_vm0, %v14457_v62  ;;  %v10055_v25 = vadd.f32 %v17158_v38, %v10054_v50  ;;  %v13121_v59 = vpop.f32.mrb[126].mxu1 }
0x19b0   : > { %14466 = vtanh.f32 %v10063_v49  ;;  %v10066_v60 = vadd.f32 %v13121_v59, %v17158_v38  ;;  %v10057_v29 = vpop.f32.mrb[127].mxu1 }
0x19b1   : > { %14468 = vtanh.f32 %v10055_v25  ;;  %v10058_v21 = vadd.f32 %v17158_v38, %v10057_v29 }
0x19b2   : > { %14470 = vtanh.f32 %v10066_v60 }
0x19b3   : > { %14472 = vtanh.f32 %v10058_v21  ;;  %v14459_v47 = vpop.eup %14458 }
0x19b4   : > { %v14461_v14 = vpop.eup %14460  ;;  %9834 = vst.msk [vmem:[%s17171_s23 + $0x30] sm:$0xff] %vm9827_vm0, %v14459_v47 }
0x19b5   : > { %v14463_v39 = vpop.eup %14462  ;;  %9832 = vst.msk [vmem:[%s17171_s23 + $0x20] sm:$0xff] %vm9827_vm0, %v14461_v14 }
0x19b6   : > { %v13148_v13 = vpop.f32.mrb[128].mxu1  ;;  %v14465_v10 = vpop.eup %14464  ;;  %9835 = vst.msk [vmem:[%s17171_s23 + $0x38] sm:$0xff] %vm9827_vm0, %v14463_v39 }
0x19b7   : > { %v10537_v32 = vadd.f32 %v13148_v13, %v17158_v38  ;;  %v10528_v12 = vpop.f32.mrb[129].mxu1  ;;  %9833 = vst.msk [vmem:[%s17171_s23 + $0x28] sm:$0xff] %vm9827_vm0, %v14465_v10 }
0x19b8   : > { %v10529_v0 = vadd.f32 %v17158_v38, %v10528_v12  ;;  %v13149_v28 = vpop.f32.mrb[130].mxu1 }
0x19b9   : > { %14474 = vtanh.f32 %v10537_v32  ;;  %v10540_v7 = vadd.f32 %v13149_v28, %v17158_v38  ;;  %v13132_v26 = vpop.f32.mrb[156].mxu0  ;;  %v10531_v57 = vpop.f32.mrb[131].mxu1 }
0x19ba   : > { %v14467_v52 = vpop.eup %14466  ;;  %14476 = vtanh.f32 %v10529_v0  ;;  %v10296_v15 = vadd.f32 %v13132_v26, %v17158_v38  ;;  %v10532_v27 = vadd.f32 %v17158_v38, %v10531_v57  ;;  %v10287_v54 = vpop.f32.mrb[157].mxu0 }
0x19bb   : > { %v14469_v23 = vpop.eup %14468  ;;  %10083 = vst.msk [vmem:[%s17171_s23 + $0x70] sm:$0xff] %vm9827_vm0, %v14467_v52  ;;  %14478 = vtanh.f32 %v10540_v7  ;;  %v10288_v48 = vadd.f32 %v17158_v38, %v10287_v54  ;;  %v13133_v56 = vpop.f32.mrb[158].mxu0 }
0x19bc   : > { %v14471_v51 = vpop.eup %14470  ;;  %10081 = vst.msk [vmem:[%s17171_s23 + $0x60] sm:$0xff] %vm9827_vm0, %v14469_v23  ;;  %14480 = vtanh.f32 %v10296_v15  ;;  %v10299_v44 = vadd.f32 %v13133_v56, %v17158_v38  ;;  %v10290_v63 = vpop.f32.mrb[159].mxu0 }
0x19bd   : > { %v14473_v22 = vpop.eup %14472  ;;  %10084 = vst.msk [vmem:[%s17171_s23 + $0x78] sm:$0xff] %vm9827_vm0, %v14471_v51  ;;  %14482 = vtanh.f32 %v10532_v27  ;;  %v10291_v33 = vadd.f32 %v17158_v38, %v10290_v63 }
0x19be   : > { %10082 = vst.msk [vmem:[%s17171_s23 + $0x68] sm:$0xff] %vm9827_vm0, %v14473_v22  ;;  %14484 = vtanh.f32 %v10288_v48 }
0x19bf   : > { %14486 = vtanh.f32 %v10299_v44 }
0x19c0   : > { %14488 = vtanh.f32 %v10291_v33 }
0x19c1   : > { %v13136_v5 = vpop.f32.mrb[160].mxu0  ;;  %v13152_v20 = vpop.f32.mrb[132].mxu1 }
0x19c2   : > { %v10312_v19 = vadd.f32 %v13136_v5, %v17158_v38  ;;  %v10553_v24 = vadd.f32 %v13152_v20, %v17158_v38  ;;  %v10303_v31 = vpop.f32.mrb[161].mxu0  ;;  %v10544_v36 = vpop.f32.mrb[133].mxu1 }
0x19c3   : > { %v14475_v30 = vpop.eup %14474  ;;  %v10304_v4 = vadd.f32 %v17158_v38, %v10303_v31  ;;  %v10545_v16 = vadd.f32 %v17158_v38, %v10544_v36  ;;  %v13137_v3 = vpop.f32.mrb[162].mxu0 }
0x19c4   : > { %v13153_v17 = vpop.f32.mrb[134].mxu1  ;;  %v14477_v61 = vpop.eup %14476  ;;  %10569 = vst.msk [vmem:[%s17171_s23 + $0xd0] sm:$0xff] %vm9827_vm0, %v14475_v30  ;;  %14490 = vtanh.f32 %v10312_v19  ;;  %v10315_v37 = vadd.f32 %v13137_v3, %v17158_v38 }
0x19c5   : > { %v10306_v40 = vpop.f32.mrb[163].mxu0  ;;  %v10547_v35 = vpop.f32.mrb[135].mxu1  ;;  %10567 = vst.msk [vmem:[%s17171_s23 + $0xc0] sm:$0xff] %vm9827_vm0, %v14477_v61  ;;  %14492 = vtanh.f32 %v10553_v24  ;;  %v10556_v8 = vadd.f32 %v13153_v17, %v17158_v38 }
0x19c6   : > { %v14479_v18 = vpop.eup %14478  ;;  %14494 = vtanh.f32 %v10304_v4  ;;  %v10307_v1 = vadd.f32 %v17158_v38, %v10306_v40  ;;  %v10548_v34 = vadd.f32 %v17158_v38, %v10547_v35 }
0x19c7   : > { %v14481_v55 = vpop.eup %14480  ;;  %10570 = vst.msk [vmem:[%s17171_s23 + $0xd8] sm:$0xff] %vm9827_vm0, %v14479_v18  ;;  %14496 = vtanh.f32 %v10545_v16 }
0x19c8   : > { %v14483_v58 = vpop.eup %14482  ;;  %10328 = vst.msk [vmem:[%s17171_s23 + $0x90] sm:$0xff] %vm9827_vm0, %v14481_v55  ;;  %14498 = vtanh.f32 %v10315_v37 }
0x19c9   : > { %v14485_v9 = vpop.eup %14484  ;;  %10568 = vst.msk [vmem:[%s17171_s23 + $0xc8] sm:$0xff] %vm9827_vm0, %v14483_v58  ;;  %14500 = vtanh.f32 %v10556_v8 }
0x19ca   : > { %v14487_v6 = vpop.eup %14486  ;;  %10326 = vst.msk [vmem:[%s17171_s23 + $0x80] sm:$0xff] %vm9827_vm0, %v14485_v9  ;;  %14502 = vtanh.f32 %v10307_v1 }
0x19cb   : > { %v14489_v41 = vpop.eup %14488  ;;  %10329 = vst.msk [vmem:[%s17171_s23 + $0x98] sm:$0xff] %vm9827_vm0, %v14487_v6  ;;  %14504 = vtanh.f32 %v10548_v34 }
0x19cc   : > { %10327 = vst.msk [vmem:[%s17171_s23 + $0x88] sm:$0xff] %vm9827_vm0, %v14489_v41 }
0x19ce   : > { %v14491_v38 = vpop.eup %14490 }
0x19cf   : > { %v14493_v11 = vpop.eup %14492  ;;  %10332 = vst.msk [vmem:[%s17171_s23 + $0xb0] sm:$0xff] %vm9827_vm0, %v14491_v38 }
0x19d0   : > { %v14495_v46 = vpop.eup %14494  ;;  %10573 = vst.msk [vmem:[%s17171_s23 + $0xf0] sm:$0xff] %vm9827_vm0, %v14493_v11 }
0x19d1   : > { %v14497_v45 = vpop.eup %14496  ;;  %10330 = vst.msk [vmem:[%s17171_s23 + $0xa0] sm:$0xff] %vm9827_vm0, %v14495_v46 }
0x19d2   : > { %v14499_v43 = vpop.eup %14498  ;;  %10571 = vst.msk [vmem:[%s17171_s23 + $0xe0] sm:$0xff] %vm9827_vm0, %v14497_v45 }
0x19d3   : > { %v14501_v53 = vpop.eup %14500  ;;  %10333 = vst.msk [vmem:[%s17171_s23 + $0xb8] sm:$0xff] %vm9827_vm0, %v14499_v43 }
0x19d4   : > { %v14503_v42 = vpop.eup %14502  ;;  %10574 = vst.msk [vmem:[%s17171_s23 + $0xf8] sm:$0xff] %vm9827_vm0, %v14501_v53 }
0x19d5   : > { %v14505_v2 = vpop.eup %14504  ;;  %10331 = vst.msk [vmem:[%s17171_s23 + $0xa8] sm:$0xff] %vm9827_vm0, %v14503_v42 }
0x19d6   : > { %10572 = vst.msk [vmem:[%s17171_s23 + $0xe8] sm:$0xff] %vm9827_vm0, %v14505_v2 }
0x19d7 PF: > { %s17356_s24 = sld [smem:[#allocation11_spill]]  ;;  %s17357_s8 = sld [smem:[#allocation8_spill]] }
0x19dd   : > { %p13795_p5 = scmp.ge.s32.totalorder %s17356_s24, 2  ;;  %s10643_s20 = sand.u32 1, %s17357_s8  }
0x19de   : > { %s10644_s9 = scalar_lea.sflag [#allocation3], %s10643_s20 }
0x19df   : > { %p13789_p9 = pnand %p13795_p5, %p14772_p6 }
0x19e1   : > { %14597 = dma.done.wait (!%p13789_p9), %s10644_s9, 256  }
0x19e2   : > { %14599 = vsyncadd (!%p13789_p9), %s10644_s9, 4294967040  ;;  %s10653_s18 = scalar_lea.sflag [#allocation5], %s10643_s20 }
0x19e3   : > { %14601 = dma.done.wait (!%p13789_p9), %s10653_s18, 256  }
0x19e4   : > { %14603 = vsyncadd (!%p13789_p9), %s10653_s18, 4294967040  ;;  %s17359_s30 = sld [smem:[#allocation12_spill]]  ;;  %s17360_s27 = sld [smem:[#allocation9_spill]] }
0x19e5   : > { %s17361_s28 = sld [smem:[#allocation10_spill]]  ;;  %s17362_s29 = sld [smem:[#allocation13_spill]] }
0x19ea   : > { %p32_p10 = scmp.ge.s32.totalorder %s17359_s30, 4  }
0x19ec   :  { %34 = sbr.rel (!%p32_p10) target bundleno = 14 (0xe), region = 202 }
0x19f3   :  { %10674 = vsyncpa [#allocation3], 1 }
0x19f4   :  { %10676 = vsyncpa [#allocation3 + $0x1], 1 }
0x19f5   :  { %10677 = vsyncpa [#allocation5], 1 }
0x19f6   :  { %10679 = vsyncpa [#allocation5 + $0x1], 1 }

</bundles_post_ra>
